<compile_context>
chip_gen: v7x
topology: tpu7x:2x2x1
jax: 0.10.0
libtpu: 0.0.40
codegen_flags: <defaults>
</compile_context>

<pallas_src>
import functools

import jax
import jax.numpy as jnp
from jax import lax
from jax.experimental import pallas as pl
from jax.experimental.pallas import tpu as pltpu


def _round_up(n, m):
    return ((n + m - 1) // m) * m


def lstm_kernel(*refs, num_layers, hidden_pad, compute_dtype):
    # inputs : x(T,B,I), h0(L,B,Hp), c0(L,B,Hp),
    #          per layer: w_ih(D_in,4Hp), w_hh(Hp,4Hp), bias(1,4Hp),
    #          w_out(Hp,Op), b_out(1,Op)
    # outputs: out(L,B,Op), h_out(L,B,Hp), c_out(L,B,Hp)
    # scratch: seq_buf(T,B,Hp) compute_dtype, gx_buf(T,B,4Hp) f32
    L = num_layers
    Hp = hidden_pad
    cdt = compute_dtype

    x_ref, h0_ref, c0_ref = refs[0], refs[1], refs[2]
    w_refs = refs[3:3 + 3 * L]
    w_out_ref = refs[3 + 3 * L]
    b_out_ref = refs[4 + 3 * L]
    out_ref, h_out_ref, c_out_ref = refs[5 + 3 * L:8 + 3 * L]
    seq_buf = refs[8 + 3 * L]
    gx_buf = refs[9 + 3 * L]

    T = x_ref.shape[0]
    B = x_ref.shape[1]

    h_finals = []

    for layer in range(L):
        w_ih = w_refs[3 * layer][...]          # (D_in, 4Hp) compute dtype
        w_hh = w_refs[3 * layer + 1][...]      # (Hp,   4Hp) compute dtype
        bias = w_refs[3 * layer + 2][...]      # (1,    4Hp) f32 (b_ih + b_hh, padded)

        # ---- hoisted input projection: one big matmul per layer, bias folded in ----
        if layer == 0:
            inp = x_ref[...]                   # (T, B, I)
        else:
            inp = seq_buf[...]                 # (T, B, Hp) -- previous layer's outputs
        gx = jnp.dot(inp.reshape(T * B, inp.shape[-1]), w_ih,
                     preferred_element_type=jnp.float32) + bias      # (T*B, 4Hp) f32
        gx_buf[...] = gx.reshape(T, B, 4 * Hp)

        h_init = h0_ref[layer]                 # (B, Hp) f32
        c_init = c0_ref[layer]                 # (B, Hp) f32
        last_layer = (layer == L - 1)

        def step(t, carry, _w_hh=w_hh, _last=last_layer):
            h, c = carry                       # f32 (B, Hp)
            # only the hidden projection sits on the serial critical path
            gates = gx_buf[t] + jnp.dot(h.astype(cdt), _w_hh,
                                        preferred_element_type=jnp.float32)  # (B, 4Hp)
            # 128-lane-aligned gate slices (Hp is a multiple of 128)
            i_g = jax.nn.sigmoid(gates[:, 0 * Hp:1 * Hp])
            f_g = jax.nn.sigmoid(gates[:, 1 * Hp:2 * Hp])
            g_g = jnp.tanh(gates[:, 2 * Hp:3 * Hp])
            o_g = jax.nn.sigmoid(gates[:, 3 * Hp:4 * Hp])
            c_new = f_g * c + i_g * g_g
            h_new = o_g * jnp.tanh(c_new)
            if not _last:                      # last layer's per-t outputs are never read
                seq_buf[t] = h_new.astype(cdt)
            return (h_new, c_new)

        h_fin, c_fin = lax.fori_loop(0, T, step, (h_init, c_init), unroll=True)
        h_out_ref[layer] = h_fin
        c_out_ref[layer] = c_fin
        h_finals.append(h_fin)

    # ---- fused output projection: one matmul over all layers' final hidden states ----
    h_stack = jnp.concatenate(h_finals, axis=0)                       # (L*B, Hp) f32
    out = (jnp.dot(h_stack.astype(cdt), w_out_ref[...],
                   preferred_element_type=jnp.float32)
           + b_out_ref[...])                                          # (L*B, Op) f32
    out_ref[...] = out.reshape(L, B, out.shape[-1])


def _pad_gate_cols(w_t, H, Hp):
    """w_t: (D, 4H) with gate blocks [i|f|g|o] -> (D, 4*Hp), each gate lane-aligned."""
    if Hp == H:
        return w_t
    D = w_t.shape[0]
    w4 = w_t.reshape(D, 4, H)
    w4 = jnp.pad(w4, ((0, 0), (0, 0), (0, Hp - H)))
    return w4.reshape(D, 4 * Hp)


def lstm_forward(x, hidden, cell, params, *, num_layers, hidden_size, output_size,
                 compute_dtype=jnp.bfloat16):
    """x: (B, T, I) f32; hidden/cell: (L, B, H) f32.  Returns (out, h_n, c_n) like the module."""
    B, T, I = x.shape
    L, H, O = num_layers, hidden_size, output_size
    LANES = 128
    Hp = _round_up(H, LANES)
    Op = _round_up(O, LANES)
    cdt = compute_dtype
    f32 = jnp.float32

    # time-major inside the kernel; cast matmul operands to the compute dtype once, host side
    x_t = jnp.transpose(x, (1, 0, 2)).astype(cdt)                     # (T, B, I)
    h0 = jnp.pad(hidden.astype(f32), ((0, 0), (0, 0), (0, Hp - H)))   # (L, B, Hp)
    c0 = jnp.pad(cell.astype(f32), ((0, 0), (0, 0), (0, Hp - H)))

    ins = [x_t, h0, c0]
    for l in range(L):
        wi = _pad_gate_cols(params[f'w_ih{l}'].T.astype(f32), H, Hp)  # (D_in, 4Hp)
        if l > 0:
            wi = jnp.pad(wi, ((0, Hp - H), (0, 0)))                   # contract over padded Hp
        wh = _pad_gate_cols(params[f'w_hh{l}'].T.astype(f32), H, Hp)
        wh = jnp.pad(wh, ((0, Hp - H), (0, 0)))                       # (Hp, 4Hp)
        b = (params[f'b_ih{l}'] + params[f'b_hh{l}']).astype(f32)     # combined bias
        bp = jnp.pad(b.reshape(4, H), ((0, 0), (0, Hp - H))).reshape(1, 4 * Hp)
        ins += [wi.astype(cdt), wh.astype(cdt), bp]

    w_out = jnp.pad(params['w_out'].T.astype(f32), ((0, Hp - H), (0, Op - O)))  # (Hp, Op)
    b_out = jnp.pad(params['b_out'].astype(f32), (0, Op - O)).reshape(1, Op)
    ins += [w_out.astype(cdt), b_out]

    vmem = pl.BlockSpec(memory_space=pltpu.MemorySpace.VMEM)

    out_p, h_p, c_p = pl.pallas_call(
        functools.partial(lstm_kernel, num_layers=L, hidden_pad=Hp, compute_dtype=cdt),
        out_shape=(jax.ShapeDtypeStruct((L, B, Op), f32),
                   jax.ShapeDtypeStruct((L, B, Hp), f32),
                   jax.ShapeDtypeStruct((L, B, Hp), f32)),
        in_specs=[vmem] * len(ins),
        out_specs=(vmem, vmem, vmem),
        scratch_shapes=[pltpu.VMEM((T, B, Hp), cdt),            # next-layer input buffer
                        pltpu.VMEM((T, B, 4 * Hp), jnp.float32)],  # precomputed gate acts
        compiler_params=pltpu.CompilerParams(vmem_limit_bytes=32 * 1024 * 1024),
    )(*ins)

    # strip lane padding (kernel writes lane-dense 128-wide tiles)
    return out_p[:, :, :O], h_p[:, :, :H], c_p[:, :, :H]


def init_params(key, input_size, hidden_size, output_size, num_layers):
    """Deterministic init, PyTorch-style U(-1/sqrt(H), 1/sqrt(H))."""
    params = {}
    k = 1.0 / jnp.sqrt(hidden_size)
    keys = jax.random.split(key, 4 * num_layers + 2)
    ki = 0
    for l in range(num_layers):
        d_in = input_size if l == 0 else hidden_size
        params[f'w_ih{l}'] = jax.random.uniform(keys[ki], (4 * hidden_size, d_in),
                                                jnp.float32, -k, k); ki += 1
        params[f'w_hh{l}'] = jax.random.uniform(keys[ki], (4 * hidden_size, hidden_size),
                                                jnp.float32, -k, k); ki += 1
        params[f'b_ih{l}'] = jax.random.uniform(keys[ki], (4 * hidden_size,),
                                                jnp.float32, -k, k); ki += 1
        params[f'b_hh{l}'] = jax.random.uniform(keys[ki], (4 * hidden_size,),
                                                jnp.float32, -k, k); ki += 1
    params['w_out'] = jax.random.uniform(keys[ki], (output_size, hidden_size),
                                         jnp.float32, -k, k); ki += 1
    params['b_out'] = jax.random.uniform(keys[ki], (output_size,),
                                         jnp.float32, -k, k)
    return params


def reference_forward(x, hidden, cell, params, *, num_layers, hidden_size):
    """Pure-JAX f32 reference mirroring torch.nn.LSTM (batch_first) + Linear on hidden."""
    B, T, I = x.shape
    H = hidden_size
    h_all, c_all = [], []
    layer_in = x
    for l in range(num_layers):
        w_ih, w_hh = params[f'w_ih{l}'], params[f'w_hh{l}']
        b = params[f'b_ih{l}'] + params[f'b_hh{l}']
        h, c = hidden[l], cell[l]
        outs = []
        for t in range(T):
            xt = layer_in[:, t, :]
            gates = xt @ w_ih.T + h @ w_hh.T + b[None, :]
            i_g = jax.nn.sigmoid(gates[:, 0 * H:1 * H])
            f_g = jax.nn.sigmoid(gates[:, 1 * H:2 * H])
            g_g = jnp.tanh(gates[:, 2 * H:3 * H])
            o_g = jax.nn.sigmoid(gates[:, 3 * H:4 * H])
            c = f_g * c + i_g * g_g
            h = o_g * jnp.tanh(c)
            outs.append(h)
        layer_in = jnp.stack(outs, axis=1)
        h_all.append(h)
        c_all.append(c)
    h_all = jnp.stack(h_all, axis=0)
    c_all = jnp.stack(c_all, axis=0)
    out = h_all @ params['w_out'].T + params['b_out'][None, None, :]
    return out, h_all, c_all


if __name__ == "__main__":
    # Small shapes implied by the forward: x=(batch, seq, input_size),
    # hidden/cell=(num_layers, batch, hidden_size).
    B, T, I, H, O, L = 2, 8, 16, 32, 4, 2

    key = jax.random.PRNGKey(0)
    k_param, k_x = jax.random.split(key)
    params = init_params(k_param, I, H, O, L)

    x = jax.random.normal(k_x, (B, T, I), jnp.float32)
    hidden = jnp.zeros((L, B, H), jnp.float32)   # init_hidden_cell
    cell = jnp.zeros((L, B, H), jnp.float32)

    out, h_out, c_out = lstm_forward(x, hidden, cell, params,
                                     num_layers=L, hidden_size=H, output_size=O,
                                     compute_dtype=jnp.bfloat16)
    jax.block_until_ready((out, h_out, c_out))

    # sanity check against a pure-JAX f32 reference of the PyTorch semantics
    # (bf16 MXU operands -> slightly looser tolerance than pure f32)
    out_ref, h_ref, c_ref = reference_forward(x, hidden, cell, params,
                                              num_layers=L, hidden_size=H)
    assert out.shape == (L, B, O) and h_out.shape == (L, B, H) and c_out.shape == (L, B, H)
    assert jnp.allclose(out, out_ref, atol=2e-2, rtol=2e-2)
    assert jnp.allclose(h_out, h_ref, atol=2e-2, rtol=2e-2)
    assert jnp.allclose(c_out, c_ref, atol=2e-2, rtol=2e-2)

    print("KERNEL_OK")
</pallas_src>

<mosaic_0001>
module attributes {stable_mosaic.version = 11 : i64} {
  func.func @lstm_kernel(%arg0: memref<8x2x16xbf16, #tpu.memory_space<vmem>>, %arg1: memref<2x2x128xf32, #tpu.memory_space<vmem>>, %arg2: memref<2x2x128xf32, #tpu.memory_space<vmem>>, %arg3: memref<16x512xbf16, #tpu.memory_space<vmem>>, %arg4: memref<128x512xbf16, #tpu.memory_space<vmem>>, %arg5: memref<1x512xf32, #tpu.memory_space<vmem>>, %arg6: memref<128x512xbf16, #tpu.memory_space<vmem>>, %arg7: memref<128x512xbf16, #tpu.memory_space<vmem>>, %arg8: memref<1x512xf32, #tpu.memory_space<vmem>>, %arg9: memref<128x128xbf16, #tpu.memory_space<vmem>>, %arg10: memref<1x128xf32, #tpu.memory_space<vmem>>, %arg11: memref<2x2x128xf32, #tpu.memory_space<vmem>>, %arg12: memref<2x2x128xf32, #tpu.memory_space<vmem>>, %arg13: memref<2x2x128xf32, #tpu.memory_space<vmem>>, %arg14: memref<8x2x128xbf16, #tpu.memory_space<vmem>>, %arg15: memref<8x2x512xf32, #tpu.memory_space<vmem>>) attributes {dimension_semantics = [], scalar_prefetch = 0 : i64, scratch_operands = 2 : i64, tpu.core_type = #tpu.core_type<tc>} {
    %c0 = arith.constant 0 : index
    %c0_0 = arith.constant 0 : index
    %0 = vector.load %arg3[%c0, %c0_0] : memref<16x512xbf16, #tpu.memory_space<vmem>>, vector<16x512xbf16>
    %c0_1 = arith.constant 0 : index
    %c0_2 = arith.constant 0 : index
    %1 = vector.load %arg4[%c0_1, %c0_2] : memref<128x512xbf16, #tpu.memory_space<vmem>>, vector<128x512xbf16>
    %c0_3 = arith.constant 0 : index
    %c0_4 = arith.constant 0 : index
    %2 = vector.load %arg5[%c0_3, %c0_4] : memref<1x512xf32, #tpu.memory_space<vmem>>, vector<1x512xf32>
    %c0_5 = arith.constant 0 : index
    %c0_6 = arith.constant 0 : index
    %c0_7 = arith.constant 0 : index
    %3 = vector.load %arg0[%c0_5, %c0_6, %c0_7] : memref<8x2x16xbf16, #tpu.memory_space<vmem>>, vector<8x2x16xbf16>
    %4 = vector.shape_cast %3 : vector<8x2x16xbf16> to vector<16x16xbf16>
    %cst = arith.constant dense<0.000000e+00> : vector<16x512xf32>
    %5 = tpu.matmul %4, %0, %cst {dimension_numbers = #tpu.dot_dimension_numbers<[1], [0], [0], [1], [0, 0, 1, 1], [], []>} : vector<16x16xbf16>, vector<16x512xbf16>, vector<16x512xf32> -> vector<16x512xf32>
    %6 = vector.broadcast %2 : vector<1x512xf32> to vector<16x512xf32>
    %7 = arith.addf %5, %6 : vector<16x512xf32>
    %8 = vector.shape_cast %7 : vector<16x512xf32> to vector<8x2x512xf32>
    %c0_8 = arith.constant 0 : index
    %c0_9 = arith.constant 0 : index
    %c0_10 = arith.constant 0 : index
    %9 = vector.load %arg15[%c0_8, %c0_9, %c0_10] : memref<8x2x512xf32, #tpu.memory_space<vmem>>, vector<8x2x512xf32>
    tpu.vector_store %arg15[%c0_8, %c0_9, %c0_10], %8 {strides = array<i32>} : memref<8x2x512xf32, #tpu.memory_space<vmem>>, vector<8x2x512xf32>,
    %c0_11 = arith.constant 0 : index
    %c0_12 = arith.constant 0 : index
    %c0_13 = arith.constant 0 : index
    %10 = vector.load %arg1[%c0_11, %c0_12, %c0_13] : memref<2x2x128xf32, #tpu.memory_space<vmem>>, vector<1x2x128xf32>
    %11 = vector.shape_cast %10 : vector<1x2x128xf32> to vector<2x128xf32>
    %c0_14 = arith.constant 0 : index
    %c0_15 = arith.constant 0 : index
    %c0_16 = arith.constant 0 : index
    %12 = vector.load %arg2[%c0_14, %c0_15, %c0_16] : memref<2x2x128xf32, #tpu.memory_space<vmem>>, vector<1x2x128xf32>
    %13 = vector.shape_cast %12 : vector<1x2x128xf32> to vector<2x128xf32>
    %c0_i32 = arith.constant 0 : i32
    %14 = arith.index_cast %c0_i32 : i32 to index
    %c0_17 = arith.constant 0 : index
    %c0_18 = arith.constant 0 : index
    %15 = vector.load %arg15[%14, %c0_17, %c0_18] : memref<8x2x512xf32, #tpu.memory_space<vmem>>, vector<1x2x512xf32>
    %16 = vector.shape_cast %15 : vector<1x2x512xf32> to vector<2x512xf32>
    %17 = arith.truncf %11 : vector<2x128xf32> to vector<2x128xbf16>
    %cst_19 = arith.constant dense<0.000000e+00> : vector<2x512xf32>
    %18 = tpu.matmul %17, %1, %cst_19 {dimension_numbers = #tpu.dot_dimension_numbers<[1], [0], [0], [1], [0, 0, 1, 1], [], []>} : vector<2x128xbf16>, vector<128x512xbf16>, vector<2x512xf32> -> vector<2x512xf32>
    %19 = arith.addf %16, %18 : vector<2x512xf32>
    %20 = vector.extract_strided_slice %19 {offsets = [0, 0], sizes = [2, 128], strides = [1, 1]} : vector<2x512xf32> to vector<2x128xf32>
    %21 = arith.negf %20 : vector<2x128xf32>
    %22 = math.exp %21 : vector<2x128xf32>
    %cst_20 = arith.constant 1.000000e+00 : f32
    %23 = vector.broadcast %cst_20 : f32 to vector<2x128xf32>
    %24 = arith.addf %23, %22 : vector<2x128xf32>
    %25 = arith.divf %23, %24 : vector<2x128xf32>
    %26 = vector.extract_strided_slice %19 {offsets = [0, 128], sizes = [2, 128], strides = [1, 1]} : vector<2x512xf32> to vector<2x128xf32>
    %27 = arith.negf %26 : vector<2x128xf32>
    %28 = math.exp %27 : vector<2x128xf32>
    %cst_21 = arith.constant 1.000000e+00 : f32
    %29 = vector.broadcast %cst_21 : f32 to vector<2x128xf32>
    %30 = arith.addf %29, %28 : vector<2x128xf32>
    %31 = arith.divf %29, %30 : vector<2x128xf32>
    %32 = vector.extract_strided_slice %19 {offsets = [0, 256], sizes = [2, 128], strides = [1, 1]} : vector<2x512xf32> to vector<2x128xf32>
    %33 = math.tanh %32 : vector<2x128xf32>
    %34 = vector.extract_strided_slice %19 {offsets = [0, 384], sizes = [2, 128], strides = [1, 1]} : vector<2x512xf32> to vector<2x128xf32>
    %35 = arith.negf %34 : vector<2x128xf32>
    %36 = math.exp %35 : vector<2x128xf32>
    %cst_22 = arith.constant 1.000000e+00 : f32
    %37 = vector.broadcast %cst_22 : f32 to vector<2x128xf32>
    %38 = arith.addf %37, %36 : vector<2x128xf32>
    %39 = arith.divf %37, %38 : vector<2x128xf32>
    %40 = arith.mulf %31, %13 : vector<2x128xf32>
    %41 = arith.mulf %25, %33 : vector<2x128xf32>
    %42 = arith.addf %40, %41 : vector<2x128xf32>
    %43 = math.tanh %42 : vector<2x128xf32>
    %44 = arith.mulf %39, %43 : vector<2x128xf32>
    %45 = arith.truncf %44 : vector<2x128xf32> to vector<2x128xbf16>
    %46 = arith.index_cast %c0_i32 : i32 to index
    %c0_23 = arith.constant 0 : index
    %c0_24 = arith.constant 0 : index
    %47 = vector.load %arg14[%46, %c0_23, %c0_24] : memref<8x2x128xbf16, #tpu.memory_space<vmem>>, vector<1x2x128xbf16>
    %48 = vector.shape_cast %47 : vector<1x2x128xbf16> to vector<2x128xbf16>
    %49 = vector.shape_cast %45 : vector<2x128xbf16> to vector<1x2x128xbf16>
    tpu.vector_store %arg14[%46, %c0_23, %c0_24], %49 {strides = array<i32>} : memref<8x2x128xbf16, #tpu.memory_space<vmem>>, vector<1x2x128xbf16>,
    %c1_i32 = arith.constant 1 : i32
    %50 = arith.index_cast %c1_i32 : i32 to index
    %c0_25 = arith.constant 0 : index
    %c0_26 = arith.constant 0 : index
    %51 = vector.load %arg15[%50, %c0_25, %c0_26] : memref<8x2x512xf32, #tpu.memory_space<vmem>>, vector<1x2x512xf32>
    %52 = vector.shape_cast %51 : vector<1x2x512xf32> to vector<2x512xf32>
    %53 = arith.truncf %44 : vector<2x128xf32> to vector<2x128xbf16>
    %cst_27 = arith.constant dense<0.000000e+00> : vector<2x512xf32>
    %54 = tpu.matmul %53, %1, %cst_27 {dimension_numbers = #tpu.dot_dimension_numbers<[1], [0], [0], [1], [0, 0, 1, 1], [], []>} : vector<2x128xbf16>, vector<128x512xbf16>, vector<2x512xf32> -> vector<2x512xf32>
    %55 = arith.addf %52, %54 : vector<2x512xf32>
    %56 = vector.extract_strided_slice %55 {offsets = [0, 0], sizes = [2, 128], strides = [1, 1]} : vector<2x512xf32> to vector<2x128xf32>
    %57 = arith.negf %56 : vector<2x128xf32>
    %58 = math.exp %57 : vector<2x128xf32>
    %cst_28 = arith.constant 1.000000e+00 : f32
    %59 = vector.broadcast %cst_28 : f32 to vector<2x128xf32>
    %60 = arith.addf %59, %58 : vector<2x128xf32>
    %61 = arith.divf %59, %60 : vector<2x128xf32>
    %62 = vector.extract_strided_slice %55 {offsets = [0, 128], sizes = [2, 128], strides = [1, 1]} : vector<2x512xf32> to vector<2x128xf32>
    %63 = arith.negf %62 : vector<2x128xf32>
    %64 = math.exp %63 : vector<2x128xf32>
    %cst_29 = arith.constant 1.000000e+00 : f32
    %65 = vector.broadcast %cst_29 : f32 to vector<2x128xf32>
    %66 = arith.addf %65, %64 : vector<2x128xf32>
    %67 = arith.divf %65, %66 : vector<2x128xf32>
    %68 = vector.extract_strided_slice %55 {offsets = [0, 256], sizes = [2, 128], strides = [1, 1]} : vector<2x512xf32> to vector<2x128xf32>
    %69 = math.tanh %68 : vector<2x128xf32>
    %70 = vector.extract_strided_slice %55 {offsets = [0, 384], sizes = [2, 128], strides = [1, 1]} : vector<2x512xf32> to vector<2x128xf32>
    %71 = arith.negf %70 : vector<2x128xf32>
    %72 = math.exp %71 : vector<2x128xf32>
    %cst_30 = arith.constant 1.000000e+00 : f32
    %73 = vector.broadcast %cst_30 : f32 to vector<2x128xf32>
    %74 = arith.addf %73, %72 : vector<2x128xf32>
    %75 = arith.divf %73, %74 : vector<2x128xf32>
    %76 = arith.mulf %67, %42 : vector<2x128xf32>
    %77 = arith.mulf %61, %69 : vector<2x128xf32>
    %78 = arith.addf %76, %77 : vector<2x128xf32>
    %79 = math.tanh %78 : vector<2x128xf32>
    %80 = arith.mulf %75, %79 : vector<2x128xf32>
    %81 = arith.truncf %80 : vector<2x128xf32> to vector<2x128xbf16>
    %82 = arith.index_cast %c1_i32 : i32 to index
    %c0_31 = arith.constant 0 : index
    %c0_32 = arith.constant 0 : index
    %83 = vector.load %arg14[%82, %c0_31, %c0_32] : memref<8x2x128xbf16, #tpu.memory_space<vmem>>, vector<1x2x128xbf16>
    %84 = vector.shape_cast %83 : vector<1x2x128xbf16> to vector<2x128xbf16>
    %85 = vector.shape_cast %81 : vector<2x128xbf16> to vector<1x2x128xbf16>
    tpu.vector_store %arg14[%82, %c0_31, %c0_32], %85 {strides = array<i32>} : memref<8x2x128xbf16, #tpu.memory_space<vmem>>, vector<1x2x128xbf16>,
    %c2_i32 = arith.constant 2 : i32
    %86 = arith.index_cast %c2_i32 : i32 to index
    %c0_33 = arith.constant 0 : index
    %c0_34 = arith.constant 0 : index
    %87 = vector.load %arg15[%86, %c0_33, %c0_34] : memref<8x2x512xf32, #tpu.memory_space<vmem>>, vector<1x2x512xf32>
    %88 = vector.shape_cast %87 : vector<1x2x512xf32> to vector<2x512xf32>
    %89 = arith.truncf %80 : vector<2x128xf32> to vector<2x128xbf16>
    %cst_35 = arith.constant dense<0.000000e+00> : vector<2x512xf32>
    %90 = tpu.matmul %89, %1, %cst_35 {dimension_numbers = #tpu.dot_dimension_numbers<[1], [0], [0], [1], [0, 0, 1, 1], [], []>} : vector<2x128xbf16>, vector<128x512xbf16>, vector<2x512xf32> -> vector<2x512xf32>
    %91 = arith.addf %88, %90 : vector<2x512xf32>
    %92 = vector.extract_strided_slice %91 {offsets = [0, 0], sizes = [2, 128], strides = [1, 1]} : vector<2x512xf32> to vector<2x128xf32>
    %93 = arith.negf %92 : vector<2x128xf32>
    %94 = math.exp %93 : vector<2x128xf32>
    %cst_36 = arith.constant 1.000000e+00 : f32
    %95 = vector.broadcast %cst_36 : f32 to vector<2x128xf32>
    %96 = arith.addf %95, %94 : vector<2x128xf32>
    %97 = arith.divf %95, %96 : vector<2x128xf32>
    %98 = vector.extract_strided_slice %91 {offsets = [0, 128], sizes = [2, 128], strides = [1, 1]} : vector<2x512xf32> to vector<2x128xf32>
    %99 = arith.negf %98 : vector<2x128xf32>
    %100 = math.exp %99 : vector<2x128xf32>
    %cst_37 = arith.constant 1.000000e+00 : f32
    %101 = vector.broadcast %cst_37 : f32 to vector<2x128xf32>
    %102 = arith.addf %101, %100 : vector<2x128xf32>
    %103 = arith.divf %101, %102 : vector<2x128xf32>
    %104 = vector.extract_strided_slice %91 {offsets = [0, 256], sizes = [2, 128], strides = [1, 1]} : vector<2x512xf32> to vector<2x128xf32>
    %105 = math.tanh %104 : vector<2x128xf32>
    %106 = vector.extract_strided_slice %91 {offsets = [0, 384], sizes = [2, 128], strides = [1, 1]} : vector<2x512xf32> to vector<2x128xf32>
    %107 = arith.negf %106 : vector<2x128xf32>
    %108 = math.exp %107 : vector<2x128xf32>
    %cst_38 = arith.constant 1.000000e+00 : f32
    %109 = vector.broadcast %cst_38 : f32 to vector<2x128xf32>
    %110 = arith.addf %109, %108 : vector<2x128xf32>
    %111 = arith.divf %109, %110 : vector<2x128xf32>
    %112 = arith.mulf %103, %78 : vector<2x128xf32>
    %113 = arith.mulf %97, %105 : vector<2x128xf32>
    %114 = arith.addf %112, %113 : vector<2x128xf32>
    %115 = math.tanh %114 : vector<2x128xf32>
    %116 = arith.mulf %111, %115 : vector<2x128xf32>
    %117 = arith.truncf %116 : vector<2x128xf32> to vector<2x128xbf16>
    %118 = arith.index_cast %c2_i32 : i32 to index
    %c0_39 = arith.constant 0 : index
    %c0_40 = arith.constant 0 : index
    %119 = vector.load %arg14[%118, %c0_39, %c0_40] : memref<8x2x128xbf16, #tpu.memory_space<vmem>>, vector<1x2x128xbf16>
    %120 = vector.shape_cast %119 : vector<1x2x128xbf16> to vector<2x128xbf16>
    %121 = vector.shape_cast %117 : vector<2x128xbf16> to vector<1x2x128xbf16>
    tpu.vector_store %arg14[%118, %c0_39, %c0_40], %121 {strides = array<i32>} : memref<8x2x128xbf16, #tpu.memory_space<vmem>>, vector<1x2x128xbf16>,
    %c3_i32 = arith.constant 3 : i32
    %122 = arith.index_cast %c3_i32 : i32 to index
    %c0_41 = arith.constant 0 : index
    %c0_42 = arith.constant 0 : index
    %123 = vector.load %arg15[%122, %c0_41, %c0_42] : memref<8x2x512xf32, #tpu.memory_space<vmem>>, vector<1x2x512xf32>
    %124 = vector.shape_cast %123 : vector<1x2x512xf32> to vector<2x512xf32>
    %125 = arith.truncf %116 : vector<2x128xf32> to vector<2x128xbf16>
    %cst_43 = arith.constant dense<0.000000e+00> : vector<2x512xf32>
    %126 = tpu.matmul %125, %1, %cst_43 {dimension_numbers = #tpu.dot_dimension_numbers<[1], [0], [0], [1], [0, 0, 1, 1], [], []>} : vector<2x128xbf16>, vector<128x512xbf16>, vector<2x512xf32> -> vector<2x512xf32>
    %127 = arith.addf %124, %126 : vector<2x512xf32>
    %128 = vector.extract_strided_slice %127 {offsets = [0, 0], sizes = [2, 128], strides = [1, 1]} : vector<2x512xf32> to vector<2x128xf32>
    %129 = arith.negf %128 : vector<2x128xf32>
    %130 = math.exp %129 : vector<2x128xf32>
    %cst_44 = arith.constant 1.000000e+00 : f32
    %131 = vector.broadcast %cst_44 : f32 to vector<2x128xf32>
    %132 = arith.addf %131, %130 : vector<2x128xf32>
    %133 = arith.divf %131, %132 : vector<2x128xf32>
    %134 = vector.extract_strided_slice %127 {offsets = [0, 128], sizes = [2, 128], strides = [1, 1]} : vector<2x512xf32> to vector<2x128xf32>
    %135 = arith.negf %134 : vector<2x128xf32>
    %136 = math.exp %135 : vector<2x128xf32>
    %cst_45 = arith.constant 1.000000e+00 : f32
    %137 = vector.broadcast %cst_45 : f32 to vector<2x128xf32>
    %138 = arith.addf %137, %136 : vector<2x128xf32>
    %139 = arith.divf %137, %138 : vector<2x128xf32>
    %140 = vector.extract_strided_slice %127 {offsets = [0, 256], sizes = [2, 128], strides = [1, 1]} : vector<2x512xf32> to vector<2x128xf32>
    %141 = math.tanh %140 : vector<2x128xf32>
    %142 = vector.extract_strided_slice %127 {offsets = [0, 384], sizes = [2, 128], strides = [1, 1]} : vector<2x512xf32> to vector<2x128xf32>
    %143 = arith.negf %142 : vector<2x128xf32>
    %144 = math.exp %143 : vector<2x128xf32>
    %cst_46 = arith.constant 1.000000e+00 : f32
    %145 = vector.broadcast %cst_46 : f32 to vector<2x128xf32>
    %146 = arith.addf %145, %144 : vector<2x128xf32>
    %147 = arith.divf %145, %146 : vector<2x128xf32>
    %148 = arith.mulf %139, %114 : vector<2x128xf32>
    %149 = arith.mulf %133, %141 : vector<2x128xf32>
    %150 = arith.addf %148, %149 : vector<2x128xf32>
    %151 = math.tanh %150 : vector<2x128xf32>
    %152 = arith.mulf %147, %151 : vector<2x128xf32>
    %153 = arith.truncf %152 : vector<2x128xf32> to vector<2x128xbf16>
    %154 = arith.index_cast %c3_i32 : i32 to index
    %c0_47 = arith.constant 0 : index
    %c0_48 = arith.constant 0 : index
    %155 = vector.load %arg14[%154, %c0_47, %c0_48] : memref<8x2x128xbf16, #tpu.memory_space<vmem>>, vector<1x2x128xbf16>
    %156 = vector.shape_cast %155 : vector<1x2x128xbf16> to vector<2x128xbf16>
    %157 = vector.shape_cast %153 : vector<2x128xbf16> to vector<1x2x128xbf16>
    tpu.vector_store %arg14[%154, %c0_47, %c0_48], %157 {strides = array<i32>} : memref<8x2x128xbf16, #tpu.memory_space<vmem>>, vector<1x2x128xbf16>,
    %c4_i32 = arith.constant 4 : i32
    %158 = arith.index_cast %c4_i32 : i32 to index
    %c0_49 = arith.constant 0 : index
    %c0_50 = arith.constant 0 : index
    %159 = vector.load %arg15[%158, %c0_49, %c0_50] : memref<8x2x512xf32, #tpu.memory_space<vmem>>, vector<1x2x512xf32>
    %160 = vector.shape_cast %159 : vector<1x2x512xf32> to vector<2x512xf32>
    %161 = arith.truncf %152 : vector<2x128xf32> to vector<2x128xbf16>
    %cst_51 = arith.constant dense<0.000000e+00> : vector<2x512xf32>
    %162 = tpu.matmul %161, %1, %cst_51 {dimension_numbers = #tpu.dot_dimension_numbers<[1], [0], [0], [1], [0, 0, 1, 1], [], []>} : vector<2x128xbf16>, vector<128x512xbf16>, vector<2x512xf32> -> vector<2x512xf32>
    %163 = arith.addf %160, %162 : vector<2x512xf32>
    %164 = vector.extract_strided_slice %163 {offsets = [0, 0], sizes = [2, 128], strides = [1, 1]} : vector<2x512xf32> to vector<2x128xf32>
    %165 = arith.negf %164 : vector<2x128xf32>
    %166 = math.exp %165 : vector<2x128xf32>
    %cst_52 = arith.constant 1.000000e+00 : f32
    %167 = vector.broadcast %cst_52 : f32 to vector<2x128xf32>
    %168 = arith.addf %167, %166 : vector<2x128xf32>
    %169 = arith.divf %167, %168 : vector<2x128xf32>
    %170 = vector.extract_strided_slice %163 {offsets = [0, 128], sizes = [2, 128], strides = [1, 1]} : vector<2x512xf32> to vector<2x128xf32>
    %171 = arith.negf %170 : vector<2x128xf32>
    %172 = math.exp %171 : vector<2x128xf32>
    %cst_53 = arith.constant 1.000000e+00 : f32
    %173 = vector.broadcast %cst_53 : f32 to vector<2x128xf32>
    %174 = arith.addf %173, %172 : vector<2x128xf32>
    %175 = arith.divf %173, %174 : vector<2x128xf32>
    %176 = vector.extract_strided_slice %163 {offsets = [0, 256], sizes = [2, 128], strides = [1, 1]} : vector<2x512xf32> to vector<2x128xf32>
    %177 = math.tanh %176 : vector<2x128xf32>
    %178 = vector.extract_strided_slice %163 {offsets = [0, 384], sizes = [2, 128], strides = [1, 1]} : vector<2x512xf32> to vector<2x128xf32>
    %179 = arith.negf %178 : vector<2x128xf32>
    %180 = math.exp %179 : vector<2x128xf32>
    %cst_54 = arith.constant 1.000000e+00 : f32
    %181 = vector.broadcast %cst_54 : f32 to vector<2x128xf32>
    %182 = arith.addf %181, %180 : vector<2x128xf32>
    %183 = arith.divf %181, %182 : vector<2x128xf32>
    %184 = arith.mulf %175, %150 : vector<2x128xf32>
    %185 = arith.mulf %169, %177 : vector<2x128xf32>
    %186 = arith.addf %184, %185 : vector<2x128xf32>
    %187 = math.tanh %186 : vector<2x128xf32>
    %188 = arith.mulf %183, %187 : vector<2x128xf32>
    %189 = arith.truncf %188 : vector<2x128xf32> to vector<2x128xbf16>
    %190 = arith.index_cast %c4_i32 : i32 to index
    %c0_55 = arith.constant 0 : index
    %c0_56 = arith.constant 0 : index
    %191 = vector.load %arg14[%190, %c0_55, %c0_56] : memref<8x2x128xbf16, #tpu.memory_space<vmem>>, vector<1x2x128xbf16>
    %192 = vector.shape_cast %191 : vector<1x2x128xbf16> to vector<2x128xbf16>
    %193 = vector.shape_cast %189 : vector<2x128xbf16> to vector<1x2x128xbf16>
    tpu.vector_store %arg14[%190, %c0_55, %c0_56], %193 {strides = array<i32>} : memref<8x2x128xbf16, #tpu.memory_space<vmem>>, vector<1x2x128xbf16>,
    %c5_i32 = arith.constant 5 : i32
    %194 = arith.index_cast %c5_i32 : i32 to index
    %c0_57 = arith.constant 0 : index
    %c0_58 = arith.constant 0 : index
    %195 = vector.load %arg15[%194, %c0_57, %c0_58] : memref<8x2x512xf32, #tpu.memory_space<vmem>>, vector<1x2x512xf32>
    %196 = vector.shape_cast %195 : vector<1x2x512xf32> to vector<2x512xf32>
    %197 = arith.truncf %188 : vector<2x128xf32> to vector<2x128xbf16>
    %cst_59 = arith.constant dense<0.000000e+00> : vector<2x512xf32>
    %198 = tpu.matmul %197, %1, %cst_59 {dimension_numbers = #tpu.dot_dimension_numbers<[1], [0], [0], [1], [0, 0, 1, 1], [], []>} : vector<2x128xbf16>, vector<128x512xbf16>, vector<2x512xf32> -> vector<2x512xf32>
    %199 = arith.addf %196, %198 : vector<2x512xf32>
    %200 = vector.extract_strided_slice %199 {offsets = [0, 0], sizes = [2, 128], strides = [1, 1]} : vector<2x512xf32> to vector<2x128xf32>
    %201 = arith.negf %200 : vector<2x128xf32>
    %202 = math.exp %201 : vector<2x128xf32>
    %cst_60 = arith.constant 1.000000e+00 : f32
    %203 = vector.broadcast %cst_60 : f32 to vector<2x128xf32>
    %204 = arith.addf %203, %202 : vector<2x128xf32>
    %205 = arith.divf %203, %204 : vector<2x128xf32>
    %206 = vector.extract_strided_slice %199 {offsets = [0, 128], sizes = [2, 128], strides = [1, 1]} : vector<2x512xf32> to vector<2x128xf32>
    %207 = arith.negf %206 : vector<2x128xf32>
    %208 = math.exp %207 : vector<2x128xf32>
    %cst_61 = arith.constant 1.000000e+00 : f32
    %209 = vector.broadcast %cst_61 : f32 to vector<2x128xf32>
    %210 = arith.addf %209, %208 : vector<2x128xf32>
    %211 = arith.divf %209, %210 : vector<2x128xf32>
    %212 = vector.extract_strided_slice %199 {offsets = [0, 256], sizes = [2, 128], strides = [1, 1]} : vector<2x512xf32> to vector<2x128xf32>
    %213 = math.tanh %212 : vector<2x128xf32>
    %214 = vector.extract_strided_slice %199 {offsets = [0, 384], sizes = [2, 128], strides = [1, 1]} : vector<2x512xf32> to vector<2x128xf32>
    %215 = arith.negf %214 : vector<2x128xf32>
    %216 = math.exp %215 : vector<2x128xf32>
    %cst_62 = arith.constant 1.000000e+00 : f32
    %217 = vector.broadcast %cst_62 : f32 to vector<2x128xf32>
    %218 = arith.addf %217, %216 : vector<2x128xf32>
    %219 = arith.divf %217, %218 : vector<2x128xf32>
    %220 = arith.mulf %211, %186 : vector<2x128xf32>
    %221 = arith.mulf %205, %213 : vector<2x128xf32>
    %222 = arith.addf %220, %221 : vector<2x128xf32>
    %223 = math.tanh %222 : vector<2x128xf32>
    %224 = arith.mulf %219, %223 : vector<2x128xf32>
    %225 = arith.truncf %224 : vector<2x128xf32> to vector<2x128xbf16>
    %226 = arith.index_cast %c5_i32 : i32 to index
    %c0_63 = arith.constant 0 : index
    %c0_64 = arith.constant 0 : index
    %227 = vector.load %arg14[%226, %c0_63, %c0_64] : memref<8x2x128xbf16, #tpu.memory_space<vmem>>, vector<1x2x128xbf16>
    %228 = vector.shape_cast %227 : vector<1x2x128xbf16> to vector<2x128xbf16>
    %229 = vector.shape_cast %225 : vector<2x128xbf16> to vector<1x2x128xbf16>
    tpu.vector_store %arg14[%226, %c0_63, %c0_64], %229 {strides = array<i32>} : memref<8x2x128xbf16, #tpu.memory_space<vmem>>, vector<1x2x128xbf16>,
    %c6_i32 = arith.constant 6 : i32
    %230 = arith.index_cast %c6_i32 : i32 to index
    %c0_65 = arith.constant 0 : index
    %c0_66 = arith.constant 0 : index
    %231 = vector.load %arg15[%230, %c0_65, %c0_66] : memref<8x2x512xf32, #tpu.memory_space<vmem>>, vector<1x2x512xf32>
    %232 = vector.shape_cast %231 : vector<1x2x512xf32> to vector<2x512xf32>
    %233 = arith.truncf %224 : vector<2x128xf32> to vector<2x128xbf16>
    %cst_67 = arith.constant dense<0.000000e+00> : vector<2x512xf32>
    %234 = tpu.matmul %233, %1, %cst_67 {dimension_numbers = #tpu.dot_dimension_numbers<[1], [0], [0], [1], [0, 0, 1, 1], [], []>} : vector<2x128xbf16>, vector<128x512xbf16>, vector<2x512xf32> -> vector<2x512xf32>
    %235 = arith.addf %232, %234 : vector<2x512xf32>
    %236 = vector.extract_strided_slice %235 {offsets = [0, 0], sizes = [2, 128], strides = [1, 1]} : vector<2x512xf32> to vector<2x128xf32>
    %237 = arith.negf %236 : vector<2x128xf32>
    %238 = math.exp %237 : vector<2x128xf32>
    %cst_68 = arith.constant 1.000000e+00 : f32
    %239 = vector.broadcast %cst_68 : f32 to vector<2x128xf32>
    %240 = arith.addf %239, %238 : vector<2x128xf32>
    %241 = arith.divf %239, %240 : vector<2x128xf32>
    %242 = vector.extract_strided_slice %235 {offsets = [0, 128], sizes = [2, 128], strides = [1, 1]} : vector<2x512xf32> to vector<2x128xf32>
    %243 = arith.negf %242 : vector<2x128xf32>
    %244 = math.exp %243 : vector<2x128xf32>
    %cst_69 = arith.constant 1.000000e+00 : f32
    %245 = vector.broadcast %cst_69 : f32 to vector<2x128xf32>
    %246 = arith.addf %245, %244 : vector<2x128xf32>
    %247 = arith.divf %245, %246 : vector<2x128xf32>
    %248 = vector.extract_strided_slice %235 {offsets = [0, 256], sizes = [2, 128], strides = [1, 1]} : vector<2x512xf32> to vector<2x128xf32>
    %249 = math.tanh %248 : vector<2x128xf32>
    %250 = vector.extract_strided_slice %235 {offsets = [0, 384], sizes = [2, 128], strides = [1, 1]} : vector<2x512xf32> to vector<2x128xf32>
    %251 = arith.negf %250 : vector<2x128xf32>
    %252 = math.exp %251 : vector<2x128xf32>
    %cst_70 = arith.constant 1.000000e+00 : f32
    %253 = vector.broadcast %cst_70 : f32 to vector<2x128xf32>
    %254 = arith.addf %253, %252 : vector<2x128xf32>
    %255 = arith.divf %253, %254 : vector<2x128xf32>
    %256 = arith.mulf %247, %222 : vector<2x128xf32>
    %257 = arith.mulf %241, %249 : vector<2x128xf32>
    %258 = arith.addf %256, %257 : vector<2x128xf32>
    %259 = math.tanh %258 : vector<2x128xf32>
    %260 = arith.mulf %255, %259 : vector<2x128xf32>
    %261 = arith.truncf %260 : vector<2x128xf32> to vector<2x128xbf16>
    %262 = arith.index_cast %c6_i32 : i32 to index
    %c0_71 = arith.constant 0 : index
    %c0_72 = arith.constant 0 : index
    %263 = vector.load %arg14[%262, %c0_71, %c0_72] : memref<8x2x128xbf16, #tpu.memory_space<vmem>>, vector<1x2x128xbf16>
    %264 = vector.shape_cast %263 : vector<1x2x128xbf16> to vector<2x128xbf16>
    %265 = vector.shape_cast %261 : vector<2x128xbf16> to vector<1x2x128xbf16>
    tpu.vector_store %arg14[%262, %c0_71, %c0_72], %265 {strides = array<i32>} : memref<8x2x128xbf16, #tpu.memory_space<vmem>>, vector<1x2x128xbf16>,
    %c7_i32 = arith.constant 7 : i32
    %266 = arith.index_cast %c7_i32 : i32 to index
    %c0_73 = arith.constant 0 : index
    %c0_74 = arith.constant 0 : index
    %267 = vector.load %arg15[%266, %c0_73, %c0_74] : memref<8x2x512xf32, #tpu.memory_space<vmem>>, vector<1x2x512xf32>
    %268 = vector.shape_cast %267 : vector<1x2x512xf32> to vector<2x512xf32>
    %269 = arith.truncf %260 : vector<2x128xf32> to vector<2x128xbf16>
    %cst_75 = arith.constant dense<0.000000e+00> : vector<2x512xf32>
    %270 = tpu.matmul %269, %1, %cst_75 {dimension_numbers = #tpu.dot_dimension_numbers<[1], [0], [0], [1], [0, 0, 1, 1], [], []>} : vector<2x128xbf16>, vector<128x512xbf16>, vector<2x512xf32> -> vector<2x512xf32>
    %271 = arith.addf %268, %270 : vector<2x512xf32>
    %272 = vector.extract_strided_slice %271 {offsets = [0, 0], sizes = [2, 128], strides = [1, 1]} : vector<2x512xf32> to vector<2x128xf32>
    %273 = arith.negf %272 : vector<2x128xf32>
    %274 = math.exp %273 : vector<2x128xf32>
    %cst_76 = arith.constant 1.000000e+00 : f32
    %275 = vector.broadcast %cst_76 : f32 to vector<2x128xf32>
    %276 = arith.addf %275, %274 : vector<2x128xf32>
    %277 = arith.divf %275, %276 : vector<2x128xf32>
    %278 = vector.extract_strided_slice %271 {offsets = [0, 128], sizes = [2, 128], strides = [1, 1]} : vector<2x512xf32> to vector<2x128xf32>
    %279 = arith.negf %278 : vector<2x128xf32>
    %280 = math.exp %279 : vector<2x128xf32>
    %cst_77 = arith.constant 1.000000e+00 : f32
    %281 = vector.broadcast %cst_77 : f32 to vector<2x128xf32>
    %282 = arith.addf %281, %280 : vector<2x128xf32>
    %283 = arith.divf %281, %282 : vector<2x128xf32>
    %284 = vector.extract_strided_slice %271 {offsets = [0, 256], sizes = [2, 128], strides = [1, 1]} : vector<2x512xf32> to vector<2x128xf32>
    %285 = math.tanh %284 : vector<2x128xf32>
    %286 = vector.extract_strided_slice %271 {offsets = [0, 384], sizes = [2, 128], strides = [1, 1]} : vector<2x512xf32> to vector<2x128xf32>
    %287 = arith.negf %286 : vector<2x128xf32>
    %288 = math.exp %287 : vector<2x128xf32>
    %cst_78 = arith.constant 1.000000e+00 : f32
    %289 = vector.broadcast %cst_78 : f32 to vector<2x128xf32>
    %290 = arith.addf %289, %288 : vector<2x128xf32>
    %291 = arith.divf %289, %290 : vector<2x128xf32>
    %292 = arith.mulf %283, %258 : vector<2x128xf32>
    %293 = arith.mulf %277, %285 : vector<2x128xf32>
    %294 = arith.addf %292, %293 : vector<2x128xf32>
    %295 = math.tanh %294 : vector<2x128xf32>
    %296 = arith.mulf %291, %295 : vector<2x128xf32>
    %297 = arith.truncf %296 : vector<2x128xf32> to vector<2x128xbf16>
    %298 = arith.index_cast %c7_i32 : i32 to index
    %c0_79 = arith.constant 0 : index
    %c0_80 = arith.constant 0 : index
    %299 = vector.load %arg14[%298, %c0_79, %c0_80] : memref<8x2x128xbf16, #tpu.memory_space<vmem>>, vector<1x2x128xbf16>
    %300 = vector.shape_cast %299 : vector<1x2x128xbf16> to vector<2x128xbf16>
    %301 = vector.shape_cast %297 : vector<2x128xbf16> to vector<1x2x128xbf16>
    tpu.vector_store %arg14[%298, %c0_79, %c0_80], %301 {strides = array<i32>} : memref<8x2x128xbf16, #tpu.memory_space<vmem>>, vector<1x2x128xbf16>,
    %c8_i32 = arith.constant 8 : i32
    %c0_81 = arith.constant 0 : index
    %c0_82 = arith.constant 0 : index
    %c0_83 = arith.constant 0 : index
    %302 = vector.load %arg12[%c0_81, %c0_82, %c0_83] : memref<2x2x128xf32, #tpu.memory_space<vmem>>, vector<1x2x128xf32>
    %303 = vector.shape_cast %302 : vector<1x2x128xf32> to vector<2x128xf32>
    %304 = vector.shape_cast %296 : vector<2x128xf32> to vector<1x2x128xf32>
    tpu.vector_store %arg12[%c0_81, %c0_82, %c0_83], %304 {strides = array<i32>} : memref<2x2x128xf32, #tpu.memory_space<vmem>>, vector<1x2x128xf32>,
    %c0_84 = arith.constant 0 : index
    %c0_85 = arith.constant 0 : index
    %c0_86 = arith.constant 0 : index
    %305 = vector.load %arg13[%c0_84, %c0_85, %c0_86] : memref<2x2x128xf32, #tpu.memory_space<vmem>>, vector<1x2x128xf32>
    %306 = vector.shape_cast %305 : vector<1x2x128xf32> to vector<2x128xf32>
    %307 = vector.shape_cast %294 : vector<2x128xf32> to vector<1x2x128xf32>
    tpu.vector_store %arg13[%c0_84, %c0_85, %c0_86], %307 {strides = array<i32>} : memref<2x2x128xf32, #tpu.memory_space<vmem>>, vector<1x2x128xf32>,
    %c0_87 = arith.constant 0 : index
    %c0_88 = arith.constant 0 : index
    %308 = vector.load %arg6[%c0_87, %c0_88] : memref<128x512xbf16, #tpu.memory_space<vmem>>, vector<128x512xbf16>
    %c0_89 = arith.constant 0 : index
    %c0_90 = arith.constant 0 : index
    %309 = vector.load %arg7[%c0_89, %c0_90] : memref<128x512xbf16, #tpu.memory_space<vmem>>, vector<128x512xbf16>
    %c0_91 = arith.constant 0 : index
    %c0_92 = arith.constant 0 : index
    %310 = vector.load %arg8[%c0_91, %c0_92] : memref<1x512xf32, #tpu.memory_space<vmem>>, vector<1x512xf32>
    %c0_93 = arith.constant 0 : index
    %c0_94 = arith.constant 0 : index
    %c0_95 = arith.constant 0 : index
    %311 = vector.load %arg14[%c0_93, %c0_94, %c0_95] : memref<8x2x128xbf16, #tpu.memory_space<vmem>>, vector<8x2x128xbf16>
    %312 = vector.shape_cast %311 : vector<8x2x128xbf16> to vector<16x128xbf16>
    %cst_96 = arith.constant dense<0.000000e+00> : vector<16x512xf32>
    %313 = tpu.matmul %312, %308, %cst_96 {dimension_numbers = #tpu.dot_dimension_numbers<[1], [0], [0], [1], [0, 0, 1, 1], [], []>} : vector<16x128xbf16>, vector<128x512xbf16>, vector<16x512xf32> -> vector<16x512xf32>
    %314 = vector.broadcast %310 : vector<1x512xf32> to vector<16x512xf32>
    %315 = arith.addf %313, %314 : vector<16x512xf32>
    %316 = vector.shape_cast %315 : vector<16x512xf32> to vector<8x2x512xf32>
    %c0_97 = arith.constant 0 : index
    %c0_98 = arith.constant 0 : index
    %c0_99 = arith.constant 0 : index
    %317 = vector.load %arg15[%c0_97, %c0_98, %c0_99] : memref<8x2x512xf32, #tpu.memory_space<vmem>>, vector<8x2x512xf32>
    tpu.vector_store %arg15[%c0_97, %c0_98, %c0_99], %316 {strides = array<i32>} : memref<8x2x512xf32, #tpu.memory_space<vmem>>, vector<8x2x512xf32>,
    %c1 = arith.constant 1 : index
    %c0_100 = arith.constant 0 : index
    %c0_101 = arith.constant 0 : index
    %318 = vector.load %arg1[%c1, %c0_100, %c0_101] : memref<2x2x128xf32, #tpu.memory_space<vmem>>, vector<1x2x128xf32>
    %319 = vector.shape_cast %318 : vector<1x2x128xf32> to vector<2x128xf32>
    %c1_102 = arith.constant 1 : index
    %c0_103 = arith.constant 0 : index
    %c0_104 = arith.constant 0 : index
    %320 = vector.load %arg2[%c1_102, %c0_103, %c0_104] : memref<2x2x128xf32, #tpu.memory_space<vmem>>, vector<1x2x128xf32>
    %321 = vector.shape_cast %320 : vector<1x2x128xf32> to vector<2x128xf32>
    %c0_i32_105 = arith.constant 0 : i32
    %322 = arith.index_cast %c0_i32_105 : i32 to index
    %c0_106 = arith.constant 0 : index
    %c0_107 = arith.constant 0 : index
    %323 = vector.load %arg15[%322, %c0_106, %c0_107] : memref<8x2x512xf32, #tpu.memory_space<vmem>>, vector<1x2x512xf32>
    %324 = vector.shape_cast %323 : vector<1x2x512xf32> to vector<2x512xf32>
    %325 = arith.truncf %319 : vector<2x128xf32> to vector<2x128xbf16>
    %cst_108 = arith.constant dense<0.000000e+00> : vector<2x512xf32>
    %326 = tpu.matmul %325, %309, %cst_108 {dimension_numbers = #tpu.dot_dimension_numbers<[1], [0], [0], [1], [0, 0, 1, 1], [], []>} : vector<2x128xbf16>, vector<128x512xbf16>, vector<2x512xf32> -> vector<2x512xf32>
    %327 = arith.addf %324, %326 : vector<2x512xf32>
    %328 = vector.extract_strided_slice %327 {offsets = [0, 0], sizes = [2, 128], strides = [1, 1]} : vector<2x512xf32> to vector<2x128xf32>
    %329 = arith.negf %328 : vector<2x128xf32>
    %330 = math.exp %329 : vector<2x128xf32>
    %cst_109 = arith.constant 1.000000e+00 : f32
    %331 = vector.broadcast %cst_109 : f32 to vector<2x128xf32>
    %332 = arith.addf %331, %330 : vector<2x128xf32>
    %333 = arith.divf %331, %332 : vector<2x128xf32>
    %334 = vector.extract_strided_slice %327 {offsets = [0, 128], sizes = [2, 128], strides = [1, 1]} : vector<2x512xf32> to vector<2x128xf32>
    %335 = arith.negf %334 : vector<2x128xf32>
    %336 = math.exp %335 : vector<2x128xf32>
    %cst_110 = arith.constant 1.000000e+00 : f32
    %337 = vector.broadcast %cst_110 : f32 to vector<2x128xf32>
    %338 = arith.addf %337, %336 : vector<2x128xf32>
    %339 = arith.divf %337, %338 : vector<2x128xf32>
    %340 = vector.extract_strided_slice %327 {offsets = [0, 256], sizes = [2, 128], strides = [1, 1]} : vector<2x512xf32> to vector<2x128xf32>
    %341 = math.tanh %340 : vector<2x128xf32>
    %342 = vector.extract_strided_slice %327 {offsets = [0, 384], sizes = [2, 128], strides = [1, 1]} : vector<2x512xf32> to vector<2x128xf32>
    %343 = arith.negf %342 : vector<2x128xf32>
    %344 = math.exp %343 : vector<2x128xf32>
    %cst_111 = arith.constant 1.000000e+00 : f32
    %345 = vector.broadcast %cst_111 : f32 to vector<2x128xf32>
    %346 = arith.addf %345, %344 : vector<2x128xf32>
    %347 = arith.divf %345, %346 : vector<2x128xf32>
    %348 = arith.mulf %339, %321 : vector<2x128xf32>
    %349 = arith.mulf %333, %341 : vector<2x128xf32>
    %350 = arith.addf %348, %349 : vector<2x128xf32>
    %351 = math.tanh %350 : vector<2x128xf32>
    %352 = arith.mulf %347, %351 : vector<2x128xf32>
    %c1_i32_112 = arith.constant 1 : i32
    %353 = arith.index_cast %c1_i32_112 : i32 to index
    %c0_113 = arith.constant 0 : index
    %c0_114 = arith.constant 0 : index
    %354 = vector.load %arg15[%353, %c0_113, %c0_114] : memref<8x2x512xf32, #tpu.memory_space<vmem>>, vector<1x2x512xf32>
    %355 = vector.shape_cast %354 : vector<1x2x512xf32> to vector<2x512xf32>
    %356 = arith.truncf %352 : vector<2x128xf32> to vector<2x128xbf16>
    %cst_115 = arith.constant dense<0.000000e+00> : vector<2x512xf32>
    %357 = tpu.matmul %356, %309, %cst_115 {dimension_numbers = #tpu.dot_dimension_numbers<[1], [0], [0], [1], [0, 0, 1, 1], [], []>} : vector<2x128xbf16>, vector<128x512xbf16>, vector<2x512xf32> -> vector<2x512xf32>
    %358 = arith.addf %355, %357 : vector<2x512xf32>
    %359 = vector.extract_strided_slice %358 {offsets = [0, 0], sizes = [2, 128], strides = [1, 1]} : vector<2x512xf32> to vector<2x128xf32>
    %360 = arith.negf %359 : vector<2x128xf32>
    %361 = math.exp %360 : vector<2x128xf32>
    %cst_116 = arith.constant 1.000000e+00 : f32
    %362 = vector.broadcast %cst_116 : f32 to vector<2x128xf32>
    %363 = arith.addf %362, %361 : vector<2x128xf32>
    %364 = arith.divf %362, %363 : vector<2x128xf32>
    %365 = vector.extract_strided_slice %358 {offsets = [0, 128], sizes = [2, 128], strides = [1, 1]} : vector<2x512xf32> to vector<2x128xf32>
    %366 = arith.negf %365 : vector<2x128xf32>
    %367 = math.exp %366 : vector<2x128xf32>
    %cst_117 = arith.constant 1.000000e+00 : f32
    %368 = vector.broadcast %cst_117 : f32 to vector<2x128xf32>
    %369 = arith.addf %368, %367 : vector<2x128xf32>
    %370 = arith.divf %368, %369 : vector<2x128xf32>
    %371 = vector.extract_strided_slice %358 {offsets = [0, 256], sizes = [2, 128], strides = [1, 1]} : vector<2x512xf32> to vector<2x128xf32>
    %372 = math.tanh %371 : vector<2x128xf32>
    %373 = vector.extract_strided_slice %358 {offsets = [0, 384], sizes = [2, 128], strides = [1, 1]} : vector<2x512xf32> to vector<2x128xf32>
    %374 = arith.negf %373 : vector<2x128xf32>
    %375 = math.exp %374 : vector<2x128xf32>
    %cst_118 = arith.constant 1.000000e+00 : f32
    %376 = vector.broadcast %cst_118 : f32 to vector<2x128xf32>
    %377 = arith.addf %376, %375 : vector<2x128xf32>
    %378 = arith.divf %376, %377 : vector<2x128xf32>
    %379 = arith.mulf %370, %350 : vector<2x128xf32>
    %380 = arith.mulf %364, %372 : vector<2x128xf32>
    %381 = arith.addf %379, %380 : vector<2x128xf32>
    %382 = math.tanh %381 : vector<2x128xf32>
    %383 = arith.mulf %378, %382 : vector<2x128xf32>
    %c2_i32_119 = arith.constant 2 : i32
    %384 = arith.index_cast %c2_i32_119 : i32 to index
    %c0_120 = arith.constant 0 : index
    %c0_121 = arith.constant 0 : index
    %385 = vector.load %arg15[%384, %c0_120, %c0_121] : memref<8x2x512xf32, #tpu.memory_space<vmem>>, vector<1x2x512xf32>
    %386 = vector.shape_cast %385 : vector<1x2x512xf32> to vector<2x512xf32>
    %387 = arith.truncf %383 : vector<2x128xf32> to vector<2x128xbf16>
    %cst_122 = arith.constant dense<0.000000e+00> : vector<2x512xf32>
    %388 = tpu.matmul %387, %309, %cst_122 {dimension_numbers = #tpu.dot_dimension_numbers<[1], [0], [0], [1], [0, 0, 1, 1], [], []>} : vector<2x128xbf16>, vector<128x512xbf16>, vector<2x512xf32> -> vector<2x512xf32>
    %389 = arith.addf %386, %388 : vector<2x512xf32>
    %390 = vector.extract_strided_slice %389 {offsets = [0, 0], sizes = [2, 128], strides = [1, 1]} : vector<2x512xf32> to vector<2x128xf32>
    %391 = arith.negf %390 : vector<2x128xf32>
    %392 = math.exp %391 : vector<2x128xf32>
    %cst_123 = arith.constant 1.000000e+00 : f32
    %393 = vector.broadcast %cst_123 : f32 to vector<2x128xf32>
    %394 = arith.addf %393, %392 : vector<2x128xf32>
    %395 = arith.divf %393, %394 : vector<2x128xf32>
    %396 = vector.extract_strided_slice %389 {offsets = [0, 128], sizes = [2, 128], strides = [1, 1]} : vector<2x512xf32> to vector<2x128xf32>
    %397 = arith.negf %396 : vector<2x128xf32>
    %398 = math.exp %397 : vector<2x128xf32>
    %cst_124 = arith.constant 1.000000e+00 : f32
    %399 = vector.broadcast %cst_124 : f32 to vector<2x128xf32>
    %400 = arith.addf %399, %398 : vector<2x128xf32>
    %401 = arith.divf %399, %400 : vector<2x128xf32>
    %402 = vector.extract_strided_slice %389 {offsets = [0, 256], sizes = [2, 128], strides = [1, 1]} : vector<2x512xf32> to vector<2x128xf32>
    %403 = math.tanh %402 : vector<2x128xf32>
    %404 = vector.extract_strided_slice %389 {offsets = [0, 384], sizes = [2, 128], strides = [1, 1]} : vector<2x512xf32> to vector<2x128xf32>
    %405 = arith.negf %404 : vector<2x128xf32>
    %406 = math.exp %405 : vector<2x128xf32>
    %cst_125 = arith.constant 1.000000e+00 : f32
    %407 = vector.broadcast %cst_125 : f32 to vector<2x128xf32>
    %408 = arith.addf %407, %406 : vector<2x128xf32>
    %409 = arith.divf %407, %408 : vector<2x128xf32>
    %410 = arith.mulf %401, %381 : vector<2x128xf32>
    %411 = arith.mulf %395, %403 : vector<2x128xf32>
    %412 = arith.addf %410, %411 : vector<2x128xf32>
    %413 = math.tanh %412 : vector<2x128xf32>
    %414 = arith.mulf %409, %413 : vector<2x128xf32>
    %c3_i32_126 = arith.constant 3 : i32
    %415 = arith.index_cast %c3_i32_126 : i32 to index
    %c0_127 = arith.constant 0 : index
    %c0_128 = arith.constant 0 : index
    %416 = vector.load %arg15[%415, %c0_127, %c0_128] : memref<8x2x512xf32, #tpu.memory_space<vmem>>, vector<1x2x512xf32>
    %417 = vector.shape_cast %416 : vector<1x2x512xf32> to vector<2x512xf32>
    %418 = arith.truncf %414 : vector<2x128xf32> to vector<2x128xbf16>
    %cst_129 = arith.constant dense<0.000000e+00> : vector<2x512xf32>
    %419 = tpu.matmul %418, %309, %cst_129 {dimension_numbers = #tpu.dot_dimension_numbers<[1], [0], [0], [1], [0, 0, 1, 1], [], []>} : vector<2x128xbf16>, vector<128x512xbf16>, vector<2x512xf32> -> vector<2x512xf32>
    %420 = arith.addf %417, %419 : vector<2x512xf32>
    %421 = vector.extract_strided_slice %420 {offsets = [0, 0], sizes = [2, 128], strides = [1, 1]} : vector<2x512xf32> to vector<2x128xf32>
    %422 = arith.negf %421 : vector<2x128xf32>
    %423 = math.exp %422 : vector<2x128xf32>
    %cst_130 = arith.constant 1.000000e+00 : f32
    %424 = vector.broadcast %cst_130 : f32 to vector<2x128xf32>
    %425 = arith.addf %424, %423 : vector<2x128xf32>
    %426 = arith.divf %424, %425 : vector<2x128xf32>
    %427 = vector.extract_strided_slice %420 {offsets = [0, 128], sizes = [2, 128], strides = [1, 1]} : vector<2x512xf32> to vector<2x128xf32>
    %428 = arith.negf %427 : vector<2x128xf32>
    %429 = math.exp %428 : vector<2x128xf32>
    %cst_131 = arith.constant 1.000000e+00 : f32
    %430 = vector.broadcast %cst_131 : f32 to vector<2x128xf32>
    %431 = arith.addf %430, %429 : vector<2x128xf32>
    %432 = arith.divf %430, %431 : vector<2x128xf32>
    %433 = vector.extract_strided_slice %420 {offsets = [0, 256], sizes = [2, 128], strides = [1, 1]} : vector<2x512xf32> to vector<2x128xf32>
    %434 = math.tanh %433 : vector<2x128xf32>
    %435 = vector.extract_strided_slice %420 {offsets = [0, 384], sizes = [2, 128], strides = [1, 1]} : vector<2x512xf32> to vector<2x128xf32>
    %436 = arith.negf %435 : vector<2x128xf32>
    %437 = math.exp %436 : vector<2x128xf32>
    %cst_132 = arith.constant 1.000000e+00 : f32
    %438 = vector.broadcast %cst_132 : f32 to vector<2x128xf32>
    %439 = arith.addf %438, %437 : vector<2x128xf32>
    %440 = arith.divf %438, %439 : vector<2x128xf32>
    %441 = arith.mulf %432, %412 : vector<2x128xf32>
    %442 = arith.mulf %426, %434 : vector<2x128xf32>
    %443 = arith.addf %441, %442 : vector<2x128xf32>
    %444 = math.tanh %443 : vector<2x128xf32>
    %445 = arith.mulf %440, %444 : vector<2x128xf32>
    %c4_i32_133 = arith.constant 4 : i32
    %446 = arith.index_cast %c4_i32_133 : i32 to index
    %c0_134 = arith.constant 0 : index
    %c0_135 = arith.constant 0 : index
    %447 = vector.load %arg15[%446, %c0_134, %c0_135] : memref<8x2x512xf32, #tpu.memory_space<vmem>>, vector<1x2x512xf32>
    %448 = vector.shape_cast %447 : vector<1x2x512xf32> to vector<2x512xf32>
    %449 = arith.truncf %445 : vector<2x128xf32> to vector<2x128xbf16>
    %cst_136 = arith.constant dense<0.000000e+00> : vector<2x512xf32>
    %450 = tpu.matmul %449, %309, %cst_136 {dimension_numbers = #tpu.dot_dimension_numbers<[1], [0], [0], [1], [0, 0, 1, 1], [], []>} : vector<2x128xbf16>, vector<128x512xbf16>, vector<2x512xf32> -> vector<2x512xf32>
    %451 = arith.addf %448, %450 : vector<2x512xf32>
    %452 = vector.extract_strided_slice %451 {offsets = [0, 0], sizes = [2, 128], strides = [1, 1]} : vector<2x512xf32> to vector<2x128xf32>
    %453 = arith.negf %452 : vector<2x128xf32>
    %454 = math.exp %453 : vector<2x128xf32>
    %cst_137 = arith.constant 1.000000e+00 : f32
    %455 = vector.broadcast %cst_137 : f32 to vector<2x128xf32>
    %456 = arith.addf %455, %454 : vector<2x128xf32>
    %457 = arith.divf %455, %456 : vector<2x128xf32>
    %458 = vector.extract_strided_slice %451 {offsets = [0, 128], sizes = [2, 128], strides = [1, 1]} : vector<2x512xf32> to vector<2x128xf32>
    %459 = arith.negf %458 : vector<2x128xf32>
    %460 = math.exp %459 : vector<2x128xf32>
    %cst_138 = arith.constant 1.000000e+00 : f32
    %461 = vector.broadcast %cst_138 : f32 to vector<2x128xf32>
    %462 = arith.addf %461, %460 : vector<2x128xf32>
    %463 = arith.divf %461, %462 : vector<2x128xf32>
    %464 = vector.extract_strided_slice %451 {offsets = [0, 256], sizes = [2, 128], strides = [1, 1]} : vector<2x512xf32> to vector<2x128xf32>
    %465 = math.tanh %464 : vector<2x128xf32>
    %466 = vector.extract_strided_slice %451 {offsets = [0, 384], sizes = [2, 128], strides = [1, 1]} : vector<2x512xf32> to vector<2x128xf32>
    %467 = arith.negf %466 : vector<2x128xf32>
    %468 = math.exp %467 : vector<2x128xf32>
    %cst_139 = arith.constant 1.000000e+00 : f32
    %469 = vector.broadcast %cst_139 : f32 to vector<2x128xf32>
    %470 = arith.addf %469, %468 : vector<2x128xf32>
    %471 = arith.divf %469, %470 : vector<2x128xf32>
    %472 = arith.mulf %463, %443 : vector<2x128xf32>
    %473 = arith.mulf %457, %465 : vector<2x128xf32>
    %474 = arith.addf %472, %473 : vector<2x128xf32>
    %475 = math.tanh %474 : vector<2x128xf32>
    %476 = arith.mulf %471, %475 : vector<2x128xf32>
    %c5_i32_140 = arith.constant 5 : i32
    %477 = arith.index_cast %c5_i32_140 : i32 to index
    %c0_141 = arith.constant 0 : index
    %c0_142 = arith.constant 0 : index
    %478 = vector.load %arg15[%477, %c0_141, %c0_142] : memref<8x2x512xf32, #tpu.memory_space<vmem>>, vector<1x2x512xf32>
    %479 = vector.shape_cast %478 : vector<1x2x512xf32> to vector<2x512xf32>
    %480 = arith.truncf %476 : vector<2x128xf32> to vector<2x128xbf16>
    %cst_143 = arith.constant dense<0.000000e+00> : vector<2x512xf32>
    %481 = tpu.matmul %480, %309, %cst_143 {dimension_numbers = #tpu.dot_dimension_numbers<[1], [0], [0], [1], [0, 0, 1, 1], [], []>} : vector<2x128xbf16>, vector<128x512xbf16>, vector<2x512xf32> -> vector<2x512xf32>
    %482 = arith.addf %479, %481 : vector<2x512xf32>
    %483 = vector.extract_strided_slice %482 {offsets = [0, 0], sizes = [2, 128], strides = [1, 1]} : vector<2x512xf32> to vector<2x128xf32>
    %484 = arith.negf %483 : vector<2x128xf32>
    %485 = math.exp %484 : vector<2x128xf32>
    %cst_144 = arith.constant 1.000000e+00 : f32
    %486 = vector.broadcast %cst_144 : f32 to vector<2x128xf32>
    %487 = arith.addf %486, %485 : vector<2x128xf32>
    %488 = arith.divf %486, %487 : vector<2x128xf32>
    %489 = vector.extract_strided_slice %482 {offsets = [0, 128], sizes = [2, 128], strides = [1, 1]} : vector<2x512xf32> to vector<2x128xf32>
    %490 = arith.negf %489 : vector<2x128xf32>
    %491 = math.exp %490 : vector<2x128xf32>
    %cst_145 = arith.constant 1.000000e+00 : f32
    %492 = vector.broadcast %cst_145 : f32 to vector<2x128xf32>
    %493 = arith.addf %492, %491 : vector<2x128xf32>
    %494 = arith.divf %492, %493 : vector<2x128xf32>
    %495 = vector.extract_strided_slice %482 {offsets = [0, 256], sizes = [2, 128], strides = [1, 1]} : vector<2x512xf32> to vector<2x128xf32>
    %496 = math.tanh %495 : vector<2x128xf32>
    %497 = vector.extract_strided_slice %482 {offsets = [0, 384], sizes = [2, 128], strides = [1, 1]} : vector<2x512xf32> to vector<2x128xf32>
    %498 = arith.negf %497 : vector<2x128xf32>
    %499 = math.exp %498 : vector<2x128xf32>
    %cst_146 = arith.constant 1.000000e+00 : f32
    %500 = vector.broadcast %cst_146 : f32 to vector<2x128xf32>
    %501 = arith.addf %500, %499 : vector<2x128xf32>
    %502 = arith.divf %500, %501 : vector<2x128xf32>
    %503 = arith.mulf %494, %474 : vector<2x128xf32>
    %504 = arith.mulf %488, %496 : vector<2x128xf32>
    %505 = arith.addf %503, %504 : vector<2x128xf32>
    %506 = math.tanh %505 : vector<2x128xf32>
    %507 = arith.mulf %502, %506 : vector<2x128xf32>
    %c6_i32_147 = arith.constant 6 : i32
    %508 = arith.index_cast %c6_i32_147 : i32 to index
    %c0_148 = arith.constant 0 : index
    %c0_149 = arith.constant 0 : index
    %509 = vector.load %arg15[%508, %c0_148, %c0_149] : memref<8x2x512xf32, #tpu.memory_space<vmem>>, vector<1x2x512xf32>
    %510 = vector.shape_cast %509 : vector<1x2x512xf32> to vector<2x512xf32>
    %511 = arith.truncf %507 : vector<2x128xf32> to vector<2x128xbf16>
    %cst_150 = arith.constant dense<0.000000e+00> : vector<2x512xf32>
    %512 = tpu.matmul %511, %309, %cst_150 {dimension_numbers = #tpu.dot_dimension_numbers<[1], [0], [0], [1], [0, 0, 1, 1], [], []>} : vector<2x128xbf16>, vector<128x512xbf16>, vector<2x512xf32> -> vector<2x512xf32>
    %513 = arith.addf %510, %512 : vector<2x512xf32>
    %514 = vector.extract_strided_slice %513 {offsets = [0, 0], sizes = [2, 128], strides = [1, 1]} : vector<2x512xf32> to vector<2x128xf32>
    %515 = arith.negf %514 : vector<2x128xf32>
    %516 = math.exp %515 : vector<2x128xf32>
    %cst_151 = arith.constant 1.000000e+00 : f32
    %517 = vector.broadcast %cst_151 : f32 to vector<2x128xf32>
    %518 = arith.addf %517, %516 : vector<2x128xf32>
    %519 = arith.divf %517, %518 : vector<2x128xf32>
    %520 = vector.extract_strided_slice %513 {offsets = [0, 128], sizes = [2, 128], strides = [1, 1]} : vector<2x512xf32> to vector<2x128xf32>
    %521 = arith.negf %520 : vector<2x128xf32>
    %522 = math.exp %521 : vector<2x128xf32>
    %cst_152 = arith.constant 1.000000e+00 : f32
    %523 = vector.broadcast %cst_152 : f32 to vector<2x128xf32>
    %524 = arith.addf %523, %522 : vector<2x128xf32>
    %525 = arith.divf %523, %524 : vector<2x128xf32>
    %526 = vector.extract_strided_slice %513 {offsets = [0, 256], sizes = [2, 128], strides = [1, 1]} : vector<2x512xf32> to vector<2x128xf32>
    %527 = math.tanh %526 : vector<2x128xf32>
    %528 = vector.extract_strided_slice %513 {offsets = [0, 384], sizes = [2, 128], strides = [1, 1]} : vector<2x512xf32> to vector<2x128xf32>
    %529 = arith.negf %528 : vector<2x128xf32>
    %530 = math.exp %529 : vector<2x128xf32>
    %cst_153 = arith.constant 1.000000e+00 : f32
    %531 = vector.broadcast %cst_153 : f32 to vector<2x128xf32>
    %532 = arith.addf %531, %530 : vector<2x128xf32>
    %533 = arith.divf %531, %532 : vector<2x128xf32>
    %534 = arith.mulf %525, %505 : vector<2x128xf32>
    %535 = arith.mulf %519, %527 : vector<2x128xf32>
    %536 = arith.addf %534, %535 : vector<2x128xf32>
    %537 = math.tanh %536 : vector<2x128xf32>
    %538 = arith.mulf %533, %537 : vector<2x128xf32>
    %c7_i32_154 = arith.constant 7 : i32
    %539 = arith.index_cast %c7_i32_154 : i32 to index
    %c0_155 = arith.constant 0 : index
    %c0_156 = arith.constant 0 : index
    %540 = vector.load %arg15[%539, %c0_155, %c0_156] : memref<8x2x512xf32, #tpu.memory_space<vmem>>, vector<1x2x512xf32>
    %541 = vector.shape_cast %540 : vector<1x2x512xf32> to vector<2x512xf32>
    %542 = arith.truncf %538 : vector<2x128xf32> to vector<2x128xbf16>
    %cst_157 = arith.constant dense<0.000000e+00> : vector<2x512xf32>
    %543 = tpu.matmul %542, %309, %cst_157 {dimension_numbers = #tpu.dot_dimension_numbers<[1], [0], [0], [1], [0, 0, 1, 1], [], []>} : vector<2x128xbf16>, vector<128x512xbf16>, vector<2x512xf32> -> vector<2x512xf32>
    %544 = arith.addf %541, %543 : vector<2x512xf32>
    %545 = vector.extract_strided_slice %544 {offsets = [0, 0], sizes = [2, 128], strides = [1, 1]} : vector<2x512xf32> to vector<2x128xf32>
    %546 = arith.negf %545 : vector<2x128xf32>
    %547 = math.exp %546 : vector<2x128xf32>
    %cst_158 = arith.constant 1.000000e+00 : f32
    %548 = vector.broadcast %cst_158 : f32 to vector<2x128xf32>
    %549 = arith.addf %548, %547 : vector<2x128xf32>
    %550 = arith.divf %548, %549 : vector<2x128xf32>
    %551 = vector.extract_strided_slice %544 {offsets = [0, 128], sizes = [2, 128], strides = [1, 1]} : vector<2x512xf32> to vector<2x128xf32>
    %552 = arith.negf %551 : vector<2x128xf32>
    %553 = math.exp %552 : vector<2x128xf32>
    %cst_159 = arith.constant 1.000000e+00 : f32
    %554 = vector.broadcast %cst_159 : f32 to vector<2x128xf32>
    %555 = arith.addf %554, %553 : vector<2x128xf32>
    %556 = arith.divf %554, %555 : vector<2x128xf32>
    %557 = vector.extract_strided_slice %544 {offsets = [0, 256], sizes = [2, 128], strides = [1, 1]} : vector<2x512xf32> to vector<2x128xf32>
    %558 = math.tanh %557 : vector<2x128xf32>
    %559 = vector.extract_strided_slice %544 {offsets = [0, 384], sizes = [2, 128], strides = [1, 1]} : vector<2x512xf32> to vector<2x128xf32>
    %560 = arith.negf %559 : vector<2x128xf32>
    %561 = math.exp %560 : vector<2x128xf32>
    %cst_160 = arith.constant 1.000000e+00 : f32
    %562 = vector.broadcast %cst_160 : f32 to vector<2x128xf32>
    %563 = arith.addf %562, %561 : vector<2x128xf32>
    %564 = arith.divf %562, %563 : vector<2x128xf32>
    %565 = arith.mulf %556, %536 : vector<2x128xf32>
    %566 = arith.mulf %550, %558 : vector<2x128xf32>
    %567 = arith.addf %565, %566 : vector<2x128xf32>
    %568 = math.tanh %567 : vector<2x128xf32>
    %569 = arith.mulf %564, %568 : vector<2x128xf32>
    %c8_i32_161 = arith.constant 8 : i32
    %c1_162 = arith.constant 1 : index
    %c0_163 = arith.constant 0 : index
    %c0_164 = arith.constant 0 : index
    %570 = vector.load %arg12[%c1_162, %c0_163, %c0_164] : memref<2x2x128xf32, #tpu.memory_space<vmem>>, vector<1x2x128xf32>
    %571 = vector.shape_cast %570 : vector<1x2x128xf32> to vector<2x128xf32>
    %572 = vector.shape_cast %569 : vector<2x128xf32> to vector<1x2x128xf32>
    tpu.vector_store %arg12[%c1_162, %c0_163, %c0_164], %572 {strides = array<i32>} : memref<2x2x128xf32, #tpu.memory_space<vmem>>, vector<1x2x128xf32>,
    %c1_165 = arith.constant 1 : index
    %c0_166 = arith.constant 0 : index
    %c0_167 = arith.constant 0 : index
    %573 = vector.load %arg13[%c1_165, %c0_166, %c0_167] : memref<2x2x128xf32, #tpu.memory_space<vmem>>, vector<1x2x128xf32>
    %574 = vector.shape_cast %573 : vector<1x2x128xf32> to vector<2x128xf32>
    %575 = vector.shape_cast %567 : vector<2x128xf32> to vector<1x2x128xf32>
    tpu.vector_store %arg13[%c1_165, %c0_166, %c0_167], %575 {strides = array<i32>} : memref<2x2x128xf32, #tpu.memory_space<vmem>>, vector<1x2x128xf32>,
    %576 = tpu.concatenate %296, %569 in 0 : vector<2x128xf32>, vector<2x128xf32> -> vector<4x128xf32>
    %577 = arith.truncf %576 : vector<4x128xf32> to vector<4x128xbf16>
    %c0_168 = arith.constant 0 : index
    %c0_169 = arith.constant 0 : index
    %578 = vector.load %arg9[%c0_168, %c0_169] : memref<128x128xbf16, #tpu.memory_space<vmem>>, vector<128x128xbf16>
    %cst_170 = arith.constant dense<0.000000e+00> : vector<4x128xf32>
    %579 = tpu.matmul %577, %578, %cst_170 {dimension_numbers = #tpu.dot_dimension_numbers<[1], [0], [0], [1], [0, 0, 1, 1], [], []>} : vector<4x128xbf16>, vector<128x128xbf16>, vector<4x128xf32> -> vector<4x128xf32>
    %c0_171 = arith.constant 0 : index
    %c0_172 = arith.constant 0 : index
    %580 = vector.load %arg10[%c0_171, %c0_172] : memref<1x128xf32, #tpu.memory_space<vmem>>, vector<1x128xf32>
    %581 = vector.broadcast %580 : vector<1x128xf32> to vector<4x128xf32>
    %582 = arith.addf %579, %581 : vector<4x128xf32>
    %583 = vector.shape_cast %582 : vector<4x128xf32> to vector<2x2x128xf32>
    %c0_173 = arith.constant 0 : index
    %c0_174 = arith.constant 0 : index
    %c0_175 = arith.constant 0 : index
    %584 = vector.load %arg11[%c0_173, %c0_174, %c0_175] : memref<2x2x128xf32, #tpu.memory_space<vmem>>, vector<2x2x128xf32>
    tpu.vector_store %arg11[%c0_173, %c0_174, %c0_175], %583 {strides = array<i32>} : memref<2x2x128xf32, #tpu.memory_space<vmem>>, vector<2x2x128xf32>,
    return
  }
}

</mosaic_0001>

<bundles_post_ra>
// kernel: tpu_custom_call.1
= control target key start
LH: loop header
LB: loop body
LE: loop exit
PB: predicated region body
PF: predicated region fallthrough
CT: control target
= control target key end

     0   :  { %19 = vsyncpa [#allocation5], 0  ;;  %s5886_s0 = inlined_call_operand.hbm [shape: bf16[8,2,16], index: 0, kind: input, shape index: {}]   ;;  %s5887_s1 = inlined_call_operand.hbm [shape: f32[2,2,128], index: 1, kind: input, shape index: {}]   ;;  %s5888_s2 = inlined_call_operand.vmem [shape: f32[2,2,128], index: 2, kind: input, shape index: {}]   ;;  %s5889_s3 = inlined_call_operand.hbm [shape: bf16[16,512], index: 3, kind: input, shape index: {}]   ;;  %s5890_s4 = inlined_call_operand.hbm [shape: bf16[128,512], index: 4, kind: input, shape index: {}]   ;;  %s5891_s5 = inlined_call_operand.vmem [shape: f32[1,512], index: 5, kind: input, shape index: {}]   ;;  %s5892_s6 = inlined_call_operand.hbm [shape: bf16[128,512], index: 6, kind: input, shape index: {}]   ;;  %s5893_s7 = inlined_call_operand.hbm [shape: bf16[128,512], index: 7, kind: input, shape index: {}]   ;;  %s5894_s8 = inlined_call_operand.vmem [shape: f32[1,512], index: 8, kind: input, shape index: {}]   ;;  %s5895_s9 = inlined_call_operand.hbm [shape: bf16[128,128], index: 9, kind: input, shape index: {}]   ;;  %s5896_s10 = inlined_call_operand.vmem [shape: f32[1,128], index: 10, kind: input, shape index: {}]   ;;  %s5897_s11 = inlined_call_operand.hbm [shape: f32[2,2,128], index: 11, kind: output, shape index: {0}]   ;;  %s5898_s12 = inlined_call_operand.hbm [shape: f32[2,2,128], index: 12, kind: output, shape index: {1}]   ;;  %s5899_s13 = inlined_call_operand.hbm [shape: f32[2,2,128], index: 13, kind: output, shape index: {2}]  }
   0x1   :  { %20 = vsyncpa [#allocation8], 0 }
   0x2   :  { %21 = vsyncpa [#allocation11], 0 }
   0x3   :  { %22 = vsyncpa [#allocation14], 0 }
   0x4   :  { %23 = vsyncpa [#allocation6], 0 }
   0x5   :  { %24 = vsyncpa [#allocation18], 0  ;;  %s4635_s25 = smov [#allocation7]   ;;  %s4403_s29 = scalar_lea.hbm %s5887_s1, 64 }
   0x6   :  { %s42_s26 = sshll.u32 %s4635_s25, 4  ;;  %p4404_p0 = scmp.ne.s32.totalorder %s5887_s1, %s4403_s29  ;;  %s43_s26 = int_to_ptr.vmem [resolvable:$true] %s42_s26 }
   0x7   :  { %p4407_p1 = scmp.lt.u32.totalorder %s4403_s29, %s5887_s1 }
   0x9   :  { %p4409_p2 = pnand %p4407_p1, %p4404_p0 }
   0xb   :  { %4412 = shalt.err (!%p4409_p2)
}
   0xc   :  { %s4413_s17 = scalar_lea.vmem %s43_s26, 64  ;;  %p4418_p4 = scmp.lt.s32.totalorder %s43_s26, %s43_s26 }
   0xd   :  { %p4414_p3 = scmp.ne.s32.totalorder %s43_s26, %s4413_s17  ;;  %p4419_p5 = scmp.lt.s32.totalorder %s4413_s17, %s4413_s17 }
   0xf   :  { %p4420_p6 = por %p4419_p5, %p4418_p4 }
  0x11   :  { %p4421_p7 = pnand %p4420_p6, %p4414_p3 }
  0x13   :  { %4424 = shalt.err (!%p4421_p7)
}
  0x14   :  { %s4636_s18 = smov 32   ;;  %s4637_s19 = smov 2  }
  0x15   :  { %48 = dma.hbm_to_vmem [thread:$0]  %s5887_s1, 64, %s43_s26, [#allocation8], %s4636_s18, %s4636_s18, %s4637_s19  }
  0x16   :  { %s4638_s22 = smov [#allocation10]   ;;  %s4639_s24 = smov [#allocation13]  }
  0x17   :  { %s68_s23 = sshll.u32 %s4638_s22, 4  ;;  %s94_s25 = sshll.u32 %s4639_s24, 4  ;;  %s69_s23 = int_to_ptr.vmem [resolvable:$true] %s68_s23  ;;  %s95_s25 = int_to_ptr.vmem [resolvable:$true] %s94_s25 }
  0x18   :  { %s4425_s29 = scalar_lea.hbm %s5890_s4, 4096 }
  0x19   :  { %p4426_p8 = scmp.ne.s32.totalorder %s5890_s4, %s4425_s29  ;;  %p4429_p9 = scmp.lt.u32.totalorder %s4425_s29, %s5890_s4 }
  0x1b   :  { %p4431_p10 = pnand %p4429_p9, %p4426_p8 }
  0x1d   :  { %4434 = shalt.err (!%p4431_p10)
}
  0x1e   :  { %s4435_s1 = scalar_lea.vmem %s69_s23, 4096  ;;  %p4440_p12 = scmp.lt.s32.totalorder %s69_s23, %s69_s23 }
  0x1f   :  { %p4436_p11 = scmp.ne.s32.totalorder %s69_s23, %s4435_s1  ;;  %p4441_p13 = scmp.lt.s32.totalorder %s4435_s1, %s4435_s1 }
  0x21   :  { %p4442_p0 = por %p4441_p13, %p4440_p12 }
  0x23   :  { %p4443_p1 = pnand %p4442_p0, %p4436_p11 }
  0x25   :  { %4446 = shalt.err (!%p4443_p1)
}
  0x26   :  { %s4640_s26 = smov 256   ;;  %s4641_s17 = smov 16  }
  0x27   :  { %74 = dma.hbm_to_vmem [thread:$0]  %s5890_s4, 4096, %s69_s23, [#allocation11], %s4640_s26, %s4640_s26, %s4641_s17  }
  0x28   :  { %s4447_s27 = scalar_lea.hbm %s5893_s7, 4096 }
  0x29   :  { %p4448_p2 = scmp.ne.s32.totalorder %s5893_s7, %s4447_s27  ;;  %p4451_p3 = scmp.lt.u32.totalorder %s4447_s27, %s5893_s7 }
  0x2b   :  { %p4453_p4 = pnand %p4451_p3, %p4448_p2 }
  0x2d   :  { %4456 = shalt.err (!%p4453_p4)
}
  0x2e   :  { %s4457_s15 = scalar_lea.vmem %s95_s25, 4096  ;;  %p4462_p6 = scmp.lt.s32.totalorder %s95_s25, %s95_s25 }
  0x2f   :  { %p4458_p5 = scmp.ne.s32.totalorder %s95_s25, %s4457_s15  ;;  %p4463_p7 = scmp.lt.s32.totalorder %s4457_s15, %s4457_s15 }
  0x31   :  { %p4464_p8 = por %p4463_p7, %p4462_p6 }
  0x33   :  { %p4465_p9 = pnand %p4464_p8, %p4458_p5 }
  0x35   :  { %4468 = shalt.err (!%p4465_p9)
}
  0x36   :  { %100 = dma.hbm_to_vmem [thread:$0]  %s5893_s7, 4096, %s95_s25, [#allocation14], %s4640_s26, %s4640_s26, %s4641_s17  }
  0x37   :  { %s4642_s16 = smov [#allocation4]   ;;  %s4469_s22 = scalar_lea.hbm %s5886_s0, 128 }
  0x38   :  { %s30_s1 = sshll.u32 %s4642_s16, 4  ;;  %p4470_p10 = scmp.ne.s32.totalorder %s5886_s0, %s4469_s22  ;;  %s31_s1 = int_to_ptr.vmem [resolvable:$true] %s30_s1 }
  0x39   :  { %p4473_p11 = scmp.lt.u32.totalorder %s4469_s22, %s5886_s0 }
  0x3b   :  { %p4475_p12 = pnand %p4473_p11, %p4470_p10 }
  0x3d   :  { %4478 = shalt.err (!%p4475_p12)
}
  0x3e   :  { %s4479_s30 = scalar_lea.vmem %s31_s1, 128  ;;  %p4484_p0 = scmp.lt.s32.totalorder %s31_s1, %s31_s1 }
  0x3f   :  { %p4480_p13 = scmp.ne.s32.totalorder %s31_s1, %s4479_s30  ;;  %p4485_p1 = scmp.lt.s32.totalorder %s4479_s30, %s4479_s30 }
  0x41   :  { %p4486_p2 = por %p4485_p1, %p4484_p0 }
  0x43   :  { %p4487_p3 = pnand %p4486_p2, %p4480_p13 }
  0x45   :  { %4490 = shalt.err (!%p4487_p3)
}
  0x46   :  { %s4643_s7 = smov 1   ;;  %s4644_s15 = smov [#allocation9]  }
  0x47   :  { %36 = dma.hbm_to_vmem [thread:$0]  %s5886_s0, 128, %s31_s1, [#allocation5], %s4641_s17, %s4641_s17, %s4643_s7  }
  0x48   :  { %s56_s4 = sshll.u32 %s4644_s15, 4  ;;  %s4645_s23 = smov [#allocation12]   ;;  %s57_s4 = int_to_ptr.vmem [resolvable:$true] %s56_s4 }
  0x49   :  { %s82_s16 = sshll.u32 %s4645_s23, 4  ;;  %s4491_s22 = scalar_lea.hbm %s5889_s3, 512  ;;  %s83_s16 = int_to_ptr.vmem [resolvable:$true] %s82_s16 }
  0x4a   :  { %p4492_p4 = scmp.ne.s32.totalorder %s5889_s3, %s4491_s22  ;;  %p4495_p5 = scmp.lt.u32.totalorder %s4491_s22, %s5889_s3 }
  0x4c   :  { %p4497_p6 = pnand %p4495_p5, %p4492_p4 }
  0x4e   :  { %4500 = shalt.err (!%p4497_p6)
}
  0x4f   :  { %s4501_s0 = scalar_lea.vmem %s57_s4, 512  ;;  %p4506_p8 = scmp.lt.s32.totalorder %s57_s4, %s57_s4 }
  0x50   :  { %p4502_p7 = scmp.ne.s32.totalorder %s57_s4, %s4501_s0  ;;  %p4507_p9 = scmp.lt.s32.totalorder %s4501_s0, %s4501_s0 }
  0x52   :  { %p4508_p10 = por %p4507_p9, %p4506_p8 }
  0x54   :  { %p4509_p11 = pnand %p4508_p10, %p4502_p7 }
  0x56   :  { %4512 = shalt.err (!%p4509_p11)
}
  0x57   :  { %62 = dma.hbm_to_vmem [thread:$0]  %s5889_s3, 512, %s57_s4, [#allocation8], %s4640_s26, %s4640_s26, %s4641_s17  }
  0x58   :  { %s4513_s14 = scalar_lea.hbm %s5892_s6, 4096 }
  0x59   :  { %p4514_p12 = scmp.ne.s32.totalorder %s5892_s6, %s4513_s14  ;;  %p4517_p13 = scmp.lt.u32.totalorder %s4513_s14, %s5892_s6 }
  0x5b   :  { %p4519_p0 = pnand %p4517_p13, %p4514_p12 }
  0x5d   :  { %4522 = shalt.err (!%p4519_p0)
}
  0x5e   :  { %s4523_s22 = scalar_lea.vmem %s83_s16, 4096  ;;  %p4528_p2 = scmp.lt.s32.totalorder %s83_s16, %s83_s16 }
  0x5f   :  { %p4524_p1 = scmp.ne.s32.totalorder %s83_s16, %s4523_s22  ;;  %p4529_p3 = scmp.lt.s32.totalorder %s4523_s22, %s4523_s22 }
  0x61   :  { %p4530_p4 = por %p4529_p3, %p4528_p2 }
  0x63   :  { %p4531_p5 = pnand %p4530_p4, %p4524_p1 }
  0x65   :  { %4534 = shalt.err (!%p4531_p5)
}
  0x66   :  { %88 = dma.hbm_to_vmem [thread:$0]  %s5892_s6, 4096, %s83_s16, [#allocation11], %s4640_s26, %s4640_s26, %s4641_s17  }
  0x67   :  { %s4646_s24 = smov [#allocation15]   ;;  %s4535_s0 = scalar_lea.hbm %s5895_s9, 1024 }
  0x68   :  { %s108_s27 = sshll.u32 %s4646_s24, 4  ;;  %p4536_p6 = scmp.ne.s32.totalorder %s5895_s9, %s4535_s0  ;;  %s109_s27 = int_to_ptr.vmem [resolvable:$true] %s108_s27 }
  0x69   :  { %p4539_p7 = scmp.lt.u32.totalorder %s4535_s0, %s5895_s9 }
  0x6b   :  { %p4541_p8 = pnand %p4539_p7, %p4536_p6 }
  0x6d   :  { %4544 = shalt.err (!%p4541_p8)
}
  0x6e   :  { %s4545_s14 = scalar_lea.vmem %s109_s27, 1024  ;;  %p4550_p10 = scmp.lt.s32.totalorder %s109_s27, %s109_s27 }
  0x6f   :  { %p4546_p9 = scmp.ne.s32.totalorder %s109_s27, %s4545_s14  ;;  %p4551_p11 = scmp.lt.s32.totalorder %s4545_s14, %s4545_s14 }
  0x71   :  { %p4552_p12 = por %p4551_p11, %p4550_p10 }
  0x73   :  { %p4553_p13 = pnand %p4552_p12, %p4546_p9 }
  0x75   :  { %4556 = shalt.err (!%p4553_p13)
}
  0x76   :  { %s4647_s6 = smov 64   ;;  %s4648_s26 = smov 4  }
  0x77   :  { %114 = dma.hbm_to_vmem [thread:$0]  %s5895_s9, 1024, %s109_s27, [#allocation14], %s4647_s6, %s4647_s6, %s4648_s26  }
  0x78   :  { %4623 = dma.done.wait [#allocation5], 128  }
  0x79   :  { %4624 = vsyncadd [#allocation5], 4294967168 }
  0x7a   :  { %4625 = dma.done.wait [#allocation8], 576  }
  0x7b   :  { %4626 = vsyncadd [#allocation8], 4294966720 }
  0x7c   :  { %4627 = dma.done.wait [#allocation11], 8192  }
  0x7d   :  { %4628 = vsyncadd [#allocation11], 4294959104 }
  0x7e   :  { %4629 = dma.done.wait [#allocation14], 5120  }
  0x7f   :  { %4630 = vsyncadd [#allocation14], 4294962176  ;;  %v4649_v0 = vmov 0   ;;  %v185_v1 = vlaneseq  ;;  %v4650_v2 = vmov 1966171168   ;;  %vm282_vm0 = vcmask 130048  }
  0x80   :  { %318 = vmatprep.mubr.bf16.mxu1 %v4649_v0  ;;  %v218_v3 = vunpack.c.l.s4 %v4650_v2  ;;  %664 = vmatprep.mubr.bf16.mxu0 %v4649_v0  ;;  %v3925_v6 = vld [vmem:[#allocation9 + $0x4] ss:$16 sps:$4 sm:$0xff]   ;;  %v3927_v7 = vld [vmem:[#allocation9] ss:$16 sps:$4 sm:$0xff]   ;;  %v3930_v8 = vld [vmem:[#allocation9 + $0xc] ss:$16 sps:$4 sm:$0xff]  }
  0x81   :  { %v4830_v4 = vshrl.u32 %v185_v1, 7  ;;  %286 = vmatprep.subr.bf16.mxu1 %v3925_v6  ;;  %v176_v9 = vld [vmem:[#allocation4] sm:$0x1]  ;;  %v177_v11 = vld [vmem:[#allocation4 + $0x1] sm:$0x1]  ;;  %vm4653_vm1 = vmmov 0  }
  0x82   :  { %v219_v5 = vunpack.c.0.s8 %v218_v3  ;;  %287 = vmatpush1.bf16.msra.mxu1 %v3927_v7  ;;  %v178_v12 = vld [vmem:[#allocation4 + $0x2] sm:$0x1]  ;;  %v179_v13 = vld [vmem:[#allocation4 + $0x3] sm:$0x1]  ;;  %v180_v14 = vld [vmem:[#allocation4 + $0x4] sm:$0x1]  ;;  %v213_v17 = vcombine.low %v176_v9, %v177_v11 }
  0x83   :  { %329 = vmatprep.subr.bf16.mxu1 %v3930_v8  ;;  %v181_v15 = vld [vmem:[#allocation4 + $0x5] sm:$0x1]  ;;  %v182_v16 = vld [vmem:[#allocation4 + $0x6] sm:$0x1]  ;;  %v214_v18 = vcombine.low %v178_v12, %v179_v13  ;;  %v183_v19 = vld [vmem:[#allocation4 + $0x7] sm:$0x1] }
  0x84   :  { %v4833_v10 = vsub.s32 %v219_v5, %v4830_v4  ;;  %v215_v20 = vcombine.low %v180_v14, %v181_v15  ;;  %v216_v21 = vcombine.low %v182_v16, %v183_v19  ;;  %v4837_v24 = vld [vmem:[#allocation10 + $0x4] ss:$16 sps:$4 sm:$0xff]   ;;  %v4839_v25 = vld [vmem:[#allocation10] ss:$16 sps:$4 sm:$0xff]   ;;  %v3928_v35 = vld [vmem:[#allocation9 + $0x8] ss:$16 sps:$4 sm:$0xff]  }
  0x85   :  { %632 = vmatprep.subr.bf16.mxu0 %v4837_v24  ;;  %v4844_v29 = vld [vmem:[#allocation10 + $0x24] ss:$16 sps:$4 sm:$0xff]   ;;  %v4847_v30 = vld [vmem:[#allocation10 + $0x20] ss:$16 sps:$4 sm:$0xff]   ;;  %v4855_v37 = vld [vmem:[#allocation10 + $0xc] ss:$16 sps:$4 sm:$0xff]  }
  0x86   :  { %v223_v22 = vrot.slane %v213_v17, %v4833_v10  ;;  %v230_v23 = vrot.slane %v214_v18, %v4833_v10  ;;  %v237_v26 = vrot.slane %v215_v20, %v4833_v10  ;;  %v244_v27 = vrot.slane %v216_v21, %v4833_v10  ;;  %633 = vmatpush1.bf16.msra.mxu0 %v4839_v25  ;;  %v4851_v33 = vld [vmem:[#allocation10 + $0x44] ss:$16 sps:$4 sm:$0xff]   ;;  %v4858_v38 = vld [vmem:[#allocation10 + $0x40] ss:$16 sps:$4 sm:$0xff]   ;;  %v4871_v42 = vld [vmem:[#allocation10 + $0x8] ss:$16 sps:$4 sm:$0xff]  }
  0x87   :  { %634 = vmatprep.subr.bf16.mxu0 %v4844_v29  ;;  %v4860_v39 = vld [vmem:[#allocation10 + $0x64] ss:$16 sps:$4 sm:$0xff]   ;;  %v4866_v40 = vld [vmem:[#allocation10 + $0x60] ss:$16 sps:$4 sm:$0xff]   ;;  %v4873_v43 = vld [vmem:[#allocation10 + $0x2c] ss:$16 sps:$4 sm:$0xff]  }
  0x88   :  { %v245_v28 = vcombine.low %v223_v22, %v230_v23  ;;  %v246_v31 = vcombine.low %v237_v26, %v244_v27  ;;  %v4869_v41 = vld [vmem:[#allocation10 + $0x84] ss:$16 sps:$4 sm:$0xff]   ;;  %v4876_v44 = vld [vmem:[#allocation10 + $0x80] ss:$16 sps:$4 sm:$0xff]   ;;  %v4883_v46 = vld [vmem:[#allocation10 + $0x28] ss:$16 sps:$4 sm:$0xff]  }
  0x89   :  { %v4879_v45 = vld [vmem:[#allocation10 + $0xa4] ss:$16 sps:$4 sm:$0xff]   ;;  %v4887_v47 = vld [vmem:[#allocation10 + $0x4c] ss:$16 sps:$4 sm:$0xff]   ;;  %v4890_v48 = vld [vmem:[#allocation10 + $0xa0] ss:$16 sps:$4 sm:$0xff]  }
  0x8a   :  { %v253_v32 = vrot.slane %v245_v28, %v4833_v10  ;;  %v260_v34 = vrot.slane %v246_v31, %v4833_v10  ;;  %635 = vmatpush1.bf16.msra.mxu0 %v4847_v30  ;;  %v4892_v49 = vld [vmem:[#allocation10 + $0x48] ss:$16 sps:$4 sm:$0xff]   ;;  %v4895_v50 = vld [vmem:[#allocation10 + $0xc4] ss:$16 sps:$4 sm:$0xff]   ;;  %v4897_v51 = vld [vmem:[#allocation10 + $0x6c] ss:$16 sps:$4 sm:$0xff]  }
  0x8b   :  { %636 = vmatprep.subr.bf16.mxu0 %v4851_v33  ;;  %v4899_v52 = vld [vmem:[#allocation10 + $0xc0] ss:$16 sps:$4 sm:$0xff]   ;;  %v4902_v53 = vld [vmem:[#allocation10 + $0xe4] ss:$16 sps:$4 sm:$0xff]   ;;  %v4906_v54 = vld [vmem:[#allocation10 + $0x68] ss:$16 sps:$4 sm:$0xff]  }
  0x8c   :  { %v261_v36 = vcombine.low %v253_v32, %v260_v34  ;;  %v4909_v55 = vld [vmem:[#allocation10 + $0x8c] ss:$16 sps:$4 sm:$0xff]   ;;  %v4911_v56 = vld [vmem:[#allocation10 + $0xe0] ss:$16 sps:$4 sm:$0xff]   ;;  %v4916_v58 = vld [vmem:[#allocation10 + $0x88] ss:$16 sps:$4 sm:$0xff]  }
  0x8d   :  { %v468_v57 = vld [vmem:[#allocation7] sm:$0x3]  ;;  %v4924_v61 = vld [vmem:[#allocation10 + $0xa8] ss:$16 sps:$4 sm:$0xff]   ;;  %v5903_v3 = vsub.s32 0, %v4830_v4  ;;  %v5901_v6 = vsub.s32 1, %v4830_v4 }
  0x8e   :  { %3717 = vmatmul.mubr.msk.bf16.vlgmr.msra.gmra.mrb[0].mxu1 %vm282_vm0, %v261_v36  ;;  %637 = vmatpush1.bf16.msra.mxu0 %v4858_v38  ;;  %v4919_v59 = vld [vmem:[#allocation10 + $0xac] ss:$16 sps:$4 sm:$0xff]   ;;  %v471_v60 = vpack.c.bf16 %v468_v57, %v468_v57  ;;  %v4932_v63 = vld [vmem:[#allocation10 + $0xc8] ss:$16 sps:$4 sm:$0xff]   ;;  %v4651_v11 = vmov 1983009808  }
  0x8f   :  { %330 = vmatpush1.bf16.msra.mxu1 %v3928_v35  ;;  %361 = vmatprep.mubr.bf16.mxu1 %v4649_v0  ;;  %v4927_v62 = vld [vmem:[#allocation10 + $0xcc] ss:$16 sps:$4 sm:$0xff]   ;;  %v4941_v2 = vld [vmem:[#allocation10 + $0xe8] ss:$16 sps:$4 sm:$0xff]   ;;  %v385_v12 = vunpack.c.l.s4 %v4651_v11  ;;  %v5902_v15 = vsub.s32 2, %v4830_v4  ;;  %v5900_v18 = vsub.s32 3, %v4830_v4 }
  0x90   :  { %673 = vmatprep.subr.bf16.mxu1 %v4855_v37  ;;  %638 = vmatprep.subr.bf16.mxu0 %v4860_v39  ;;  %v4936_v1 = vld [vmem:[#allocation10 + $0xec] ss:$16 sps:$4 sm:$0xff]   ;;  %vm3535_vm2 = vcmask 1041408  }
  0x91   :  { %v175_v5 = vld [vmem:[%s5891_s5] sm:$0xf]  ;;  %v386_v26 = vunpack.c.0.s8 %v385_v12 }
  0x92   :  { %639 = vmatpush1.bf16.msra.mxu0 %v4866_v40  ;;  %v188_v7 = vrot.slane %v175_v5, %v5903_v3  ;;  %v192_v8 = vrot.slane %v175_v5, %v5901_v6  ;;  %v196_v27 = vrot.slane %v175_v5, %v5902_v15  ;;  %v200_v32 = vrot.slane %v175_v5, %v5900_v18 }
  0x93   :  { %640 = vmatprep.subr.bf16.mxu0 %v4869_v41  ;;  %v4993_v35 = vsub.s32 %v386_v26, %v4830_v4 }
  0x96   :  { %3718 = vmatmul.mubr.msk.bf16.vlgmr.msra.gmra.mrb[4].mxu1 %vm282_vm0, %v261_v36  ;;  %641 = vmatpush1.bf16.msra.mxu0 %v4876_v44 }
  0x97   :  { %674 = vmatpush1.bf16.msra.mxu1 %v4871_v42  ;;  %705 = vmatprep.mubr.bf16.mxu1 %v4649_v0 }
  0x98   :  { %675 = vmatprep.subr.bf16.mxu1 %v4873_v43  ;;  %642 = vmatprep.subr.bf16.mxu0 %v4879_v45 }
  0x9a   :  { %643 = vmatpush1.bf16.msra.mxu0 %v4890_v48 }
  0x9b   :  { %676 = vmatpush1.bf16.msra.mxu1 %v4883_v46  ;;  %644 = vmatprep.subr.bf16.mxu0 %v4895_v50 }
  0x9c   :  { %677 = vmatprep.subr.bf16.mxu1 %v4887_v47 }
  0x9e   :  { %645 = vmatpush1.bf16.msra.mxu0 %v4899_v52 }
  0x9f   :  { %678 = vmatpush1.bf16.msra.mxu1 %v4892_v49  ;;  %646 = vmatprep.subr.bf16.mxu0 %v4902_v53 }
  0xa0   :  { %679 = vmatprep.subr.bf16.mxu1 %v4897_v51 }
  0xa2   :  { %647 = vmatpush1.bf16.msra.mxu0 %v4911_v56 }
  0xa3   :  { %680 = vmatpush1.bf16.msra.mxu1 %v4906_v54  ;;  %772 = vmatprep.subr.bf16.mxu0 %v4837_v24 }
  0xa4   :  { %681 = vmatprep.subr.bf16.mxu1 %v4909_v55 }
  0xa5   :  { %665 = vmatmul.mubr.bf16.vlgmr.msra.gmra.mrb[0].mxu0 %v471_v60 }
  0xa6   :  { %773 = vmatpush1.bf16.msra.mxu0 %v4839_v25  ;;  %804 = vmatprep.mubr.bf16.mxu0 %v4649_v0 }
  0xa7   :  { %682 = vmatpush1.bf16.msra.mxu1 %v4916_v58  ;;  %774 = vmatprep.subr.bf16.mxu0 %v4844_v29 }
  0xa8   :  { %683 = vmatprep.subr.bf16.mxu1 %v4919_v59 }
  0xaa   :  { %775 = vmatpush1.bf16.msra.mxu0 %v4847_v30 }
  0xab   :  { %684 = vmatpush1.bf16.msra.mxu1 %v4924_v61  ;;  %776 = vmatprep.subr.bf16.mxu0 %v4851_v33 }
  0xac   :  { %685 = vmatprep.subr.bf16.mxu1 %v4927_v62 }
  0xae   :  { %777 = vmatpush1.bf16.msra.mxu0 %v4858_v38 }
  0xaf   :  { %686 = vmatpush1.bf16.msra.mxu1 %v4932_v63  ;;  %778 = vmatprep.subr.bf16.mxu0 %v4860_v39 }
  0xb0   :  { %687 = vmatprep.subr.bf16.mxu1 %v4936_v1 }
  0xb2   :  { %779 = vmatpush1.bf16.msra.mxu0 %v4866_v40 }
  0xb3   :  { %688 = vmatpush1.bf16.msra.mxu1 %v4941_v2  ;;  %780 = vmatprep.subr.bf16.mxu0 %v4869_v41 }
  0xb4   :  { %813 = vmatprep.subr.bf16.mxu1 %v4855_v37 }
  0xb6   :  { %706 = vmatmul.mubr.bf16.vlgmr.msra.gmra.mrb[8].mxu1 %v471_v60  ;;  %781 = vmatpush1.bf16.msra.mxu0 %v4876_v44 }
  0xb7   :  { %814 = vmatpush1.bf16.msra.mxu1 %v4871_v42  ;;  %845 = vmatprep.mubr.bf16.mxu1 %v4649_v0 }
  0xb8   :  { %815 = vmatprep.subr.bf16.mxu1 %v4873_v43  ;;  %782 = vmatprep.subr.bf16.mxu0 %v4879_v45 }
  0xba   :  { %783 = vmatpush1.bf16.msra.mxu0 %v4890_v48 }
  0xbb   :  { %816 = vmatpush1.bf16.msra.mxu1 %v4883_v46  ;;  %784 = vmatprep.subr.bf16.mxu0 %v4895_v50 }
  0xbc   :  { %817 = vmatprep.subr.bf16.mxu1 %v4887_v47 }
  0xbe   :  { %785 = vmatpush1.bf16.msra.mxu0 %v4899_v52 }
  0xbf   :  { %818 = vmatpush1.bf16.msra.mxu1 %v4892_v49  ;;  %786 = vmatprep.subr.bf16.mxu0 %v4902_v53 }
  0xc0   :  { %819 = vmatprep.subr.bf16.mxu1 %v4897_v51 }
  0xc2   :  { %787 = vmatpush1.bf16.msra.mxu0 %v4911_v56 }
  0xc3   :  { %820 = vmatpush1.bf16.msra.mxu1 %v4906_v54  ;;  %913 = vmatprep.subr.bf16.mxu0 %v4837_v24 }
  0xc4   :  { %821 = vmatprep.subr.bf16.mxu1 %v4909_v55 }
  0xc7   :  { %822 = vmatpush1.bf16.msra.mxu1 %v4916_v58 }
  0xc8   :  { %823 = vmatprep.subr.bf16.mxu1 %v4919_v59 }
  0xcb   :  { %824 = vmatpush1.bf16.msra.mxu1 %v4924_v61 }
  0xcc   :  { %825 = vmatprep.subr.bf16.mxu1 %v4927_v62 }
  0xcf   :  { %826 = vmatpush1.bf16.msra.mxu1 %v4932_v63 }
  0xd0   :  { %827 = vmatprep.subr.bf16.mxu1 %v4936_v1 }
  0xd3   :  { %828 = vmatpush1.bf16.msra.mxu1 %v4941_v2 }
  0xd4   :  { %954 = vmatprep.subr.bf16.mxu1 %v4855_v37 }
 0x161   :  { %v320_v9 = vpop.f32.mrb[0].mxu1 }
 0x162   :  { %v321_v13 = vadd.f32 %v320_v9, %v188_v7  ;;  %v322_v14 = vpop.f32.mrb[1].mxu1 }
 0x163   :  { %v323_v16 = vadd.f32 %v322_v14, %v192_v8  ;;  %v324_v17 = vpop.f32.mrb[2].mxu1 }
 0x164   :  { %v325_v19 = vadd.f32 %v324_v17, %v188_v7  ;;  %v326_v20 = vpop.f32.mrb[3].mxu1 }
 0x165   :  { %v380_v21 = vcombine.low %v321_v13, %v323_v16  ;;  %v381_v22 = vcombine.high %v321_v13, %v323_v16  ;;  %v327_v23 = vadd.f32 %v326_v20, %v192_v8 }
 0x167   :  { %v416_v28 = vcombine.low %v325_v19, %v327_v23  ;;  %v417_v31 = vcombine.high %v325_v19, %v327_v23  ;;  %v4996_v14 = vrot.slane %v380_v21, %v4993_v35  ;;  %v4999_v16 = vrot.slane %v381_v22, %v4993_v35 }
 0x169   :  { %v363_v34 = vpop.f32.mrb[4].mxu1 }
 0x16a   :  { %v364_v36 = vadd.f32 %v363_v34, %v196_v27  ;;  %v365_v57 = vpop.f32.mrb[5].mxu1 }
 0x16b   :  { %v366_v60 = vadd.f32 %v365_v57, %v200_v32  ;;  %v367_v7 = vpop.f32.mrb[6].mxu1 }
 0x16c   :  { %v368_v9 = vadd.f32 %v367_v7, %v196_v27  ;;  %v369_v11 = vpop.f32.mrb[7].mxu1  ;;  %v5016_v27 = vrot.slane %v416_v28, %v4993_v35 }
 0x16d   :  { %v382_v8 = vcombine.low %v364_v36, %v366_v60  ;;  %v383_v12 = vcombine.high %v364_v36, %v366_v60  ;;  %v370_v13 = vadd.f32 %v369_v11, %v200_v32  ;;  %v5019_v32 = vrot.slane %v417_v31, %v4993_v35 }
 0x16f   :  { %v5002_v5 = vrot.slane %v382_v8, %v4993_v35  ;;  %v5005_v17 = vrot.slane %v383_v12, %v4993_v35  ;;  %v418_v19 = vcombine.low %v368_v9, %v370_v13  ;;  %v419_v20 = vcombine.high %v368_v9, %v370_v13 }
 0x171   :  { %v412_v23 = vcombine.low %v4996_v14, %v5002_v5  ;;  %v5022_v34 = vrot.slane %v418_v19, %v4993_v35  ;;  %v5025_v36 = vrot.slane %v419_v20, %v4993_v35 }
 0x178   :  { %v666_v31 = vpop.f32.mrb[0].mxu0 }
 0x179   :  { %v668_v9 = vpop.f32.mrb[1].mxu0 }
 0x17a   :  { %v718_v11 = vcombine.low %v666_v31, %v668_v9  ;;  %v670_v8 = vpop.f32.mrb[2].mxu0 }
 0x17b   :  { %v671_v12 = vpop.f32.mrb[3].mxu0 }
 0x17c   :  { %v726_v20 = vrot.slane %v718_v11, %v4993_v35 }
 0x189   :  { %v707_v13 = vpop.f32.mrb[8].mxu1 }
 0x18a   :  { %v709_v19 = vpop.f32.mrb[9].mxu1 }
 0x18b   :  { %v719_v18 = vcombine.low %v707_v13, %v709_v19  ;;  %v711_v6 = vpop.f32.mrb[10].mxu1 }
 0x18c   :  { %v712_v15 = vpop.f32.mrb[11].mxu1 }
 0x18d   :  { %v733_v3 = vrot.slane %v719_v18, %v4993_v35 }
 0x18f   :  { %v734_v60 = vcombine.low %v726_v20, %v733_v3  ;;  %v469_v3 = vld [vmem:[%s5888_s2] sm:$0x3] }
 0x191   :  { %v736_v57 = vadd.f32 %v734_v60, %v412_v23 }
 0x193   :  { %v3751_v7 = vmul.f32 -1.442695, %v736_v57  ;;  %v744_v22 = vrot.slane %v736_v57, 2  ;;  %v755_v21 = vrot.slane %v736_v57, 6  ;;  %v752_v8 = vrot.slane %v736_v57, 4 }
 0x195   :  { %4083 = vpow2.f32 %v3751_v7  ;;  %v3752_v28 = vmul.f32 -1.442695, %v744_v22  ;;  %v3753_v31 = vmul.f32 -1.442695, %v755_v21 }
 0x197   :  { %4085 = vpow2.f32 %v3752_v28 }
 0x198   :  { %4087 = vpow2.f32 %v3753_v31 }
 0x19f   :  { %v4084_v9 = vpop.eup %4083 }
 0x1a0   :  { %v740_v12 = vadd.f32 1.0, %v4084_v9 }
 0x1a1   :  { %v4086_v26 = vpop.eup %4085 }
 0x1a2   :  { %4089 = vrcp.f32 %v740_v12  ;;  %v749_v11 = vadd.f32 1.0, %v4086_v26  ;;  %v4088_v6 = vpop.eup %4087 }
 0x1a3   :  { %4091 = vtanh.f32 %v752_v8  ;;  %v760_v22 = vadd.f32 1.0, %v4088_v6 }
 0x1a4   :  { %4093 = vrcp.f32 %v749_v11 }
 0x1a5   :  { %4095 = vrcp.f32 %v760_v22 }
 0x1ac   :  { %v4090_v15 = vpop.eup %4089 }
 0x1ad   :  { %v4092_v18 = vpop.eup %4091 }
 0x1ae   :  { %v4094_v23 = vpop.eup %4093  ;;  %v764_v21 = vmul.f32 %v4092_v18, %v4090_v15 }
 0x1af   :  { %v763_v60 = vmul.f32 %v4094_v23, %v469_v3  ;;  %v4096_v57 = vpop.eup %4095 }
 0x1b1   :  { %v5040_v7 = vadd.f32 %v764_v21, %v763_v60  ;;  %v5904_v60 = vcombine.high %v4996_v14, %v5002_v5 }
 0x1b3   :  { %4097 = vtanh.f32 %v5040_v7 }
 0x1bd   :  { %v4098_v26 = vpop.eup %4097 }
 0x1be   :  { %v767_v28 = vmul.f32 %v4098_v26, %v4096_v57 }
 0x1c0   :  { %v768_v13 = vpack.c.bf16 %v767_v28, %v767_v28 }
 0x1c2   :  { %769 = vst [vmem:[#allocation2] sm:$0x1] %v768_v13  ;;  %805 = vmatmul.mubr.bf16.vlgmr.msra.gmra.mrb[4].mxu0 %v768_v13  ;;  %846 = vmatmul.mubr.bf16.vlgmr.msra.gmra.mrb[12].mxu1 %v768_v13 }
 0x1c3   :  { %914 = vmatpush1.bf16.msra.mxu0 %v4839_v25  ;;  %955 = vmatpush1.bf16.msra.mxu1 %v4871_v42 }
 0x1c4   :  { %915 = vmatprep.subr.bf16.mxu0 %v4844_v29  ;;  %956 = vmatprep.subr.bf16.mxu1 %v4873_v43 }
 0x1c5   :  { %945 = vmatprep.mubr.bf16.mxu0 %v4649_v0  ;;  %986 = vmatprep.mubr.bf16.mxu1 %v4649_v0 }
 0x1c7   :  { %916 = vmatpush1.bf16.msra.mxu0 %v4847_v30  ;;  %957 = vmatpush1.bf16.msra.mxu1 %v4883_v46 }
 0x1c8   :  { %917 = vmatprep.subr.bf16.mxu0 %v4851_v33  ;;  %958 = vmatprep.subr.bf16.mxu1 %v4887_v47 }
 0x1cb   :  { %918 = vmatpush1.bf16.msra.mxu0 %v4858_v38  ;;  %959 = vmatpush1.bf16.msra.mxu1 %v4892_v49 }
 0x1cc   :  { %919 = vmatprep.subr.bf16.mxu0 %v4860_v39  ;;  %960 = vmatprep.subr.bf16.mxu1 %v4897_v51 }
 0x1cf   :  { %920 = vmatpush1.bf16.msra.mxu0 %v4866_v40  ;;  %961 = vmatpush1.bf16.msra.mxu1 %v4906_v54 }
 0x1d0   :  { %921 = vmatprep.subr.bf16.mxu0 %v4869_v41  ;;  %962 = vmatprep.subr.bf16.mxu1 %v4909_v55 }
 0x1d3   :  { %922 = vmatpush1.bf16.msra.mxu0 %v4876_v44  ;;  %963 = vmatpush1.bf16.msra.mxu1 %v4916_v58 }
 0x1d4   :  { %923 = vmatprep.subr.bf16.mxu0 %v4879_v45  ;;  %964 = vmatprep.subr.bf16.mxu1 %v4919_v59 }
 0x1d7   :  { %924 = vmatpush1.bf16.msra.mxu0 %v4890_v48  ;;  %965 = vmatpush1.bf16.msra.mxu1 %v4924_v61 }
 0x1d8   :  { %925 = vmatprep.subr.bf16.mxu0 %v4895_v50  ;;  %966 = vmatprep.subr.bf16.mxu1 %v4927_v62 }
 0x1db   :  { %926 = vmatpush1.bf16.msra.mxu0 %v4899_v52  ;;  %967 = vmatpush1.bf16.msra.mxu1 %v4932_v63 }
 0x1dc   :  { %927 = vmatprep.subr.bf16.mxu0 %v4902_v53  ;;  %968 = vmatprep.subr.bf16.mxu1 %v4936_v1 }
 0x1df   :  { %928 = vmatpush1.bf16.msra.mxu0 %v4911_v56  ;;  %969 = vmatpush1.bf16.msra.mxu1 %v4941_v2 }
 0x1e0   :  { %1054 = vmatprep.subr.bf16.mxu0 %v4837_v24  ;;  %1095 = vmatprep.subr.bf16.mxu1 %v4855_v37 }
 0x295   :  { %v806_v19 = vpop.f32.mrb[4].mxu0  ;;  %v847_v20 = vpop.f32.mrb[12].mxu1 }
 0x296   :  { %v808_v31 = vpop.f32.mrb[5].mxu0  ;;  %v849_v9 = vpop.f32.mrb[13].mxu1 }
 0x297   :  { %v858_v8 = vcombine.low %v806_v19, %v808_v31  ;;  %v859_v12 = vcombine.low %v847_v20, %v849_v9  ;;  %v810_v11 = vpop.f32.mrb[6].mxu0  ;;  %v851_v6 = vpop.f32.mrb[14].mxu1 }
 0x298   :  { %v811_v15 = vpop.f32.mrb[7].mxu0  ;;  %v852_v3 = vpop.f32.mrb[15].mxu1 }
 0x299   :  { %v866_v18 = vrot.slane %v858_v8, %v4993_v35  ;;  %v873_v23 = vrot.slane %v859_v12, %v4993_v35 }
 0x29b   :  { %v874_v22 = vcombine.low %v866_v18, %v873_v23 }
 0x29d   :  { %v876_v21 = vadd.f32 %v874_v22, %v5904_v60 }
 0x29f   :  { %v3754_v57 = vmul.f32 -1.442695, %v876_v21  ;;  %v884_v26 = vrot.slane %v876_v21, 2  ;;  %v895_v13 = vrot.slane %v876_v21, 6  ;;  %v892_v31 = vrot.slane %v876_v21, 4 }
 0x2a1   :  { %4099 = vpow2.f32 %v3754_v57  ;;  %v3755_v28 = vmul.f32 -1.442695, %v884_v26  ;;  %v3756_v19 = vmul.f32 -1.442695, %v895_v13 }
 0x2a3   :  { %4101 = vpow2.f32 %v3755_v28 }
 0x2a4   :  { %4103 = vpow2.f32 %v3756_v19 }
 0x2ab   :  { %v4100_v20 = vpop.eup %4099 }
 0x2ac   :  { %v880_v9 = vadd.f32 1.0, %v4100_v20 }
 0x2ad   :  { %v4102_v11 = vpop.eup %4101 }
 0x2ae   :  { %4105 = vrcp.f32 %v880_v9  ;;  %v889_v8 = vadd.f32 1.0, %v4102_v11  ;;  %v4104_v12 = vpop.eup %4103 }
 0x2af   :  { %4107 = vtanh.f32 %v892_v31  ;;  %v900_v15 = vadd.f32 1.0, %v4104_v12 }
 0x2b0   :  { %4109 = vrcp.f32 %v889_v8 }
 0x2b1   :  { %4111 = vrcp.f32 %v900_v15 }
 0x2b8   :  { %v4106_v6 = vpop.eup %4105 }
 0x2b9   :  { %v4108_v14 = vpop.eup %4107 }
 0x2ba   :  { %v4110_v5 = vpop.eup %4109  ;;  %v904_v18 = vmul.f32 %v4108_v14, %v4106_v6 }
 0x2bb   :  { %v903_v3 = vmul.f32 %v4110_v5, %v5040_v7  ;;  %v4112_v22 = vpop.eup %4111 }
 0x2bd   :  { %v5083_v23 = vadd.f32 %v904_v18, %v903_v3 }
 0x2bf   :  { %4113 = vtanh.f32 %v5083_v23 }
 0x2c9   :  { %v4114_v60 = vpop.eup %4113 }
 0x2ca   :  { %v907_v21 = vmul.f32 %v4114_v60, %v4112_v22 }
 0x2cc   :  { %v908_v57 = vpack.c.bf16 %v907_v21, %v907_v21 }
 0x2ce   :  { %910 = vst [vmem:[#allocation2 + $0x1] sm:$0x1] %v908_v57  ;;  %946 = vmatmul.mubr.bf16.vlgmr.msra.gmra.mrb[8].mxu0 %v908_v57  ;;  %987 = vmatmul.mubr.bf16.vlgmr.msra.gmra.mrb[16].mxu1 %v908_v57 }
 0x2cf   :  { %1055 = vmatpush1.bf16.msra.mxu0 %v4839_v25  ;;  %1096 = vmatpush1.bf16.msra.mxu1 %v4871_v42 }
 0x2d0   :  { %1056 = vmatprep.subr.bf16.mxu0 %v4844_v29  ;;  %1097 = vmatprep.subr.bf16.mxu1 %v4873_v43 }
 0x2d1   :  { %1086 = vmatprep.mubr.bf16.mxu0 %v4649_v0  ;;  %1127 = vmatprep.mubr.bf16.mxu1 %v4649_v0 }
 0x2d3   :  { %1057 = vmatpush1.bf16.msra.mxu0 %v4847_v30  ;;  %1098 = vmatpush1.bf16.msra.mxu1 %v4883_v46 }
 0x2d4   :  { %1058 = vmatprep.subr.bf16.mxu0 %v4851_v33  ;;  %1099 = vmatprep.subr.bf16.mxu1 %v4887_v47 }
 0x2d7   :  { %1059 = vmatpush1.bf16.msra.mxu0 %v4858_v38  ;;  %1100 = vmatpush1.bf16.msra.mxu1 %v4892_v49 }
 0x2d8   :  { %1060 = vmatprep.subr.bf16.mxu0 %v4860_v39  ;;  %1101 = vmatprep.subr.bf16.mxu1 %v4897_v51 }
 0x2db   :  { %1061 = vmatpush1.bf16.msra.mxu0 %v4866_v40  ;;  %1102 = vmatpush1.bf16.msra.mxu1 %v4906_v54 }
 0x2dc   :  { %1062 = vmatprep.subr.bf16.mxu0 %v4869_v41  ;;  %1103 = vmatprep.subr.bf16.mxu1 %v4909_v55 }
 0x2df   :  { %1063 = vmatpush1.bf16.msra.mxu0 %v4876_v44  ;;  %1104 = vmatpush1.bf16.msra.mxu1 %v4916_v58 }
 0x2e0   :  { %1064 = vmatprep.subr.bf16.mxu0 %v4879_v45  ;;  %1105 = vmatprep.subr.bf16.mxu1 %v4919_v59 }
 0x2e3   :  { %1065 = vmatpush1.bf16.msra.mxu0 %v4890_v48  ;;  %1106 = vmatpush1.bf16.msra.mxu1 %v4924_v61 }
 0x2e4   :  { %1066 = vmatprep.subr.bf16.mxu0 %v4895_v50  ;;  %1107 = vmatprep.subr.bf16.mxu1 %v4927_v62 }
 0x2e7   :  { %1067 = vmatpush1.bf16.msra.mxu0 %v4899_v52  ;;  %1108 = vmatpush1.bf16.msra.mxu1 %v4932_v63 }
 0x2e8   :  { %1068 = vmatprep.subr.bf16.mxu0 %v4902_v53  ;;  %1109 = vmatprep.subr.bf16.mxu1 %v4936_v1 }
 0x2eb   :  { %1069 = vmatpush1.bf16.msra.mxu0 %v4911_v56  ;;  %1110 = vmatpush1.bf16.msra.mxu1 %v4941_v2 }
 0x2ec   :  { %1195 = vmatprep.subr.bf16.mxu0 %v4837_v24  ;;  %1236 = vmatprep.subr.bf16.mxu1 %v4855_v37  ;;  %v5905_v24 = vcombine.low %v4999_v16, %v5005_v17 }
 0x3a1   :  { %v947_v7 = vpop.f32.mrb[8].mxu0  ;;  %v988_v26 = vpop.f32.mrb[16].mxu1 }
 0x3a2   :  { %v949_v28 = vpop.f32.mrb[9].mxu0  ;;  %v990_v13 = vpop.f32.mrb[17].mxu1 }
 0x3a3   :  { %v999_v19 = vcombine.low %v947_v7, %v949_v28  ;;  %v1000_v20 = vcombine.low %v988_v26, %v990_v13  ;;  %v951_v31 = vpop.f32.mrb[10].mxu0  ;;  %v992_v9 = vpop.f32.mrb[18].mxu1 }
 0x3a4   :  { %v952_v11 = vpop.f32.mrb[11].mxu0  ;;  %v993_v8 = vpop.f32.mrb[19].mxu1 }
 0x3a5   :  { %v1007_v12 = vrot.slane %v999_v19, %v4993_v35  ;;  %v1014_v6 = vrot.slane %v1000_v20, %v4993_v35 }
 0x3a7   :  { %v1015_v14 = vcombine.low %v1007_v12, %v1014_v6 }
 0x3a9   :  { %v1017_v5 = vadd.f32 %v1015_v14, %v5905_v24 }
 0x3ab   :  { %v3757_v15 = vmul.f32 -1.442695, %v1017_v5  ;;  %v1025_v3 = vrot.slane %v1017_v5, 2  ;;  %v1036_v22 = vrot.slane %v1017_v5, 6  ;;  %v1033_v57 = vrot.slane %v1017_v5, 4 }
 0x3ad   :  { %4115 = vpow2.f32 %v3757_v15  ;;  %v3758_v18 = vmul.f32 -1.442695, %v1025_v3  ;;  %v3759_v60 = vmul.f32 -1.442695, %v1036_v22 }
 0x3af   :  { %4117 = vpow2.f32 %v3758_v18 }
 0x3b0   :  { %4119 = vpow2.f32 %v3759_v60 }
 0x3b7   :  { %v4116_v21 = vpop.eup %4115 }
 0x3b8   :  { %v1021_v7 = vadd.f32 1.0, %v4116_v21 }
 0x3b9   :  { %v4118_v26 = vpop.eup %4117 }
 0x3ba   :  { %4121 = vrcp.f32 %v1021_v7  ;;  %v1030_v28 = vadd.f32 1.0, %v4118_v26  ;;  %v4120_v13 = vpop.eup %4119 }
 0x3bb   :  { %4123 = vtanh.f32 %v1033_v57  ;;  %v1041_v9 = vadd.f32 1.0, %v4120_v13 }
 0x3bc   :  { %4125 = vrcp.f32 %v1030_v28 }
 0x3bd   :  { %4127 = vrcp.f32 %v1041_v9 }
 0x3c4   :  { %v4122_v19 = vpop.eup %4121 }
 0x3c5   :  { %v4124_v20 = vpop.eup %4123 }
 0x3c6   :  { %v4126_v31 = vpop.eup %4125  ;;  %v1045_v8 = vmul.f32 %v4124_v20, %v4122_v19 }
 0x3c7   :  { %v1044_v11 = vmul.f32 %v4126_v31, %v5083_v23  ;;  %v4128_v6 = vpop.eup %4127 }
 0x3c9   :  { %v5126_v12 = vadd.f32 %v1045_v8, %v1044_v11 }
 0x3cb   :  { %4129 = vtanh.f32 %v5126_v12 }
 0x3d5   :  { %v4130_v14 = vpop.eup %4129 }
 0x3d6   :  { %v1048_v24 = vmul.f32 %v4130_v14, %v4128_v6  ;;  %v5174_v6 = vld [vmem:[#allocation10] ss:$16 sps:$4 sm:$0xff]   ;;  %v5177_v14 = vld [vmem:[#allocation10 + $0x8] ss:$16 sps:$4 sm:$0xff]  }
 0x3d8   :  { %v1049_v5 = vpack.c.bf16 %v1048_v24, %v1048_v24  ;;  %v5183_v24 = vld [vmem:[#allocation10 + $0x2c] ss:$16 sps:$4 sm:$0xff]  }
 0x3da   :  { %1051 = vst [vmem:[#allocation2 + $0x2] sm:$0x1] %v1049_v5  ;;  %1087 = vmatmul.mubr.bf16.vlgmr.msra.gmra.mrb[12].mxu0 %v1049_v5  ;;  %1128 = vmatmul.mubr.bf16.vlgmr.msra.gmra.mrb[20].mxu1 %v1049_v5  ;;  %v5188_v5 = vld [vmem:[#allocation10 + $0x20] ss:$16 sps:$4 sm:$0xff]  }
 0x3db   :  { %1196 = vmatpush1.bf16.msra.mxu0 %v4839_v25  ;;  %1237 = vmatpush1.bf16.msra.mxu1 %v4871_v42  ;;  %v5161_v25 = vld [vmem:[#allocation10 + $0x4] ss:$16 sps:$4 sm:$0xff]  }
 0x3dc   :  { %1197 = vmatprep.subr.bf16.mxu0 %v4844_v29  ;;  %1238 = vmatprep.subr.bf16.mxu1 %v4873_v43 }
 0x3dd   :  { %1227 = vmatprep.mubr.bf16.mxu0 %v4649_v0  ;;  %1268 = vmatprep.mubr.bf16.mxu1 %v4649_v0 }
 0x3df   :  { %1198 = vmatpush1.bf16.msra.mxu0 %v4847_v30  ;;  %1239 = vmatpush1.bf16.msra.mxu1 %v4883_v46 }
 0x3e0   :  { %1199 = vmatprep.subr.bf16.mxu0 %v4851_v33  ;;  %1240 = vmatprep.subr.bf16.mxu1 %v4887_v47 }
 0x3e3   :  { %1200 = vmatpush1.bf16.msra.mxu0 %v4858_v38  ;;  %1241 = vmatpush1.bf16.msra.mxu1 %v4892_v49 }
 0x3e4   :  { %1201 = vmatprep.subr.bf16.mxu0 %v4860_v39  ;;  %1242 = vmatprep.subr.bf16.mxu1 %v4897_v51 }
 0x3e7   :  { %1202 = vmatpush1.bf16.msra.mxu0 %v4866_v40  ;;  %1243 = vmatpush1.bf16.msra.mxu1 %v4906_v54 }
 0x3e8   :  { %1203 = vmatprep.subr.bf16.mxu0 %v4869_v41  ;;  %1244 = vmatprep.subr.bf16.mxu1 %v4909_v55 }
 0x3eb   :  { %1204 = vmatpush1.bf16.msra.mxu0 %v4876_v44  ;;  %1245 = vmatpush1.bf16.msra.mxu1 %v4916_v58 }
 0x3ec   :  { %1205 = vmatprep.subr.bf16.mxu0 %v4879_v45  ;;  %1246 = vmatprep.subr.bf16.mxu1 %v4919_v59 }
 0x3ef   :  { %1206 = vmatpush1.bf16.msra.mxu0 %v4890_v48  ;;  %1247 = vmatpush1.bf16.msra.mxu1 %v4924_v61 }
 0x3f0   :  { %1207 = vmatprep.subr.bf16.mxu0 %v4895_v50  ;;  %1248 = vmatprep.subr.bf16.mxu1 %v4927_v62  ;;  %v5906_v50 = vcombine.high %v4999_v16, %v5005_v17 }
 0x3f3   :  { %1208 = vmatpush1.bf16.msra.mxu0 %v4899_v52  ;;  %1249 = vmatpush1.bf16.msra.mxu1 %v4932_v63 }
 0x3f4   :  { %1209 = vmatprep.subr.bf16.mxu0 %v4902_v53  ;;  %1250 = vmatprep.subr.bf16.mxu1 %v4936_v1 }
 0x3f7   :  { %1210 = vmatpush1.bf16.msra.mxu0 %v4911_v56  ;;  %1251 = vmatpush1.bf16.msra.mxu1 %v4941_v2 }
 0x3f8   :  { %1336 = vmatprep.subr.bf16.mxu0 %v5161_v25  ;;  %1377 = vmatprep.subr.bf16.mxu1 %v4855_v37 }
 0x4ad   :  { %v1088_v29 = vpop.f32.mrb[12].mxu0  ;;  %v1129_v30 = vpop.f32.mrb[20].mxu1 }
 0x4ae   :  { %v1090_v33 = vpop.f32.mrb[13].mxu0  ;;  %v1131_v38 = vpop.f32.mrb[21].mxu1 }
 0x4af   :  { %v1140_v39 = vcombine.low %v1088_v29, %v1090_v33  ;;  %v1141_v40 = vcombine.low %v1129_v30, %v1131_v38  ;;  %v1092_v41 = vpop.f32.mrb[14].mxu0  ;;  %v1133_v42 = vpop.f32.mrb[22].mxu1  ;;  %v5191_v29 = vld [vmem:[#allocation10 + $0x28] ss:$16 sps:$4 sm:$0xff]   ;;  %v5194_v30 = vld [vmem:[#allocation10 + $0x44] ss:$16 sps:$4 sm:$0xff]  }
 0x4b0   :  { %v1093_v43 = vpop.f32.mrb[15].mxu0  ;;  %v1134_v44 = vpop.f32.mrb[23].mxu1  ;;  %v5198_v33 = vld [vmem:[#allocation10 + $0x40] ss:$16 sps:$4 sm:$0xff]   ;;  %v5202_v38 = vld [vmem:[#allocation10 + $0x64] ss:$16 sps:$4 sm:$0xff]  }
 0x4b1   :  { %v1148_v45 = vrot.slane %v1140_v39, %v4993_v35  ;;  %v1155_v46 = vrot.slane %v1141_v40, %v4993_v35  ;;  %v5206_v39 = vld [vmem:[#allocation10 + $0x60] ss:$16 sps:$4 sm:$0xff]   ;;  %v5210_v40 = vld [vmem:[#allocation10 + $0x84] ss:$16 sps:$4 sm:$0xff]  }
 0x4b3   :  { %v1156_v48 = vcombine.low %v1148_v45, %v1155_v46 }
 0x4b5   :  { %v1158_v52 = vadd.f32 %v1156_v48, %v5906_v50  ;;  %v5907_v50 = vcombine.low %v5016_v27, %v5022_v34 }
 0x4b7   :  { %v3760_v37 = vmul.f32 -1.442695, %v1158_v52  ;;  %v1166_v53 = vrot.slane %v1158_v52, 2  ;;  %v1177_v15 = vrot.slane %v1158_v52, 6  ;;  %v1174_v22 = vrot.slane %v1158_v52, 4 }
 0x4b9   :  { %4131 = vpow2.f32 %v3760_v37  ;;  %v3761_v23 = vmul.f32 -1.442695, %v1166_v53  ;;  %v3762_v3 = vmul.f32 -1.442695, %v1177_v15 }
 0x4bb   :  { %4133 = vpow2.f32 %v3761_v23 }
 0x4bc   :  { %4135 = vpow2.f32 %v3762_v3 }
 0x4c3   :  { %v4132_v18 = vpop.eup %4131 }
 0x4c4   :  { %v1162_v60 = vadd.f32 1.0, %v4132_v18 }
 0x4c5   :  { %v4134_v21 = vpop.eup %4133 }
 0x4c6   :  { %4137 = vrcp.f32 %v1162_v60  ;;  %v1171_v57 = vadd.f32 1.0, %v4134_v21  ;;  %v4136_v7 = vpop.eup %4135 }
 0x4c7   :  { %4139 = vtanh.f32 %v1174_v22  ;;  %v1182_v28 = vadd.f32 1.0, %v4136_v7 }
 0x4c8   :  { %4141 = vrcp.f32 %v1171_v57 }
 0x4c9   :  { %4143 = vrcp.f32 %v1182_v28 }
 0x4d0   :  { %v4138_v26 = vpop.eup %4137 }
 0x4d1   :  { %v4140_v16 = vpop.eup %4139 }
 0x4d2   :  { %v4142_v17 = vpop.eup %4141  ;;  %v1186_v19 = vmul.f32 %v4140_v16, %v4138_v26 }
 0x4d3   :  { %v1185_v13 = vmul.f32 %v4142_v17, %v5126_v12  ;;  %v4144_v31 = vpop.eup %4143  ;;  %v5180_v12 = vld [vmem:[#allocation10 + $0x24] ss:$16 sps:$4 sm:$0xff]  }
 0x4d5   :  { %v5171_v20 = vadd.f32 %v1186_v19, %v1185_v13 }
 0x4d7   :  { %4145 = vtanh.f32 %v5171_v20 }
 0x4e1   :  { %v4146_v9 = vpop.eup %4145 }
 0x4e2   :  { %v1189_v11 = vmul.f32 %v4146_v9, %v4144_v31 }
 0x4e4   :  { %v1190_v8 = vpack.c.bf16 %v1189_v11, %v1189_v11 }
 0x4e6   :  { %1192 = vst [vmem:[#allocation2 + $0x3] sm:$0x1] %v1190_v8  ;;  %1228 = vmatmul.mubr.bf16.vlgmr.msra.gmra.mrb[16].mxu0 %v1190_v8  ;;  %1269 = vmatmul.mubr.bf16.vlgmr.msra.gmra.mrb[24].mxu1 %v1190_v8 }
 0x4e7   :  { %1337 = vmatpush1.bf16.msra.mxu0 %v5174_v6  ;;  %1378 = vmatpush1.bf16.msra.mxu1 %v5177_v14 }
 0x4e8   :  { %1338 = vmatprep.subr.bf16.mxu0 %v5180_v12  ;;  %1379 = vmatprep.subr.bf16.mxu1 %v5183_v24 }
 0x4e9   :  { %1368 = vmatprep.mubr.bf16.mxu0 %v4649_v0  ;;  %1409 = vmatprep.mubr.bf16.mxu1 %v4649_v0 }
 0x4eb   :  { %1339 = vmatpush1.bf16.msra.mxu0 %v5188_v5  ;;  %1380 = vmatpush1.bf16.msra.mxu1 %v5191_v29 }
 0x4ec   :  { %1340 = vmatprep.subr.bf16.mxu0 %v5194_v30  ;;  %1381 = vmatprep.subr.bf16.mxu1 %v4887_v47  ;;  %v5214_v47 = vld [vmem:[#allocation10 + $0x80] ss:$16 sps:$4 sm:$0xff]  }
 0x4ef   :  { %1341 = vmatpush1.bf16.msra.mxu0 %v5198_v33  ;;  %1382 = vmatpush1.bf16.msra.mxu1 %v4892_v49  ;;  %v5218_v49 = vld [vmem:[#allocation10 + $0xa4] ss:$16 sps:$4 sm:$0xff]  }
 0x4f0   :  { %1342 = vmatprep.subr.bf16.mxu0 %v5202_v38  ;;  %1383 = vmatprep.subr.bf16.mxu1 %v4897_v51  ;;  %v5222_v51 = vld [vmem:[#allocation10 + $0xa0] ss:$16 sps:$4 sm:$0xff]  }
 0x4f3   :  { %1343 = vmatpush1.bf16.msra.mxu0 %v5206_v39  ;;  %1384 = vmatpush1.bf16.msra.mxu1 %v4906_v54  ;;  %v5226_v54 = vld [vmem:[#allocation10 + $0xc4] ss:$16 sps:$4 sm:$0xff]  }
 0x4f4   :  { %1344 = vmatprep.subr.bf16.mxu0 %v5210_v40  ;;  %1385 = vmatprep.subr.bf16.mxu1 %v4909_v55  ;;  %v5230_v55 = vld [vmem:[#allocation10 + $0xc0] ss:$16 sps:$4 sm:$0xff]  }
 0x4f7   :  { %1345 = vmatpush1.bf16.msra.mxu0 %v5214_v47  ;;  %1386 = vmatpush1.bf16.msra.mxu1 %v4916_v58  ;;  %v5234_v58 = vld [vmem:[#allocation10 + $0xe4] ss:$16 sps:$4 sm:$0xff]  }
 0x4f8   :  { %1346 = vmatprep.subr.bf16.mxu0 %v5218_v49  ;;  %1387 = vmatprep.subr.bf16.mxu1 %v4919_v59  ;;  %v5241_v59 = vld [vmem:[#allocation10 + $0xc] ss:$16 sps:$4 sm:$0xff]  }
 0x4fb   :  { %1347 = vmatpush1.bf16.msra.mxu0 %v5222_v51  ;;  %1388 = vmatpush1.bf16.msra.mxu1 %v4924_v61 }
 0x4fc   :  { %1348 = vmatprep.subr.bf16.mxu0 %v5226_v54  ;;  %1389 = vmatprep.subr.bf16.mxu1 %v4927_v62 }
 0x4ff   :  { %1349 = vmatpush1.bf16.msra.mxu0 %v5230_v55  ;;  %1390 = vmatpush1.bf16.msra.mxu1 %v4932_v63 }
 0x500   :  { %1350 = vmatprep.subr.bf16.mxu0 %v5234_v58  ;;  %1391 = vmatprep.subr.bf16.mxu1 %v4936_v1 }
 0x503   :  { %1351 = vmatpush1.bf16.msra.mxu0 %v4911_v56  ;;  %1392 = vmatpush1.bf16.msra.mxu1 %v4941_v2 }
 0x504   :  { %1477 = vmatprep.subr.bf16.mxu0 %v5161_v25  ;;  %1518 = vmatprep.subr.bf16.mxu1 %v5241_v59 }
 0x5b9   :  { %v1229_v61 = vpop.f32.mrb[16].mxu0  ;;  %v1270_v62 = vpop.f32.mrb[24].mxu1 }
 0x5ba   :  { %v1231_v41 = vpop.f32.mrb[17].mxu0  ;;  %v1272_v63 = vpop.f32.mrb[25].mxu1 }
 0x5bb   :  { %v1281_v42 = vcombine.low %v1229_v61, %v1231_v41  ;;  %v1282_v43 = vcombine.low %v1270_v62, %v1272_v63  ;;  %v1233_v44 = vpop.f32.mrb[18].mxu0  ;;  %v1274_v45 = vpop.f32.mrb[26].mxu1  ;;  %v5266_v62 = vld [vmem:[#allocation10 + $0x48] ss:$16 sps:$4 sm:$0xff]   ;;  %v5270_v41 = vld [vmem:[#allocation10 + $0x6c] ss:$16 sps:$4 sm:$0xff]  }
 0x5bc   :  { %v1234_v46 = vpop.f32.mrb[19].mxu0  ;;  %v1275_v1 = vpop.f32.mrb[27].mxu1  ;;  %v5274_v63 = vld [vmem:[#allocation10 + $0x68] ss:$16 sps:$4 sm:$0xff]   ;;  %v5286_v44 = vld [vmem:[#allocation10 + $0xac] ss:$16 sps:$4 sm:$0xff]  }
 0x5bd   :  { %v1289_v56 = vrot.slane %v1281_v42, %v4993_v35  ;;  %v1296_v2 = vrot.slane %v1282_v43, %v4993_v35  ;;  %v5278_v42 = vld [vmem:[#allocation10 + $0x8c] ss:$16 sps:$4 sm:$0xff]   ;;  %v5282_v43 = vld [vmem:[#allocation10 + $0x88] ss:$16 sps:$4 sm:$0xff]  }
 0x5be   :  { %v5290_v45 = vld [vmem:[#allocation10 + $0xa8] ss:$16 sps:$4 sm:$0xff]   ;;  %v5294_v46 = vld [vmem:[#allocation10 + $0xcc] ss:$16 sps:$4 sm:$0xff]  }
 0x5bf   :  { %v1297_v48 = vcombine.low %v1289_v56, %v1296_v2  ;;  %v5298_v1 = vld [vmem:[#allocation10 + $0xc8] ss:$16 sps:$4 sm:$0xff]   ;;  %v5302_v56 = vld [vmem:[#allocation10 + $0xec] ss:$16 sps:$4 sm:$0xff]   ;;  %v5305_v2 = vld [vmem:[#allocation10 + $0xe0] ss:$16 sps:$4 sm:$0xff]  }
 0x5c1   :  { %v1299_v52 = vadd.f32 %v1297_v48, %v5907_v50  ;;  %v5308_v48 = vld [vmem:[#allocation10 + $0xe8] ss:$16 sps:$4 sm:$0xff]  }
 0x5c3   :  { %v3763_v37 = vmul.f32 -1.442695, %v1299_v52  ;;  %v1307_v53 = vrot.slane %v1299_v52, 2  ;;  %v1318_v15 = vrot.slane %v1299_v52, 6  ;;  %v1315_v22 = vrot.slane %v1299_v52, 4 }
 0x5c5   :  { %4147 = vpow2.f32 %v3763_v37  ;;  %v3764_v23 = vmul.f32 -1.442695, %v1307_v53  ;;  %v3765_v3 = vmul.f32 -1.442695, %v1318_v15 }
 0x5c7   :  { %4149 = vpow2.f32 %v3764_v23 }
 0x5c8   :  { %4151 = vpow2.f32 %v3765_v3 }
 0x5cf   :  { %v4148_v18 = vpop.eup %4147 }
 0x5d0   :  { %v1303_v60 = vadd.f32 1.0, %v4148_v18 }
 0x5d1   :  { %v4150_v21 = vpop.eup %4149 }
 0x5d2   :  { %4153 = vrcp.f32 %v1303_v60  ;;  %v1312_v57 = vadd.f32 1.0, %v4150_v21  ;;  %v4152_v7 = vpop.eup %4151 }
 0x5d3   :  { %4155 = vtanh.f32 %v1315_v22  ;;  %v1323_v28 = vadd.f32 1.0, %v4152_v7 }
 0x5d4   :  { %4157 = vrcp.f32 %v1312_v57 }
 0x5d5   :  { %4159 = vrcp.f32 %v1323_v28 }
 0x5dc   :  { %v4154_v26 = vpop.eup %4153 }
 0x5dd   :  { %v4156_v16 = vpop.eup %4155 }
 0x5de   :  { %v4158_v17 = vpop.eup %4157  ;;  %v1327_v19 = vmul.f32 %v4156_v16, %v4154_v26 }
 0x5df   :  { %v1326_v13 = vmul.f32 %v4158_v17, %v5171_v20  ;;  %v4160_v9 = vpop.eup %4159  ;;  %v5262_v20 = vld [vmem:[#allocation10 + $0x4c] ss:$16 sps:$4 sm:$0xff]  }
 0x5e1   :  { %v5250_v31 = vadd.f32 %v1327_v19, %v1326_v13 }
 0x5e3   :  { %4161 = vtanh.f32 %v5250_v31 }
 0x5ed   :  { %v4162_v11 = vpop.eup %4161 }
 0x5ee   :  { %v1330_v8 = vmul.f32 %v4162_v11, %v4160_v9 }
 0x5f0   :  { %v1331_v61 = vpack.c.bf16 %v1330_v8, %v1330_v8 }
 0x5f2   :  { %1333 = vst [vmem:[#allocation2 + $0x4] sm:$0x1] %v1331_v61  ;;  %1369 = vmatmul.mubr.bf16.vlgmr.msra.gmra.mrb[20].mxu0 %v1331_v61  ;;  %1410 = vmatmul.mubr.bf16.vlgmr.msra.gmra.mrb[28].mxu1 %v1331_v61 }
 0x5f3   :  { %1478 = vmatpush1.bf16.msra.mxu0 %v5174_v6  ;;  %1519 = vmatpush1.bf16.msra.mxu1 %v5177_v14 }
 0x5f4   :  { %1479 = vmatprep.subr.bf16.mxu0 %v5180_v12  ;;  %1520 = vmatprep.subr.bf16.mxu1 %v5183_v24 }
 0x5f5   :  { %1509 = vmatprep.mubr.bf16.mxu0 %v4649_v0  ;;  %1550 = vmatprep.mubr.bf16.mxu1 %v4649_v0 }
 0x5f7   :  { %1480 = vmatpush1.bf16.msra.mxu0 %v5188_v5  ;;  %1521 = vmatpush1.bf16.msra.mxu1 %v5191_v29 }
 0x5f8   :  { %1481 = vmatprep.subr.bf16.mxu0 %v5194_v30  ;;  %1522 = vmatprep.subr.bf16.mxu1 %v5262_v20 }
 0x5fb   :  { %1482 = vmatpush1.bf16.msra.mxu0 %v5198_v33  ;;  %1523 = vmatpush1.bf16.msra.mxu1 %v5266_v62 }
 0x5fc   :  { %1483 = vmatprep.subr.bf16.mxu0 %v5202_v38  ;;  %1524 = vmatprep.subr.bf16.mxu1 %v5270_v41 }
 0x5ff   :  { %1484 = vmatpush1.bf16.msra.mxu0 %v5206_v39  ;;  %1525 = vmatpush1.bf16.msra.mxu1 %v5274_v63 }
 0x600   :  { %1485 = vmatprep.subr.bf16.mxu0 %v5210_v40  ;;  %1526 = vmatprep.subr.bf16.mxu1 %v5278_v42 }
 0x603   :  { %1486 = vmatpush1.bf16.msra.mxu0 %v5214_v47  ;;  %1527 = vmatpush1.bf16.msra.mxu1 %v5282_v43 }
 0x604   :  { %1487 = vmatprep.subr.bf16.mxu0 %v5218_v49  ;;  %1528 = vmatprep.subr.bf16.mxu1 %v5286_v44 }
 0x607   :  { %1488 = vmatpush1.bf16.msra.mxu0 %v5222_v51  ;;  %1529 = vmatpush1.bf16.msra.mxu1 %v5290_v45 }
 0x608   :  { %1489 = vmatprep.subr.bf16.mxu0 %v5226_v54  ;;  %1530 = vmatprep.subr.bf16.mxu1 %v5294_v46 }
 0x60b   :  { %1490 = vmatpush1.bf16.msra.mxu0 %v5230_v55  ;;  %1531 = vmatpush1.bf16.msra.mxu1 %v5298_v1 }
 0x60c   :  { %1491 = vmatprep.subr.bf16.mxu0 %v5234_v58  ;;  %1532 = vmatprep.subr.bf16.mxu1 %v5302_v56 }
 0x60f   :  { %1492 = vmatpush1.bf16.msra.mxu0 %v5305_v2  ;;  %1533 = vmatpush1.bf16.msra.mxu1 %v5308_v48 }
 0x610   :  { %1618 = vmatprep.subr.bf16.mxu0 %v5161_v25  ;;  %1659 = vmatprep.subr.bf16.mxu1 %v5241_v59  ;;  %v5908_v25 = vcombine.high %v5016_v27, %v5022_v34 }
 0x6c5   :  { %v1370_v50 = vpop.f32.mrb[20].mxu0  ;;  %v1411_v52 = vpop.f32.mrb[28].mxu1 }
 0x6c6   :  { %v1372_v37 = vpop.f32.mrb[21].mxu0  ;;  %v1413_v53 = vpop.f32.mrb[29].mxu1 }
 0x6c7   :  { %v1422_v23 = vcombine.low %v1370_v50, %v1372_v37  ;;  %v1423_v15 = vcombine.low %v1411_v52, %v1413_v53  ;;  %v1374_v3 = vpop.f32.mrb[22].mxu0  ;;  %v1415_v18 = vpop.f32.mrb[30].mxu1 }
 0x6c8   :  { %v1375_v22 = vpop.f32.mrb[23].mxu0  ;;  %v1416_v60 = vpop.f32.mrb[31].mxu1 }
 0x6c9   :  { %v1430_v21 = vrot.slane %v1422_v23, %v4993_v35  ;;  %v1437_v57 = vrot.slane %v1423_v15, %v4993_v35 }
 0x6cb   :  { %v1438_v7 = vcombine.low %v1430_v21, %v1437_v57 }
 0x6cd   :  { %v1440_v26 = vadd.f32 %v1438_v7, %v5908_v25 }
 0x6cf   :  { %v3766_v59 = vmul.f32 -1.442695, %v1440_v26  ;;  %v1448_v16 = vrot.slane %v1440_v26, 2  ;;  %v1459_v28 = vrot.slane %v1440_v26, 6  ;;  %v1456_v9 = vrot.slane %v1440_v26, 4 }
 0x6d1   :  { %4163 = vpow2.f32 %v3766_v59  ;;  %v3767_v17 = vmul.f32 -1.442695, %v1448_v16  ;;  %v3768_v13 = vmul.f32 -1.442695, %v1459_v28  ;;  %v3981_v16 = vld [vmem:[#allocation12 + $0x4] ss:$16 sps:$4 sm:$0xff]  }
 0x6d2   :  { %v3979_v28 = vld [vmem:[#allocation12] ss:$16 sps:$4 sm:$0xff]  }
 0x6d3   :  { %4165 = vpow2.f32 %v3767_v17  ;;  %v3984_v17 = vld [vmem:[#allocation12 + $0xc] ss:$16 sps:$4 sm:$0xff]  }
 0x6d4   :  { %4167 = vpow2.f32 %v3768_v13  ;;  %v3982_v13 = vld [vmem:[#allocation12 + $0x8] ss:$16 sps:$4 sm:$0xff]  }
 0x6db   :  { %v4164_v19 = vpop.eup %4163 }
 0x6dc   :  { %v1444_v11 = vadd.f32 1.0, %v4164_v19  ;;  %v3987_v19 = vld [vmem:[#allocation12 + $0x24] ss:$16 sps:$4 sm:$0xff]  }
 0x6dd   :  { %v4166_v8 = vpop.eup %4165 }
 0x6de   :  { %4169 = vrcp.f32 %v1444_v11  ;;  %v1453_v61 = vadd.f32 1.0, %v4166_v8  ;;  %v4168_v50 = vpop.eup %4167  ;;  %v3985_v11 = vld [vmem:[#allocation12 + $0x20] ss:$16 sps:$4 sm:$0xff]   ;;  %v3988_v8 = vld [vmem:[#allocation12 + $0x28] ss:$16 sps:$4 sm:$0xff]  }
 0x6df   :  { %4171 = vtanh.f32 %v1456_v9  ;;  %v1464_v37 = vadd.f32 1.0, %v4168_v50  ;;  %v3990_v9 = vld [vmem:[#allocation12 + $0x2c] ss:$16 sps:$4 sm:$0xff]  }
 0x6e0   :  { %4173 = vrcp.f32 %v1453_v61  ;;  %v3993_v61 = vld [vmem:[#allocation12 + $0x44] ss:$16 sps:$4 sm:$0xff]   ;;  %v3996_v50 = vld [vmem:[#allocation12 + $0x4c] ss:$16 sps:$4 sm:$0xff]  }
 0x6e1   :  { %4175 = vrcp.f32 %v1464_v37  ;;  %v4002_v37 = vld [vmem:[#allocation12 + $0x6c] ss:$16 sps:$4 sm:$0xff]  }
 0x6e8   :  { %v4170_v52 = vpop.eup %4169 }
 0x6e9   :  { %v4172_v27 = vpop.eup %4171 }
 0x6ea   :  { %v4174_v34 = vpop.eup %4173  ;;  %v1468_v23 = vmul.f32 %v4172_v27, %v4170_v52  ;;  %v3991_v52 = vld [vmem:[#allocation12 + $0x40] ss:$16 sps:$4 sm:$0xff]   ;;  %v3994_v27 = vld [vmem:[#allocation12 + $0x48] ss:$16 sps:$4 sm:$0xff]  }
 0x6eb   :  { %v1467_v53 = vmul.f32 %v4174_v34, %v5250_v31  ;;  %v4176_v3 = vpop.eup %4175  ;;  %v3999_v34 = vld [vmem:[#allocation12 + $0x64] ss:$16 sps:$4 sm:$0xff]  }
 0x6ed   :  { %v5319_v15 = vadd.f32 %v1468_v23, %v1467_v53  ;;  %v3997_v53 = vld [vmem:[#allocation12 + $0x60] ss:$16 sps:$4 sm:$0xff]   ;;  %v4000_v23 = vld [vmem:[#allocation12 + $0x68] ss:$16 sps:$4 sm:$0xff]  }
 0x6ef   :  { %4177 = vtanh.f32 %v5319_v15 }
 0x6f9   :  { %v4178_v18 = vpop.eup %4177 }
 0x6fa   :  { %v1471_v22 = vmul.f32 %v4178_v18, %v4176_v3  ;;  %v4005_v3 = vld [vmem:[#allocation12 + $0x84] ss:$16 sps:$4 sm:$0xff]   ;;  %v4006_v18 = vld [vmem:[#allocation12 + $0x88] ss:$16 sps:$4 sm:$0xff]  }
 0x6fc   :  { %v1472_v60 = vpack.c.bf16 %v1471_v22, %v1471_v22  ;;  %v4008_v22 = vld [vmem:[#allocation12 + $0x8c] ss:$16 sps:$4 sm:$0xff]  }
 0x6fe   :  { %1474 = vst [vmem:[#allocation2 + $0x5] sm:$0x1] %v1472_v60  ;;  %1510 = vmatmul.mubr.bf16.vlgmr.msra.gmra.mrb[24].mxu0 %v1472_v60  ;;  %1551 = vmatmul.mubr.bf16.vlgmr.msra.gmra.mrb[32].mxu1 %v1472_v60  ;;  %v4011_v60 = vld [vmem:[#allocation12 + $0xa4] ss:$16 sps:$4 sm:$0xff]  }
 0x6ff   :  { %1619 = vmatpush1.bf16.msra.mxu0 %v5174_v6  ;;  %1660 = vmatpush1.bf16.msra.mxu1 %v5177_v14 }
 0x700   :  { %1620 = vmatprep.subr.bf16.mxu0 %v5180_v12  ;;  %1661 = vmatprep.subr.bf16.mxu1 %v5183_v24 }
 0x701   :  { %1650 = vmatprep.mubr.bf16.mxu0 %v4649_v0  ;;  %1691 = vmatprep.mubr.bf16.mxu1 %v4649_v0 }
 0x703   :  { %1621 = vmatpush1.bf16.msra.mxu0 %v5188_v5  ;;  %1662 = vmatpush1.bf16.msra.mxu1 %v5191_v29 }
 0x704   :  { %1622 = vmatprep.subr.bf16.mxu0 %v5194_v30  ;;  %1663 = vmatprep.subr.bf16.mxu1 %v5262_v20 }
 0x707   :  { %1623 = vmatpush1.bf16.msra.mxu0 %v5198_v33  ;;  %1664 = vmatpush1.bf16.msra.mxu1 %v5266_v62 }
 0x708   :  { %1624 = vmatprep.subr.bf16.mxu0 %v5202_v38  ;;  %1665 = vmatprep.subr.bf16.mxu1 %v5270_v41 }
 0x70b   :  { %1625 = vmatpush1.bf16.msra.mxu0 %v5206_v39  ;;  %1666 = vmatpush1.bf16.msra.mxu1 %v5274_v63 }
 0x70c   :  { %1626 = vmatprep.subr.bf16.mxu0 %v5210_v40  ;;  %1667 = vmatprep.subr.bf16.mxu1 %v5278_v42 }
 0x70f   :  { %1627 = vmatpush1.bf16.msra.mxu0 %v5214_v47  ;;  %1668 = vmatpush1.bf16.msra.mxu1 %v5282_v43 }
 0x710   :  { %1628 = vmatprep.subr.bf16.mxu0 %v5218_v49  ;;  %1669 = vmatprep.subr.bf16.mxu1 %v5286_v44 }
 0x713   :  { %1629 = vmatpush1.bf16.msra.mxu0 %v5222_v51  ;;  %1670 = vmatpush1.bf16.msra.mxu1 %v5290_v45  ;;  %v5909_v51 = vcombine.low %v5019_v32, %v5025_v36 }
 0x714   :  { %1630 = vmatprep.subr.bf16.mxu0 %v5226_v54  ;;  %1671 = vmatprep.subr.bf16.mxu1 %v5294_v46 }
 0x717   :  { %1631 = vmatpush1.bf16.msra.mxu0 %v5230_v55  ;;  %1672 = vmatpush1.bf16.msra.mxu1 %v5298_v1 }
 0x718   :  { %1632 = vmatprep.subr.bf16.mxu0 %v5234_v58  ;;  %1673 = vmatprep.subr.bf16.mxu1 %v5302_v56 }
 0x71b   :  { %1633 = vmatpush1.bf16.msra.mxu0 %v5305_v2  ;;  %1674 = vmatpush1.bf16.msra.mxu1 %v5308_v48 }
 0x71c   :  { %2071 = vmatprep.subr.bf16.mxu0 %v3981_v16  ;;  %2114 = vmatprep.subr.bf16.mxu1 %v3984_v17 }
 0x7d1   :  { %v1511_v6 = vpop.f32.mrb[24].mxu0  ;;  %v1552_v14 = vpop.f32.mrb[32].mxu1 }
 0x7d2   :  { %v1513_v12 = vpop.f32.mrb[25].mxu0  ;;  %v1554_v24 = vpop.f32.mrb[33].mxu1 }
 0x7d3   :  { %v1563_v5 = vcombine.low %v1511_v6, %v1513_v12  ;;  %v1564_v29 = vcombine.low %v1552_v14, %v1554_v24  ;;  %v1515_v30 = vpop.f32.mrb[26].mxu0  ;;  %v1556_v33 = vpop.f32.mrb[34].mxu1  ;;  %v4014_v6 = vld [vmem:[#allocation12 + $0xac] ss:$16 sps:$4 sm:$0xff]   ;;  %v4009_v14 = vld [vmem:[#allocation12 + $0xa0] ss:$16 sps:$4 sm:$0xff]  }
 0x7d4   :  { %v1516_v38 = vpop.f32.mrb[27].mxu0  ;;  %v1557_v39 = vpop.f32.mrb[35].mxu1  ;;  %v4012_v12 = vld [vmem:[#allocation12 + $0xa8] ss:$16 sps:$4 sm:$0xff]   ;;  %v4017_v24 = vld [vmem:[#allocation12 + $0xc4] ss:$16 sps:$4 sm:$0xff]  }
 0x7d5   :  { %v1571_v40 = vrot.slane %v1563_v5, %v4993_v35  ;;  %v1578_v47 = vrot.slane %v1564_v29, %v4993_v35  ;;  %v4020_v5 = vld [vmem:[#allocation12 + $0xcc] ss:$16 sps:$4 sm:$0xff]   ;;  %v4015_v29 = vld [vmem:[#allocation12 + $0xc0] ss:$16 sps:$4 sm:$0xff]   ;;  %v4018_v30 = vld [vmem:[#allocation12 + $0xc8] ss:$16 sps:$4 sm:$0xff]  }
 0x7d6   :  { %v4023_v33 = vld [vmem:[#allocation12 + $0xe4] ss:$16 sps:$4 sm:$0xff]   ;;  %v4026_v38 = vld [vmem:[#allocation12 + $0xec] ss:$16 sps:$4 sm:$0xff]   ;;  %v4021_v39 = vld [vmem:[#allocation12 + $0xe0] ss:$16 sps:$4 sm:$0xff]  }
 0x7d7   :  { %v1579_v49 = vcombine.low %v1571_v40, %v1578_v47  ;;  %v4024_v40 = vld [vmem:[#allocation12 + $0xe8] ss:$16 sps:$4 sm:$0xff]   ;;  %v5365_v47 = vld [vmem:[#allocation13 + $0x4] ss:$16 sps:$4 sm:$0xff]  }
 0x7d9   :  { %v1581_v54 = vadd.f32 %v1579_v49, %v5909_v51  ;;  %v5367_v49 = vld [vmem:[#allocation13 + $0xc] ss:$16 sps:$4 sm:$0xff]  }
 0x7db   :  { %v3769_v55 = vmul.f32 -1.442695, %v1581_v54  ;;  %v1589_v58 = vrot.slane %v1581_v54, 2  ;;  %v1600_v20 = vrot.slane %v1581_v54, 6  ;;  %v1597_v63 = vrot.slane %v1581_v54, 4 }
 0x7dd   :  { %4179 = vpow2.f32 %v3769_v55  ;;  %v3770_v31 = vmul.f32 -1.442695, %v1589_v58  ;;  %v3771_v62 = vmul.f32 -1.442695, %v1600_v20 }
 0x7df   :  { %4181 = vpow2.f32 %v3770_v31 }
 0x7e0   :  { %4183 = vpow2.f32 %v3771_v62 }
 0x7e7   :  { %v4180_v41 = vpop.eup %4179 }
 0x7e8   :  { %v1585_v42 = vadd.f32 1.0, %v4180_v41 }
 0x7e9   :  { %v4182_v43 = vpop.eup %4181 }
 0x7ea   :  { %4185 = vrcp.f32 %v1585_v42  ;;  %v1594_v44 = vadd.f32 1.0, %v4182_v43  ;;  %v4184_v45 = vpop.eup %4183 }
 0x7eb   :  { %4187 = vtanh.f32 %v1597_v63  ;;  %v1605_v2 = vadd.f32 1.0, %v4184_v45 }
 0x7ec   :  { %4189 = vrcp.f32 %v1594_v44 }
 0x7ed   :  { %4191 = vrcp.f32 %v1605_v2 }
 0x7f4   :  { %v4186_v46 = vpop.eup %4185 }
 0x7f5   :  { %v4188_v1 = vpop.eup %4187 }
 0x7f6   :  { %v4190_v56 = vpop.eup %4189  ;;  %v1609_v21 = vmul.f32 %v4188_v1, %v4186_v46  ;;  %v5910_v46 = vcombine.high %v5019_v32, %v5025_v36 }
 0x7f7   :  { %v1608_v48 = vmul.f32 %v4190_v56, %v5319_v15  ;;  %v4192_v7 = vpop.eup %4191  ;;  %v4003_v15 = vld [vmem:[#allocation12 + $0x80] ss:$16 sps:$4 sm:$0xff]  }
 0x7f9   :  { %v5360_v57 = vadd.f32 %v1609_v21, %v1608_v48 }
 0x7fb   :  { %4193 = vtanh.f32 %v5360_v57 }
 0x805   :  { %v4194_v25 = vpop.eup %4193 }
 0x806   :  { %v1612_v26 = vmul.f32 %v4194_v25, %v4192_v7 }
 0x808   :  { %v1613_v59 = vpack.c.bf16 %v1612_v26, %v1612_v26 }
 0x80a   :  { %1615 = vst [vmem:[#allocation2 + $0x6] sm:$0x1] %v1613_v59  ;;  %1651 = vmatmul.mubr.bf16.vlgmr.msra.gmra.mrb[28].mxu0 %v1613_v59  ;;  %1692 = vmatmul.mubr.bf16.vlgmr.msra.gmra.mrb[36].mxu1 %v1613_v59 }
 0x80b   :  { %2103 = vmatprep.mubr.bf16.mxu0 %v4649_v0  ;;  %2146 = vmatprep.mubr.bf16.mxu1 %v4649_v0 }
 0x80c   :  { %2072 = vmatpush1.bf16.msra.mxu0 %v3979_v28  ;;  %2115 = vmatpush1.bf16.msra.mxu1 %v3982_v13 }
 0x80d   :  { %2073 = vmatprep.subr.bf16.mxu0 %v3987_v19  ;;  %2116 = vmatprep.subr.bf16.mxu1 %v3990_v9 }
 0x810   :  { %2074 = vmatpush1.bf16.msra.mxu0 %v3985_v11  ;;  %2117 = vmatpush1.bf16.msra.mxu1 %v3988_v8 }
 0x811   :  { %2075 = vmatprep.subr.bf16.mxu0 %v3993_v61  ;;  %2118 = vmatprep.subr.bf16.mxu1 %v3996_v50 }
 0x814   :  { %2076 = vmatpush1.bf16.msra.mxu0 %v3991_v52  ;;  %2119 = vmatpush1.bf16.msra.mxu1 %v3994_v27 }
 0x815   :  { %2077 = vmatprep.subr.bf16.mxu0 %v3999_v34  ;;  %2120 = vmatprep.subr.bf16.mxu1 %v4002_v37  ;;  %v1827_v34 = vld [vmem:[#allocation2 + $0x3] sm:$0x1]  ;;  %v1825_v37 = vld [vmem:[#allocation2 + $0x1] sm:$0x1] }
 0x818   :  { %2078 = vmatpush1.bf16.msra.mxu0 %v3997_v53  ;;  %2121 = vmatpush1.bf16.msra.mxu1 %v4000_v23  ;;  %v1826_v53 = vld [vmem:[#allocation2 + $0x2] sm:$0x1] }
 0x819   :  { %2079 = vmatprep.subr.bf16.mxu0 %v4005_v3  ;;  %2122 = vmatprep.subr.bf16.mxu1 %v4008_v22  ;;  %v1862_v23 = vcombine.low %v1826_v53, %v1827_v34  ;;  %v5913_v34 = vsub.s32 1, %v4830_v4  ;;  %v5914_v53 = vsub.s32 3, %v4830_v4 }
 0x81c   :  { %2080 = vmatpush1.bf16.msra.mxu0 %v4003_v15  ;;  %2123 = vmatpush1.bf16.msra.mxu1 %v4006_v18  ;;  %v1829_v15 = vld [vmem:[#allocation2 + $0x5] sm:$0x1]  ;;  %v1828_v18 = vld [vmem:[#allocation2 + $0x4] sm:$0x1] }
 0x81d   :  { %2081 = vmatprep.subr.bf16.mxu0 %v4011_v60  ;;  %2124 = vmatprep.subr.bf16.mxu1 %v4014_v6  ;;  %v1863_v22 = vcombine.low %v1828_v18, %v1829_v15  ;;  %v1878_v60 = vrot.slane %v1862_v23, %v4833_v10  ;;  %v1830_v6 = vld [vmem:[#allocation2 + $0x6] sm:$0x1] }
 0x820   :  { %2082 = vmatpush1.bf16.msra.mxu0 %v4009_v14  ;;  %2125 = vmatpush1.bf16.msra.mxu1 %v4012_v12 }
 0x821   :  { %2083 = vmatprep.subr.bf16.mxu0 %v4017_v24  ;;  %2126 = vmatprep.subr.bf16.mxu1 %v4020_v5  ;;  %v1885_v5 = vrot.slane %v1863_v22, %v4833_v10 }
 0x824   :  { %2084 = vmatpush1.bf16.msra.mxu0 %v4015_v29  ;;  %2127 = vmatpush1.bf16.msra.mxu1 %v4018_v30 }
 0x825   :  { %2085 = vmatprep.subr.bf16.mxu0 %v4023_v33  ;;  %2128 = vmatprep.subr.bf16.mxu1 %v4026_v38 }
 0x828   :  { %2086 = vmatpush1.bf16.msra.mxu0 %v4021_v39  ;;  %2129 = vmatpush1.bf16.msra.mxu1 %v4024_v40  ;;  %v5388_v40 = vld [vmem:[#allocation13] ss:$16 sps:$4 sm:$0xff]  }
 0x829   :  { %2419 = vmatprep.subr.bf16.mxu0 %v5365_v47  ;;  %2460 = vmatprep.subr.bf16.mxu1 %v5367_v49 }
 0x8dd   :  { %v1652_v51 = vpop.f32.mrb[28].mxu0  ;;  %v1693_v54 = vpop.f32.mrb[36].mxu1 }
 0x8de   :  { %v1654_v55 = vpop.f32.mrb[29].mxu0  ;;  %v1695_v58 = vpop.f32.mrb[37].mxu1 }
 0x8df   :  { %v1704_v31 = vcombine.low %v1652_v51, %v1654_v55  ;;  %v1705_v20 = vcombine.low %v1693_v54, %v1695_v58  ;;  %v1656_v62 = vpop.f32.mrb[30].mxu0  ;;  %v1697_v41 = vpop.f32.mrb[38].mxu1  ;;  %v5390_v51 = vld [vmem:[#allocation13 + $0x8] ss:$16 sps:$4 sm:$0xff]   ;;  %v5392_v55 = vld [vmem:[#allocation13 + $0x24] ss:$16 sps:$4 sm:$0xff]  }
 0x8e0   :  { %v1657_v63 = vpop.f32.mrb[31].mxu0  ;;  %v1698_v42 = vpop.f32.mrb[39].mxu1  ;;  %v5394_v58 = vld [vmem:[#allocation13 + $0x2c] ss:$16 sps:$4 sm:$0xff]   ;;  %v5412_v41 = vld [vmem:[#allocation13 + $0x40] ss:$16 sps:$4 sm:$0xff]  }
 0x8e1   :  { %v1712_v43 = vrot.slane %v1704_v31, %v4993_v35  ;;  %v1719_v44 = vrot.slane %v1705_v20, %v4993_v35  ;;  %v5398_v31 = vld [vmem:[#allocation13 + $0x20] ss:$16 sps:$4 sm:$0xff]   ;;  %v5400_v20 = vld [vmem:[#allocation13 + $0x28] ss:$16 sps:$4 sm:$0xff]   ;;  %v5406_v62 = vld [vmem:[#allocation13 + $0x4c] ss:$16 sps:$4 sm:$0xff]  }
 0x8e2   :  { %v5414_v63 = vld [vmem:[#allocation13 + $0x48] ss:$16 sps:$4 sm:$0xff]   ;;  %v5418_v42 = vld [vmem:[#allocation13 + $0x64] ss:$16 sps:$4 sm:$0xff]  }
 0x8e3   :  { %v1720_v45 = vcombine.low %v1712_v43, %v1719_v44  ;;  %v5420_v43 = vld [vmem:[#allocation13 + $0x6c] ss:$16 sps:$4 sm:$0xff]   ;;  %v5424_v44 = vld [vmem:[#allocation13 + $0x60] ss:$16 sps:$4 sm:$0xff]  }
 0x8e5   :  { %v1722_v1 = vadd.f32 %v1720_v45, %v5910_v46  ;;  %v5426_v45 = vld [vmem:[#allocation13 + $0x68] ss:$16 sps:$4 sm:$0xff]   ;;  %v5430_v46 = vld [vmem:[#allocation13 + $0x84] ss:$16 sps:$4 sm:$0xff]  }
 0x8e7   :  { %v3772_v56 = vmul.f32 -1.442695, %v1722_v1  ;;  %v1730_v2 = vrot.slane %v1722_v1, 2  ;;  %v1741_v21 = vrot.slane %v1722_v1, 6  ;;  %v1738_v26 = vrot.slane %v1722_v1, 4 }
 0x8e8   :  { %v5432_v1 = vld [vmem:[#allocation13 + $0x8c] ss:$16 sps:$4 sm:$0xff]  }
 0x8e9   :  { %4195 = vpow2.f32 %v3772_v56  ;;  %v3773_v48 = vmul.f32 -1.442695, %v1730_v2  ;;  %v3774_v7 = vmul.f32 -1.442695, %v1741_v21  ;;  %v5436_v56 = vld [vmem:[#allocation13 + $0x80] ss:$16 sps:$4 sm:$0xff]  }
 0x8ea   :  { %v5438_v2 = vld [vmem:[#allocation13 + $0x88] ss:$16 sps:$4 sm:$0xff]   ;;  %v5444_v21 = vld [vmem:[#allocation13 + $0xac] ss:$16 sps:$4 sm:$0xff]  }
 0x8eb   :  { %4197 = vpow2.f32 %v3773_v48  ;;  %v5442_v48 = vld [vmem:[#allocation13 + $0xa4] ss:$16 sps:$4 sm:$0xff]  }
 0x8ec   :  { %4199 = vpow2.f32 %v3774_v7  ;;  %v5448_v7 = vld [vmem:[#allocation13 + $0xa0] ss:$16 sps:$4 sm:$0xff]  }
 0x8f3   :  { %v4196_v25 = vpop.eup %4195 }
 0x8f4   :  { %v1726_v59 = vadd.f32 1.0, %v4196_v25  ;;  %v5450_v25 = vld [vmem:[#allocation13 + $0xa8] ss:$16 sps:$4 sm:$0xff]  }
 0x8f5   :  { %v4198_v16 = vpop.eup %4197 }
 0x8f6   :  { %4201 = vrcp.f32 %v1726_v59  ;;  %v1735_v17 = vadd.f32 1.0, %v4198_v16  ;;  %v4200_v28 = vpop.eup %4199  ;;  %v5456_v59 = vld [vmem:[#allocation13 + $0xcc] ss:$16 sps:$4 sm:$0xff]   ;;  %v5460_v16 = vld [vmem:[#allocation13 + $0xc0] ss:$16 sps:$4 sm:$0xff]  }
 0x8f7   :  { %4203 = vtanh.f32 %v1738_v26  ;;  %v1746_v19 = vadd.f32 1.0, %v4200_v28  ;;  %v5454_v26 = vld [vmem:[#allocation13 + $0xc4] ss:$16 sps:$4 sm:$0xff]  }
 0x8f8   :  { %4205 = vrcp.f32 %v1735_v17  ;;  %v5462_v17 = vld [vmem:[#allocation13 + $0xc8] ss:$16 sps:$4 sm:$0xff]   ;;  %v5466_v28 = vld [vmem:[#allocation13 + $0xe4] ss:$16 sps:$4 sm:$0xff]  }
 0x8f9   :  { %4207 = vrcp.f32 %v1746_v19  ;;  %v2254_v19 = vld [vmem:[#allocation7 + $0x2] sm:$0x3] }
 0x900   :  { %v4202_v13 = vpop.eup %4201 }
 0x901   :  { %v4204_v32 = vpop.eup %4203 }
 0x902   :  { %v4206_v36 = vpop.eup %4205  ;;  %v1750_v11 = vmul.f32 %v4204_v32, %v4202_v13  ;;  %v5468_v13 = vld [vmem:[#allocation13 + $0xec] ss:$16 sps:$4 sm:$0xff]   ;;  %v5472_v32 = vld [vmem:[#allocation13 + $0xe0] ss:$16 sps:$4 sm:$0xff]  }
 0x903   :  { %v1749_v9 = vmul.f32 %v4206_v36, %v5360_v57  ;;  %v4208_v61 = vpop.eup %4207  ;;  %v1824_v57 = vld [vmem:[#allocation2] sm:$0x1]  ;;  %v5474_v36 = vld [vmem:[#allocation13 + $0xe8] ss:$16 sps:$4 sm:$0xff]  }
 0x904   :  { %v1861_v3 = vcombine.low %v1824_v57, %v1825_v37 }
 0x905   :  { %v1751_v8 = vadd.f32 %v1750_v11, %v1749_v9  ;;  %v2258_v9 = vpack.c.bf16 %v2254_v19, %v2254_v19  ;;  %v1823_v11 = vld [vmem:[%s5894_s8] sm:$0xf] }
 0x906   :  { %v1871_v24 = vrot.slane %v1861_v3, %v4833_v10  ;;  %v1840_v37 = vrot.slane %v1823_v11, %v5913_v34  ;;  %v1848_v23 = vrot.slane %v1823_v11, %v5914_v53 }
 0x907   :  { %4209 = vtanh.f32 %v1751_v8  ;;  %1758 = vst [vmem:[#allocation19] sm:$0x3] %v1751_v8  ;;  %v5911_v8 = vsub.s32 0, %v4830_v4 }
 0x908   :  { %v1893_v30 = vcombine.low %v1871_v24, %v1878_v60 }
 0x90a   :  { %v1901_v38 = vrot.slane %v1893_v30, %v4833_v10 }
 0x911   :  { %v4210_v50 = vpop.eup %4209 }
 0x912   :  { %v5377_v52 = vmul.f32 %v4210_v50, %v4208_v61  ;;  %v1836_v61 = vrot.slane %v1823_v11, %v5911_v8  ;;  %v5912_v50 = vsub.s32 2, %v4830_v4 }
 0x914   :  { %v1754_v27 = vpack.c.bf16 %v5377_v52, %v5377_v52  ;;  %1757 = vst [vmem:[#allocation17] sm:$0x3] %v5377_v52 }
 0x916   :  { %1756 = vst [vmem:[#allocation2 + $0x7] sm:$0x1] %v1754_v27  ;;  %v1844_v27 = vrot.slane %v1823_v11, %v5912_v50 }
 0x91d   :  { %v1831_v14 = vld [vmem:[#allocation2 + $0x7] sm:$0x1] }
 0x91e   :  { %v1864_v12 = vcombine.low %v1830_v6, %v1831_v14 }
 0x920   :  { %v1892_v29 = vrot.slane %v1864_v12, %v4833_v10 }
 0x922   :  { %v1894_v33 = vcombine.low %v1885_v5, %v1892_v29 }
 0x924   :  { %v1908_v39 = vrot.slane %v1894_v33, %v4833_v10  ;;  %v5404_v10 = vld [vmem:[#allocation13 + $0x44] ss:$16 sps:$4 sm:$0xff]  }
 0x926   :  { %v1909_v54 = vcombine.low %v1901_v38, %v1908_v39 }
 0x928   :  { %2104 = vmatmul.mubr.bf16.vlgmr.msra.gmra.mrb[32].mxu0 %v1909_v54  ;;  %2147 = vmatmul.mubr.bf16.vlgmr.msra.gmra.mrb[40].mxu1 %v1909_v54 }
 0x929   :  { %2420 = vmatpush1.bf16.msra.mxu0 %v5388_v40  ;;  %2461 = vmatpush1.bf16.msra.mxu1 %v5390_v51 }
 0x92a   :  { %2421 = vmatprep.subr.bf16.mxu0 %v5392_v55  ;;  %2462 = vmatprep.subr.bf16.mxu1 %v5394_v58 }
 0x92b   :  { %2451 = vmatprep.mubr.bf16.mxu0 %v4649_v0  ;;  %2492 = vmatprep.mubr.bf16.mxu1 %v4649_v0 }
 0x92d   :  { %2422 = vmatpush1.bf16.msra.mxu0 %v5398_v31  ;;  %2463 = vmatpush1.bf16.msra.mxu1 %v5400_v20 }
 0x92e   :  { %2423 = vmatprep.subr.bf16.mxu0 %v5404_v10  ;;  %2464 = vmatprep.subr.bf16.mxu1 %v5406_v62 }
 0x931   :  { %2424 = vmatpush1.bf16.msra.mxu0 %v5412_v41  ;;  %2465 = vmatpush1.bf16.msra.mxu1 %v5414_v63 }
 0x932   :  { %2425 = vmatprep.subr.bf16.mxu0 %v5418_v42  ;;  %2466 = vmatprep.subr.bf16.mxu1 %v5420_v43 }
 0x935   :  { %2426 = vmatpush1.bf16.msra.mxu0 %v5424_v44  ;;  %2467 = vmatpush1.bf16.msra.mxu1 %v5426_v45 }
 0x936   :  { %2427 = vmatprep.subr.bf16.mxu0 %v5430_v46  ;;  %2468 = vmatprep.subr.bf16.mxu1 %v5432_v1 }
 0x939   :  { %2428 = vmatpush1.bf16.msra.mxu0 %v5436_v56  ;;  %2469 = vmatpush1.bf16.msra.mxu1 %v5438_v2 }
 0x93a   :  { %2429 = vmatprep.subr.bf16.mxu0 %v5442_v48  ;;  %2470 = vmatprep.subr.bf16.mxu1 %v5444_v21 }
 0x93d   :  { %2430 = vmatpush1.bf16.msra.mxu0 %v5448_v7  ;;  %2471 = vmatpush1.bf16.msra.mxu1 %v5450_v25 }
 0x93e   :  { %2431 = vmatprep.subr.bf16.mxu0 %v5454_v26  ;;  %2472 = vmatprep.subr.bf16.mxu1 %v5456_v59 }
 0x941   :  { %2432 = vmatpush1.bf16.msra.mxu0 %v5460_v16  ;;  %2473 = vmatpush1.bf16.msra.mxu1 %v5462_v17 }
 0x942   :  { %2433 = vmatprep.subr.bf16.mxu0 %v5466_v28  ;;  %2474 = vmatprep.subr.bf16.mxu1 %v5468_v13 }
 0x945   :  { %2434 = vmatpush1.bf16.msra.mxu0 %v5472_v32  ;;  %2475 = vmatpush1.bf16.msra.mxu1 %v5474_v36 }
 0x946   :  { %2557 = vmatprep.subr.bf16.mxu0 %v5365_v47  ;;  %2598 = vmatprep.subr.bf16.mxu1 %v5367_v49 }
 0x948   :  { %2452 = vmatmul.mubr.bf16.vlgmr.msra.gmra.mrb[36].mxu0 %v2258_v9  ;;  %2493 = vmatmul.mubr.bf16.vlgmr.msra.gmra.mrb[44].mxu1 %v2258_v9 }
 0x949   :  { %2558 = vmatpush1.bf16.msra.mxu0 %v5388_v40  ;;  %2599 = vmatpush1.bf16.msra.mxu1 %v5390_v51 }
 0x94a   :  { %2559 = vmatprep.subr.bf16.mxu0 %v5392_v55  ;;  %2600 = vmatprep.subr.bf16.mxu1 %v5394_v58 }
 0x94b   :  { %2589 = vmatprep.mubr.bf16.mxu0 %v4649_v0  ;;  %2630 = vmatprep.mubr.bf16.mxu1 %v4649_v0 }
 0x94d   :  { %2560 = vmatpush1.bf16.msra.mxu0 %v5398_v31  ;;  %2601 = vmatpush1.bf16.msra.mxu1 %v5400_v20 }
 0x94e   :  { %2561 = vmatprep.subr.bf16.mxu0 %v5404_v10  ;;  %2602 = vmatprep.subr.bf16.mxu1 %v5406_v62 }
 0x951   :  { %2562 = vmatpush1.bf16.msra.mxu0 %v5412_v41  ;;  %2603 = vmatpush1.bf16.msra.mxu1 %v5414_v63 }
 0x952   :  { %2563 = vmatprep.subr.bf16.mxu0 %v5418_v42  ;;  %2604 = vmatprep.subr.bf16.mxu1 %v5420_v43 }
 0x955   :  { %2564 = vmatpush1.bf16.msra.mxu0 %v5424_v44  ;;  %2605 = vmatpush1.bf16.msra.mxu1 %v5426_v45 }
 0x956   :  { %2565 = vmatprep.subr.bf16.mxu0 %v5430_v46  ;;  %2606 = vmatprep.subr.bf16.mxu1 %v5432_v1 }
 0x959   :  { %2566 = vmatpush1.bf16.msra.mxu0 %v5436_v56  ;;  %2607 = vmatpush1.bf16.msra.mxu1 %v5438_v2 }
 0x95a   :  { %2567 = vmatprep.subr.bf16.mxu0 %v5442_v48  ;;  %2608 = vmatprep.subr.bf16.mxu1 %v5444_v21 }
 0x95d   :  { %2568 = vmatpush1.bf16.msra.mxu0 %v5448_v7  ;;  %2609 = vmatpush1.bf16.msra.mxu1 %v5450_v25 }
 0x95e   :  { %2569 = vmatprep.subr.bf16.mxu0 %v5454_v26  ;;  %2610 = vmatprep.subr.bf16.mxu1 %v5456_v59 }
 0x961   :  { %2570 = vmatpush1.bf16.msra.mxu0 %v5460_v16  ;;  %2611 = vmatpush1.bf16.msra.mxu1 %v5462_v17 }
 0x962   :  { %2571 = vmatprep.subr.bf16.mxu0 %v5466_v28  ;;  %2612 = vmatprep.subr.bf16.mxu1 %v5468_v13 }
 0x965   :  { %2572 = vmatpush1.bf16.msra.mxu0 %v5472_v32  ;;  %2613 = vmatpush1.bf16.msra.mxu1 %v5474_v36 }
 0x966   :  { %2695 = vmatprep.subr.bf16.mxu0 %v5365_v47  ;;  %2736 = vmatprep.subr.bf16.mxu1 %v5367_v49 }
 0x9fb   :  { %v2105_v57 = vpop.f32.mrb[32].mxu0  ;;  %v2148_v15 = vpop.f32.mrb[40].mxu1 }
 0x9fc   :  { %v2106_v3 = vadd.f32 %v2105_v57, %v1836_v61  ;;  %v2149_v18 = vadd.f32 %v2148_v15, %v1844_v27  ;;  %v2107_v22 = vpop.f32.mrb[33].mxu0  ;;  %v2150_v60 = vpop.f32.mrb[41].mxu1 }
 0x9fd   :  { %v2108_v6 = vadd.f32 %v2107_v22, %v1840_v37  ;;  %v2151_v14 = vadd.f32 %v2150_v60, %v1848_v23  ;;  %v2109_v12 = vpop.f32.mrb[34].mxu0  ;;  %v2152_v24 = vpop.f32.mrb[42].mxu1 }
 0x9fe   :  { %v2110_v5 = vadd.f32 %v2109_v12, %v1836_v61  ;;  %v2153_v29 = vadd.f32 %v2152_v24, %v1844_v27  ;;  %v2111_v30 = vpop.f32.mrb[35].mxu0  ;;  %v2154_v33 = vpop.f32.mrb[43].mxu1 }
 0x9ff   :  { %v2165_v38 = vcombine.low %v2106_v3, %v2108_v6  ;;  %v2166_v39 = vcombine.high %v2106_v3, %v2108_v6  ;;  %v2167_v54 = vcombine.low %v2149_v18, %v2151_v14  ;;  %v2168_v19 = vcombine.high %v2149_v18, %v2151_v14 }
 0xa00   :  { %v2112_v4 = vadd.f32 %v2111_v30, %v1840_v37  ;;  %v2155_v9 = vadd.f32 %v2154_v33, %v1848_v23 }
 0xa01   :  { %v5528_v11 = vrot.slane %v2165_v38, %v4993_v35  ;;  %v5531_v8 = vrot.slane %v2166_v39, %v4993_v35  ;;  %v5534_v50 = vrot.slane %v2167_v54, %v4993_v35  ;;  %v5537_v61 = vrot.slane %v2168_v19, %v4993_v35 }
 0xa02   :  { %v2201_v27 = vcombine.low %v2110_v5, %v2112_v4  ;;  %v2202_v34 = vcombine.high %v2110_v5, %v2112_v4  ;;  %v2203_v53 = vcombine.low %v2153_v29, %v2155_v9  ;;  %v2204_v57 = vcombine.high %v2153_v29, %v2155_v9 }
 0xa03   :  { %v2197_v37 = vcombine.low %v5528_v11, %v5534_v50 }
 0xa04   :  { %v5548_v18 = vrot.slane %v2201_v27, %v4993_v35  ;;  %v5551_v22 = vrot.slane %v2202_v34, %v4993_v35  ;;  %v5554_v60 = vrot.slane %v2203_v53, %v4993_v35  ;;  %v5557_v6 = vrot.slane %v2204_v57, %v4993_v35 }
 0xa1b   :  { %v2453_v29 = vpop.f32.mrb[36].mxu0  ;;  %v2494_v30 = vpop.f32.mrb[44].mxu1 }
 0xa1c   :  { %v2455_v33 = vpop.f32.mrb[37].mxu0  ;;  %v2496_v38 = vpop.f32.mrb[45].mxu1 }
 0xa1d   :  { %v2505_v39 = vcombine.low %v2453_v29, %v2455_v33  ;;  %v2506_v54 = vcombine.low %v2494_v30, %v2496_v38  ;;  %v2457_v19 = vpop.f32.mrb[38].mxu0  ;;  %v2498_v4 = vpop.f32.mrb[46].mxu1 }
 0xa1e   :  { %v2458_v9 = vpop.f32.mrb[39].mxu0  ;;  %v2499_v27 = vpop.f32.mrb[47].mxu1 }
 0xa1f   :  { %v2513_v34 = vrot.slane %v2505_v39, %v4993_v35  ;;  %v2520_v53 = vrot.slane %v2506_v54, %v4993_v35 }
 0xa21   :  { %v2521_v57 = vcombine.low %v2513_v34, %v2520_v53 }
 0xa23   :  { %v2523_v12 = vadd.f32 %v2521_v57, %v2197_v37  ;;  %v3807_v37 = vld [vmem:[%s5888_s2 + $0x2] sm:$0x3]  ;;  %s4654_s2 = smov [#allocation17]  }
 0xa24   :  { %s3679_s3 = sshll.u32 %s4654_s2, 4  ;;  %s3680_s3 = int_to_ptr.vmem [resolvable:$true] %s3679_s3 }
 0xa25   :  { %v3840_v24 = vmul.f32 -1.442695, %v2523_v12  ;;  %v2531_v14 = vrot.slane %v2523_v12, 2  ;;  %v2542_v3 = vrot.slane %v2523_v12, 6  ;;  %v2539_v29 = vrot.slane %v2523_v12, 4  ;;  %s4557_s4 = scalar_lea.vmem %s3680_s3, 64  ;;  %p4562_p1 = scmp.lt.s32.totalorder %s3680_s3, %s3680_s3 }
 0xa26   :  { %p4558_p0 = scmp.ne.s32.totalorder %s3680_s3, %s4557_s4  ;;  %p4563_p2 = scmp.lt.s32.totalorder %s4557_s4, %s4557_s4 }
 0xa27   :  { %4211 = vpow2.f32 %v3840_v24  ;;  %v3841_v5 = vmul.f32 -1.442695, %v2531_v14  ;;  %v3842_v15 = vmul.f32 -1.442695, %v2542_v3 }
 0xa28   :  { %p4564_p3 = por %p4563_p2, %p4562_p1 }
 0xa29   :  { %4213 = vpow2.f32 %v3841_v5 }
 0xa2a   :  { %4215 = vpow2.f32 %v3842_v15  ;;  %p4565_p4 = pnand %p4564_p3, %p4558_p0 }
 0xa31   :  { %v4212_v23 = vpop.eup %4211 }
 0xa32   :  { %v2527_v30 = vadd.f32 1.0, %v4212_v23 }
 0xa33   :  { %v4214_v33 = vpop.eup %4213 }
 0xa34   :  { %4217 = vrcp.f32 %v2527_v30  ;;  %v2536_v38 = vadd.f32 1.0, %v4214_v33  ;;  %v4216_v39 = vpop.eup %4215 }
 0xa35   :  { %4219 = vtanh.f32 %v2539_v29  ;;  %v2547_v5 = vadd.f32 1.0, %v4216_v39 }
 0xa36   :  { %4221 = vrcp.f32 %v2536_v38 }
 0xa37   :  { %4223 = vrcp.f32 %v2547_v5  ;;  %v5915_v5 = vcombine.high %v5528_v11, %v5534_v50 }
 0xa3e   :  { %v4218_v54 = vpop.eup %4217 }
 0xa3f   :  { %v4220_v24 = vpop.eup %4219 }
 0xa40   :  { %v4222_v14 = vpop.eup %4221  ;;  %v2551_v3 = vmul.f32 %v4220_v24, %v4218_v54 }
 0xa41   :  { %v2550_v19 = vmul.f32 %v4222_v14, %v3807_v37  ;;  %v4224_v23 = vpop.eup %4223 }
 0xa43   :  { %v5572_v4 = vadd.f32 %v2551_v3, %v2550_v19 }
 0xa45   :  { %4225 = vtanh.f32 %v5572_v4 }
 0xa4f   :  { %v4226_v15 = vpop.eup %4225 }
 0xa50   :  { %v2554_v12 = vmul.f32 %v4226_v15, %v4224_v23 }
 0xa52   :  { %v2556_v9 = vpack.c.bf16 %v2554_v12, %v2554_v12 }
 0xa54   :  { %2590 = vmatmul.mubr.bf16.vlgmr.msra.gmra.mrb[40].mxu0 %v2556_v9  ;;  %2631 = vmatmul.mubr.bf16.vlgmr.msra.gmra.mrb[48].mxu1 %v2556_v9 }
 0xa55   :  { %2696 = vmatpush1.bf16.msra.mxu0 %v5388_v40  ;;  %2737 = vmatpush1.bf16.msra.mxu1 %v5390_v51 }
 0xa56   :  { %2697 = vmatprep.subr.bf16.mxu0 %v5392_v55  ;;  %2738 = vmatprep.subr.bf16.mxu1 %v5394_v58 }
 0xa57   :  { %2727 = vmatprep.mubr.bf16.mxu0 %v4649_v0  ;;  %2768 = vmatprep.mubr.bf16.mxu1 %v4649_v0 }
 0xa59   :  { %2698 = vmatpush1.bf16.msra.mxu0 %v5398_v31  ;;  %2739 = vmatpush1.bf16.msra.mxu1 %v5400_v20 }
 0xa5a   :  { %2699 = vmatprep.subr.bf16.mxu0 %v5404_v10  ;;  %2740 = vmatprep.subr.bf16.mxu1 %v5406_v62 }
 0xa5d   :  { %2700 = vmatpush1.bf16.msra.mxu0 %v5412_v41  ;;  %2741 = vmatpush1.bf16.msra.mxu1 %v5414_v63 }
 0xa5e   :  { %2701 = vmatprep.subr.bf16.mxu0 %v5418_v42  ;;  %2742 = vmatprep.subr.bf16.mxu1 %v5420_v43 }
 0xa61   :  { %2702 = vmatpush1.bf16.msra.mxu0 %v5424_v44  ;;  %2743 = vmatpush1.bf16.msra.mxu1 %v5426_v45 }
 0xa62   :  { %2703 = vmatprep.subr.bf16.mxu0 %v5430_v46  ;;  %2744 = vmatprep.subr.bf16.mxu1 %v5432_v1 }
 0xa65   :  { %2704 = vmatpush1.bf16.msra.mxu0 %v5436_v56  ;;  %2745 = vmatpush1.bf16.msra.mxu1 %v5438_v2 }
 0xa66   :  { %2705 = vmatprep.subr.bf16.mxu0 %v5442_v48  ;;  %2746 = vmatprep.subr.bf16.mxu1 %v5444_v21 }
 0xa69   :  { %2706 = vmatpush1.bf16.msra.mxu0 %v5448_v7  ;;  %2747 = vmatpush1.bf16.msra.mxu1 %v5450_v25 }
 0xa6a   :  { %2707 = vmatprep.subr.bf16.mxu0 %v5454_v26  ;;  %2748 = vmatprep.subr.bf16.mxu1 %v5456_v59 }
 0xa6d   :  { %2708 = vmatpush1.bf16.msra.mxu0 %v5460_v16  ;;  %2749 = vmatpush1.bf16.msra.mxu1 %v5462_v17 }
 0xa6e   :  { %2709 = vmatprep.subr.bf16.mxu0 %v5466_v28  ;;  %2750 = vmatprep.subr.bf16.mxu1 %v5468_v13 }
 0xa71   :  { %2710 = vmatpush1.bf16.msra.mxu0 %v5472_v32  ;;  %2751 = vmatpush1.bf16.msra.mxu1 %v5474_v36 }
 0xa72   :  { %2833 = vmatprep.subr.bf16.mxu0 %v5365_v47  ;;  %2874 = vmatprep.subr.bf16.mxu1 %v5367_v49 }
 0xb27   :  { %v2591_v27 = vpop.f32.mrb[40].mxu0  ;;  %v2632_v34 = vpop.f32.mrb[48].mxu1 }
 0xb28   :  { %v2593_v53 = vpop.f32.mrb[41].mxu0  ;;  %v2634_v57 = vpop.f32.mrb[49].mxu1 }
 0xb29   :  { %v2643_v29 = vcombine.low %v2591_v27, %v2593_v53  ;;  %v2644_v30 = vcombine.low %v2632_v34, %v2634_v57  ;;  %v2595_v33 = vpop.f32.mrb[42].mxu0  ;;  %v2636_v38 = vpop.f32.mrb[50].mxu1 }
 0xb2a   :  { %v2596_v39 = vpop.f32.mrb[43].mxu0  ;;  %v2637_v54 = vpop.f32.mrb[51].mxu1 }
 0xb2b   :  { %v2651_v37 = vrot.slane %v2643_v29, %v4993_v35  ;;  %v2658_v24 = vrot.slane %v2644_v30, %v4993_v35 }
 0xb2d   :  { %v2659_v14 = vcombine.low %v2651_v37, %v2658_v24 }
 0xb2f   :  { %v2661_v19 = vadd.f32 %v2659_v14, %v5915_v5 }
 0xb31   :  { %v3843_v3 = vmul.f32 -1.442695, %v2661_v19  ;;  %v2669_v23 = vrot.slane %v2661_v19, 2  ;;  %v2680_v12 = vrot.slane %v2661_v19, 6  ;;  %v2677_v34 = vrot.slane %v2661_v19, 4 }
 0xb33   :  { %4227 = vpow2.f32 %v3843_v3  ;;  %v3844_v15 = vmul.f32 -1.442695, %v2669_v23  ;;  %v3845_v9 = vmul.f32 -1.442695, %v2680_v12 }
 0xb35   :  { %4229 = vpow2.f32 %v3844_v15 }
 0xb36   :  { %4231 = vpow2.f32 %v3845_v9 }
 0xb3d   :  { %v4228_v27 = vpop.eup %4227 }
 0xb3e   :  { %v2665_v53 = vadd.f32 1.0, %v4228_v27 }
 0xb3f   :  { %v4230_v57 = vpop.eup %4229 }
 0xb40   :  { %4233 = vrcp.f32 %v2665_v53  ;;  %v2674_v29 = vadd.f32 1.0, %v4230_v57  ;;  %v4232_v30 = vpop.eup %4231 }
 0xb41   :  { %4235 = vtanh.f32 %v2677_v34  ;;  %v2685_v38 = vadd.f32 1.0, %v4232_v30 }
 0xb42   :  { %4237 = vrcp.f32 %v2674_v29 }
 0xb43   :  { %4239 = vrcp.f32 %v2685_v38 }
 0xb4a   :  { %v4234_v33 = vpop.eup %4233 }
 0xb4b   :  { %v4236_v11 = vpop.eup %4235 }
 0xb4c   :  { %v4238_v50 = vpop.eup %4237  ;;  %v2689_v54 = vmul.f32 %v4236_v11, %v4234_v33  ;;  %v5916_v11 = vcombine.low %v5531_v8, %v5537_v61 }
 0xb4d   :  { %v2688_v39 = vmul.f32 %v4238_v50, %v5572_v4  ;;  %v4240_v24 = vpop.eup %4239 }
 0xb4f   :  { %v5615_v37 = vadd.f32 %v2689_v54, %v2688_v39 }
 0xb51   :  { %4241 = vtanh.f32 %v5615_v37 }
 0xb5b   :  { %v4242_v14 = vpop.eup %4241 }
 0xb5c   :  { %v2692_v5 = vmul.f32 %v4242_v14, %v4240_v24 }
 0xb5e   :  { %v2694_v19 = vpack.c.bf16 %v2692_v5, %v2692_v5 }
 0xb60   :  { %2728 = vmatmul.mubr.bf16.vlgmr.msra.gmra.mrb[44].mxu0 %v2694_v19  ;;  %2769 = vmatmul.mubr.bf16.vlgmr.msra.gmra.mrb[52].mxu1 %v2694_v19 }
 0xb61   :  { %2834 = vmatpush1.bf16.msra.mxu0 %v5388_v40  ;;  %2875 = vmatpush1.bf16.msra.mxu1 %v5390_v51 }
 0xb62   :  { %2835 = vmatprep.subr.bf16.mxu0 %v5392_v55  ;;  %2876 = vmatprep.subr.bf16.mxu1 %v5394_v58 }
 0xb63   :  { %2865 = vmatprep.mubr.bf16.mxu0 %v4649_v0  ;;  %2906 = vmatprep.mubr.bf16.mxu1 %v4649_v0 }
 0xb65   :  { %2836 = vmatpush1.bf16.msra.mxu0 %v5398_v31  ;;  %2877 = vmatpush1.bf16.msra.mxu1 %v5400_v20 }
 0xb66   :  { %2837 = vmatprep.subr.bf16.mxu0 %v5404_v10  ;;  %2878 = vmatprep.subr.bf16.mxu1 %v5406_v62 }
 0xb69   :  { %2838 = vmatpush1.bf16.msra.mxu0 %v5412_v41  ;;  %2879 = vmatpush1.bf16.msra.mxu1 %v5414_v63 }
 0xb6a   :  { %2839 = vmatprep.subr.bf16.mxu0 %v5418_v42  ;;  %2880 = vmatprep.subr.bf16.mxu1 %v5420_v43 }
 0xb6d   :  { %2840 = vmatpush1.bf16.msra.mxu0 %v5424_v44  ;;  %2881 = vmatpush1.bf16.msra.mxu1 %v5426_v45 }
 0xb6e   :  { %2841 = vmatprep.subr.bf16.mxu0 %v5430_v46  ;;  %2882 = vmatprep.subr.bf16.mxu1 %v5432_v1 }
 0xb71   :  { %2842 = vmatpush1.bf16.msra.mxu0 %v5436_v56  ;;  %2883 = vmatpush1.bf16.msra.mxu1 %v5438_v2 }
 0xb72   :  { %2843 = vmatprep.subr.bf16.mxu0 %v5442_v48  ;;  %2884 = vmatprep.subr.bf16.mxu1 %v5444_v21 }
 0xb75   :  { %2844 = vmatpush1.bf16.msra.mxu0 %v5448_v7  ;;  %2885 = vmatpush1.bf16.msra.mxu1 %v5450_v25 }
 0xb76   :  { %2845 = vmatprep.subr.bf16.mxu0 %v5454_v26  ;;  %2886 = vmatprep.subr.bf16.mxu1 %v5456_v59 }
 0xb79   :  { %2846 = vmatpush1.bf16.msra.mxu0 %v5460_v16  ;;  %2887 = vmatpush1.bf16.msra.mxu1 %v5462_v17 }
 0xb7a   :  { %2847 = vmatprep.subr.bf16.mxu0 %v5466_v28  ;;  %2888 = vmatprep.subr.bf16.mxu1 %v5468_v13 }
 0xb7d   :  { %2848 = vmatpush1.bf16.msra.mxu0 %v5472_v32  ;;  %2889 = vmatpush1.bf16.msra.mxu1 %v5474_v36 }
 0xb7e   :  { %2971 = vmatprep.subr.bf16.mxu0 %v5365_v47  ;;  %3012 = vmatprep.subr.bf16.mxu1 %v5367_v49 }
 0xc33   :  { %v2729_v4 = vpop.f32.mrb[44].mxu0  ;;  %v2770_v3 = vpop.f32.mrb[52].mxu1 }
 0xc34   :  { %v2731_v23 = vpop.f32.mrb[45].mxu0  ;;  %v2772_v15 = vpop.f32.mrb[53].mxu1 }
 0xc35   :  { %v2781_v12 = vcombine.low %v2729_v4, %v2731_v23  ;;  %v2782_v9 = vcombine.low %v2770_v3, %v2772_v15  ;;  %v2733_v27 = vpop.f32.mrb[46].mxu0  ;;  %v2774_v34 = vpop.f32.mrb[54].mxu1 }
 0xc36   :  { %v2734_v53 = vpop.f32.mrb[47].mxu0  ;;  %v2775_v57 = vpop.f32.mrb[55].mxu1 }
 0xc37   :  { %v2789_v29 = vrot.slane %v2781_v12, %v4993_v35  ;;  %v2796_v30 = vrot.slane %v2782_v9, %v4993_v35 }
 0xc39   :  { %v2797_v33 = vcombine.low %v2789_v29, %v2796_v30 }
 0xc3b   :  { %v2799_v50 = vadd.f32 %v2797_v33, %v5916_v11 }
 0xc3d   :  { %v3846_v38 = vmul.f32 -1.442695, %v2799_v50  ;;  %v2807_v39 = vrot.slane %v2799_v50, 2  ;;  %v2818_v24 = vrot.slane %v2799_v50, 6  ;;  %v2815_v19 = vrot.slane %v2799_v50, 4 }
 0xc3f   :  { %4243 = vpow2.f32 %v3846_v38  ;;  %v3847_v54 = vmul.f32 -1.442695, %v2807_v39  ;;  %v3848_v14 = vmul.f32 -1.442695, %v2818_v24 }
 0xc41   :  { %4245 = vpow2.f32 %v3847_v54 }
 0xc42   :  { %4247 = vpow2.f32 %v3848_v14 }
 0xc49   :  { %v4244_v5 = vpop.eup %4243 }
 0xc4a   :  { %v2803_v4 = vadd.f32 1.0, %v4244_v5 }
 0xc4b   :  { %v4246_v3 = vpop.eup %4245 }
 0xc4c   :  { %4249 = vrcp.f32 %v2803_v4  ;;  %v2812_v23 = vadd.f32 1.0, %v4246_v3  ;;  %v4248_v15 = vpop.eup %4247 }
 0xc4d   :  { %4251 = vtanh.f32 %v2815_v19  ;;  %v2823_v34 = vadd.f32 1.0, %v4248_v15 }
 0xc4e   :  { %4253 = vrcp.f32 %v2812_v23 }
 0xc4f   :  { %4255 = vrcp.f32 %v2823_v34 }
 0xc56   :  { %v4250_v12 = vpop.eup %4249 }
 0xc57   :  { %v4252_v9 = vpop.eup %4251 }
 0xc58   :  { %v4254_v27 = vpop.eup %4253  ;;  %v2827_v57 = vmul.f32 %v4252_v9, %v4250_v12 }
 0xc59   :  { %v2826_v53 = vmul.f32 %v4254_v27, %v5615_v37  ;;  %v4256_v30 = vpop.eup %4255 }
 0xc5b   :  { %v5658_v29 = vadd.f32 %v2827_v57, %v2826_v53 }
 0xc5d   :  { %4257 = vtanh.f32 %v5658_v29 }
 0xc67   :  { %v4258_v33 = vpop.eup %4257 }
 0xc68   :  { %v2830_v11 = vmul.f32 %v4258_v33, %v4256_v30 }
 0xc6a   :  { %v2832_v50 = vpack.c.bf16 %v2830_v11, %v2830_v11 }
 0xc6c   :  { %2866 = vmatmul.mubr.bf16.vlgmr.msra.gmra.mrb[48].mxu0 %v2832_v50  ;;  %2907 = vmatmul.mubr.bf16.vlgmr.msra.gmra.mrb[56].mxu1 %v2832_v50 }
 0xc6d   :  { %2972 = vmatpush1.bf16.msra.mxu0 %v5388_v40  ;;  %3013 = vmatpush1.bf16.msra.mxu1 %v5390_v51 }
 0xc6e   :  { %2973 = vmatprep.subr.bf16.mxu0 %v5392_v55  ;;  %3014 = vmatprep.subr.bf16.mxu1 %v5394_v58 }
 0xc6f   :  { %3003 = vmatprep.mubr.bf16.mxu0 %v4649_v0  ;;  %3044 = vmatprep.mubr.bf16.mxu1 %v4649_v0 }
 0xc71   :  { %2974 = vmatpush1.bf16.msra.mxu0 %v5398_v31  ;;  %3015 = vmatpush1.bf16.msra.mxu1 %v5400_v20 }
 0xc72   :  { %2975 = vmatprep.subr.bf16.mxu0 %v5404_v10  ;;  %3016 = vmatprep.subr.bf16.mxu1 %v5406_v62 }
 0xc75   :  { %2976 = vmatpush1.bf16.msra.mxu0 %v5412_v41  ;;  %3017 = vmatpush1.bf16.msra.mxu1 %v5414_v63 }
 0xc76   :  { %2977 = vmatprep.subr.bf16.mxu0 %v5418_v42  ;;  %3018 = vmatprep.subr.bf16.mxu1 %v5420_v43 }
 0xc79   :  { %2978 = vmatpush1.bf16.msra.mxu0 %v5424_v44  ;;  %3019 = vmatpush1.bf16.msra.mxu1 %v5426_v45 }
 0xc7a   :  { %2979 = vmatprep.subr.bf16.mxu0 %v5430_v46  ;;  %3020 = vmatprep.subr.bf16.mxu1 %v5432_v1 }
 0xc7d   :  { %2980 = vmatpush1.bf16.msra.mxu0 %v5436_v56  ;;  %3021 = vmatpush1.bf16.msra.mxu1 %v5438_v2 }
 0xc7e   :  { %2981 = vmatprep.subr.bf16.mxu0 %v5442_v48  ;;  %3022 = vmatprep.subr.bf16.mxu1 %v5444_v21 }
 0xc81   :  { %2982 = vmatpush1.bf16.msra.mxu0 %v5448_v7  ;;  %3023 = vmatpush1.bf16.msra.mxu1 %v5450_v25 }
 0xc82   :  { %2983 = vmatprep.subr.bf16.mxu0 %v5454_v26  ;;  %3024 = vmatprep.subr.bf16.mxu1 %v5456_v59 }
 0xc85   :  { %2984 = vmatpush1.bf16.msra.mxu0 %v5460_v16  ;;  %3025 = vmatpush1.bf16.msra.mxu1 %v5462_v17 }
 0xc86   :  { %2985 = vmatprep.subr.bf16.mxu0 %v5466_v28  ;;  %3026 = vmatprep.subr.bf16.mxu1 %v5468_v13 }
 0xc89   :  { %2986 = vmatpush1.bf16.msra.mxu0 %v5472_v32  ;;  %3027 = vmatpush1.bf16.msra.mxu1 %v5474_v36 }
 0xc8a   :  { %3109 = vmatprep.subr.bf16.mxu0 %v5365_v47  ;;  %3150 = vmatprep.subr.bf16.mxu1 %v5367_v49  ;;  %v5917_v47 = vcombine.high %v5531_v8, %v5537_v61 }
 0xd3f   :  { %v2867_v37 = vpop.f32.mrb[48].mxu0  ;;  %v2908_v38 = vpop.f32.mrb[56].mxu1 }
 0xd40   :  { %v2869_v39 = vpop.f32.mrb[49].mxu0  ;;  %v2910_v54 = vpop.f32.mrb[57].mxu1 }
 0xd41   :  { %v2919_v24 = vcombine.low %v2867_v37, %v2869_v39  ;;  %v2920_v14 = vcombine.low %v2908_v38, %v2910_v54  ;;  %v2871_v5 = vpop.f32.mrb[50].mxu0  ;;  %v2912_v19 = vpop.f32.mrb[58].mxu1 }
 0xd42   :  { %v2872_v4 = vpop.f32.mrb[51].mxu0  ;;  %v2913_v3 = vpop.f32.mrb[59].mxu1 }
 0xd43   :  { %v2927_v23 = vrot.slane %v2919_v24, %v4993_v35  ;;  %v2934_v15 = vrot.slane %v2920_v14, %v4993_v35 }
 0xd45   :  { %v2935_v12 = vcombine.low %v2927_v23, %v2934_v15 }
 0xd47   :  { %v2937_v9 = vadd.f32 %v2935_v12, %v5917_v47 }
 0xd49   :  { %v3849_v49 = vmul.f32 -1.442695, %v2937_v9  ;;  %v2945_v27 = vrot.slane %v2937_v9, 2  ;;  %v2956_v53 = vrot.slane %v2937_v9, 6  ;;  %v2953_v33 = vrot.slane %v2937_v9, 4 }
 0xd4b   :  { %4259 = vpow2.f32 %v3849_v49  ;;  %v3850_v34 = vmul.f32 -1.442695, %v2945_v27  ;;  %v3851_v57 = vmul.f32 -1.442695, %v2956_v53 }
 0xd4d   :  { %4261 = vpow2.f32 %v3850_v34  ;;  %v5918_v34 = vcombine.low %v5548_v18, %v5554_v60 }
 0xd4e   :  { %4263 = vpow2.f32 %v3851_v57 }
 0xd55   :  { %v4260_v30 = vpop.eup %4259 }
 0xd56   :  { %v2941_v11 = vadd.f32 1.0, %v4260_v30 }
 0xd57   :  { %v4262_v50 = vpop.eup %4261 }
 0xd58   :  { %4265 = vrcp.f32 %v2941_v11  ;;  %v2950_v37 = vadd.f32 1.0, %v4262_v50  ;;  %v4264_v38 = vpop.eup %4263 }
 0xd59   :  { %4267 = vtanh.f32 %v2953_v33  ;;  %v2961_v54 = vadd.f32 1.0, %v4264_v38 }
 0xd5a   :  { %4269 = vrcp.f32 %v2950_v37 }
 0xd5b   :  { %4271 = vrcp.f32 %v2961_v54 }
 0xd62   :  { %v4266_v39 = vpop.eup %4265 }
 0xd63   :  { %v4268_v8 = vpop.eup %4267 }
 0xd64   :  { %v4270_v61 = vpop.eup %4269  ;;  %v2965_v14 = vmul.f32 %v4268_v8, %v4266_v39 }
 0xd65   :  { %v2964_v24 = vmul.f32 %v4270_v61, %v5658_v29  ;;  %v4272_v19 = vpop.eup %4271 }
 0xd67   :  { %v5701_v5 = vadd.f32 %v2965_v14, %v2964_v24 }
 0xd69   :  { %4273 = vtanh.f32 %v5701_v5 }
 0xd73   :  { %v4274_v4 = vpop.eup %4273 }
 0xd74   :  { %v2968_v3 = vmul.f32 %v4274_v4, %v4272_v19 }
 0xd76   :  { %v2970_v23 = vpack.c.bf16 %v2968_v3, %v2968_v3 }
 0xd78   :  { %3004 = vmatmul.mubr.bf16.vlgmr.msra.gmra.mrb[52].mxu0 %v2970_v23  ;;  %3045 = vmatmul.mubr.bf16.vlgmr.msra.gmra.mrb[60].mxu1 %v2970_v23 }
 0xd79   :  { %3110 = vmatpush1.bf16.msra.mxu0 %v5388_v40  ;;  %3151 = vmatpush1.bf16.msra.mxu1 %v5390_v51  ;;  %v5736_v40 = vld [vmem:[#allocation13 + $0x4] ss:$16 sps:$4 sm:$0xff]   ;;  %v5739_v51 = vld [vmem:[#allocation13 + $0xc] ss:$16 sps:$4 sm:$0xff]  }
 0xd7a   :  { %3111 = vmatprep.subr.bf16.mxu0 %v5392_v55  ;;  %3152 = vmatprep.subr.bf16.mxu1 %v5394_v58 }
 0xd7b   :  { %3141 = vmatprep.mubr.bf16.mxu0 %v4649_v0  ;;  %3182 = vmatprep.mubr.bf16.mxu1 %v4649_v0 }
 0xd7d   :  { %3112 = vmatpush1.bf16.msra.mxu0 %v5398_v31  ;;  %3153 = vmatpush1.bf16.msra.mxu1 %v5400_v20 }
 0xd7e   :  { %3113 = vmatprep.subr.bf16.mxu0 %v5404_v10  ;;  %3154 = vmatprep.subr.bf16.mxu1 %v5406_v62 }
 0xd81   :  { %3114 = vmatpush1.bf16.msra.mxu0 %v5412_v41  ;;  %3155 = vmatpush1.bf16.msra.mxu1 %v5414_v63 }
 0xd82   :  { %3115 = vmatprep.subr.bf16.mxu0 %v5418_v42  ;;  %3156 = vmatprep.subr.bf16.mxu1 %v5420_v43 }
 0xd85   :  { %3116 = vmatpush1.bf16.msra.mxu0 %v5424_v44  ;;  %3157 = vmatpush1.bf16.msra.mxu1 %v5426_v45 }
 0xd86   :  { %3117 = vmatprep.subr.bf16.mxu0 %v5430_v46  ;;  %3158 = vmatprep.subr.bf16.mxu1 %v5432_v1 }
 0xd89   :  { %3118 = vmatpush1.bf16.msra.mxu0 %v5436_v56  ;;  %3159 = vmatpush1.bf16.msra.mxu1 %v5438_v2 }
 0xd8a   :  { %3119 = vmatprep.subr.bf16.mxu0 %v5442_v48  ;;  %3160 = vmatprep.subr.bf16.mxu1 %v5444_v21 }
 0xd8d   :  { %3120 = vmatpush1.bf16.msra.mxu0 %v5448_v7  ;;  %3161 = vmatpush1.bf16.msra.mxu1 %v5450_v25 }
 0xd8e   :  { %3121 = vmatprep.subr.bf16.mxu0 %v5454_v26  ;;  %3162 = vmatprep.subr.bf16.mxu1 %v5456_v59 }
 0xd91   :  { %3122 = vmatpush1.bf16.msra.mxu0 %v5460_v16  ;;  %3163 = vmatpush1.bf16.msra.mxu1 %v5462_v17 }
 0xd92   :  { %3123 = vmatprep.subr.bf16.mxu0 %v5466_v28  ;;  %3164 = vmatprep.subr.bf16.mxu1 %v5468_v13 }
 0xd95   :  { %3124 = vmatpush1.bf16.msra.mxu0 %v5472_v32  ;;  %3165 = vmatpush1.bf16.msra.mxu1 %v5474_v36 }
 0xd96   :  { %3247 = vmatprep.subr.bf16.mxu0 %v5736_v40  ;;  %3288 = vmatprep.subr.bf16.mxu1 %v5739_v51 }
 0xe4b   :  { %v3005_v55 = vpop.f32.mrb[52].mxu0  ;;  %v3046_v58 = vpop.f32.mrb[60].mxu1 }
 0xe4c   :  { %v3007_v31 = vpop.f32.mrb[53].mxu0  ;;  %v3048_v20 = vpop.f32.mrb[61].mxu1 }
 0xe4d   :  { %v3057_v10 = vcombine.low %v3005_v55, %v3007_v31  ;;  %v3058_v62 = vcombine.low %v3046_v58, %v3048_v20  ;;  %v3009_v29 = vpop.f32.mrb[54].mxu0  ;;  %v3050_v15 = vpop.f32.mrb[62].mxu1 }
 0xe4e   :  { %v3010_v12 = vpop.f32.mrb[55].mxu0  ;;  %v3051_v47 = vpop.f32.mrb[63].mxu1  ;;  %v5754_v29 = vld [vmem:[#allocation13 + $0x8] ss:$16 sps:$4 sm:$0xff]   ;;  %v5760_v15 = vld [vmem:[#allocation13 + $0x2c] ss:$16 sps:$4 sm:$0xff]  }
 0xe4f   :  { %v3065_v9 = vrot.slane %v3057_v10, %v4993_v35  ;;  %v3072_v49 = vrot.slane %v3058_v62, %v4993_v35  ;;  %v5751_v62 = vld [vmem:[#allocation13] ss:$16 sps:$4 sm:$0xff]   ;;  %v5768_v47 = vld [vmem:[#allocation13 + $0x28] ss:$16 sps:$4 sm:$0xff]  }
 0xe50   :  { %v5765_v12 = vld [vmem:[#allocation13 + $0x20] ss:$16 sps:$4 sm:$0xff]  }
 0xe51   :  { %v3073_v27 = vcombine.low %v3065_v9, %v3072_v49  ;;  %v5771_v9 = vld [vmem:[#allocation13 + $0x44] ss:$16 sps:$4 sm:$0xff]   ;;  %v5774_v49 = vld [vmem:[#allocation13 + $0x4c] ss:$16 sps:$4 sm:$0xff]  }
 0xe53   :  { %v3075_v53 = vadd.f32 %v3073_v27, %v5918_v34 }
 0xe55   :  { %v3852_v57 = vmul.f32 -1.442695, %v3075_v53  ;;  %v3083_v30 = vrot.slane %v3075_v53, 2  ;;  %v3094_v11 = vrot.slane %v3075_v53, 6  ;;  %v3091_v38 = vrot.slane %v3075_v53, 4 }
 0xe57   :  { %4275 = vpow2.f32 %v3852_v57  ;;  %v3853_v33 = vmul.f32 -1.442695, %v3083_v30  ;;  %v3854_v50 = vmul.f32 -1.442695, %v3094_v11 }
 0xe59   :  { %4277 = vpow2.f32 %v3853_v33 }
 0xe5a   :  { %4279 = vpow2.f32 %v3854_v50 }
 0xe61   :  { %v4276_v37 = vpop.eup %4275 }
 0xe62   :  { %v3079_v39 = vadd.f32 1.0, %v4276_v37 }
 0xe63   :  { %v4278_v8 = vpop.eup %4277 }
 0xe64   :  { %4281 = vrcp.f32 %v3079_v39  ;;  %v3088_v61 = vadd.f32 1.0, %v4278_v8  ;;  %v4280_v54 = vpop.eup %4279  ;;  %v4381_v8 = vld [vmem:[#allocation13 + $0x40] ss:$16 sps:$4 sm:$0xff]  }
 0xe65   :  { %4283 = vtanh.f32 %v3091_v38  ;;  %v3099_v4 = vadd.f32 1.0, %v4280_v54  ;;  %v4383_v54 = vld [vmem:[#allocation13 + $0x64] ss:$16 sps:$4 sm:$0xff]  }
 0xe66   :  { %4285 = vrcp.f32 %v3088_v61  ;;  %v4382_v61 = vld [vmem:[#allocation13 + $0x48] ss:$16 sps:$4 sm:$0xff]  }
 0xe67   :  { %4287 = vrcp.f32 %v3099_v4  ;;  %v4388_v4 = vld [vmem:[#allocation13 + $0x8c] ss:$16 sps:$4 sm:$0xff]  }
 0xe6e   :  { %v4282_v24 = vpop.eup %4281 }
 0xe6f   :  { %v4284_v14 = vpop.eup %4283 }
 0xe70   :  { %v4286_v19 = vpop.eup %4285  ;;  %v3103_v23 = vmul.f32 %v4284_v14, %v4282_v24  ;;  %v4384_v24 = vld [vmem:[#allocation13 + $0x6c] ss:$16 sps:$4 sm:$0xff]   ;;  %v4385_v14 = vld [vmem:[#allocation13 + $0x60] ss:$16 sps:$4 sm:$0xff]  }
 0xe71   :  { %v3102_v3 = vmul.f32 %v4286_v19, %v5701_v5  ;;  %v4288_v58 = vpop.eup %4287  ;;  %v5757_v5 = vld [vmem:[#allocation13 + $0x24] ss:$16 sps:$4 sm:$0xff]   ;;  %v4386_v19 = vld [vmem:[#allocation13 + $0x68] ss:$16 sps:$4 sm:$0xff]  }
 0xe73   :  { %v5748_v55 = vadd.f32 %v3103_v23, %v3102_v3  ;;  %v4389_v3 = vld [vmem:[#allocation13 + $0x80] ss:$16 sps:$4 sm:$0xff]   ;;  %v4390_v23 = vld [vmem:[#allocation13 + $0x88] ss:$16 sps:$4 sm:$0xff]  }
 0xe75   :  { %4289 = vtanh.f32 %v5748_v55 }
 0xe7f   :  { %v4290_v31 = vpop.eup %4289 }
 0xe80   :  { %v3106_v20 = vmul.f32 %v4290_v31, %v4288_v58  ;;  %v4392_v58 = vld [vmem:[#allocation13 + $0xac] ss:$16 sps:$4 sm:$0xff]   ;;  %v4393_v31 = vld [vmem:[#allocation13 + $0xa0] ss:$16 sps:$4 sm:$0xff]  }
 0xe82   :  { %v3108_v10 = vpack.c.bf16 %v3106_v20, %v3106_v20  ;;  %v4394_v20 = vld [vmem:[#allocation13 + $0xa8] ss:$16 sps:$4 sm:$0xff]  }
 0xe84   :  { %3142 = vmatmul.mubr.bf16.vlgmr.msra.gmra.mrb[56].mxu0 %v3108_v10  ;;  %3183 = vmatmul.mubr.bf16.vlgmr.msra.gmra.mrb[64].mxu1 %v3108_v10  ;;  %v4395_v10 = vld [vmem:[#allocation13 + $0xc4] ss:$16 sps:$4 sm:$0xff]  }
 0xe85   :  { %3248 = vmatpush1.bf16.msra.mxu0 %v5751_v62  ;;  %3289 = vmatpush1.bf16.msra.mxu1 %v5754_v29 }
 0xe86   :  { %3249 = vmatprep.subr.bf16.mxu0 %v5757_v5  ;;  %3290 = vmatprep.subr.bf16.mxu1 %v5760_v15 }
 0xe87   :  { %3279 = vmatprep.mubr.bf16.mxu0 %v4649_v0  ;;  %3320 = vmatprep.mubr.bf16.mxu1 %v4649_v0 }
 0xe89   :  { %3250 = vmatpush1.bf16.msra.mxu0 %v5765_v12  ;;  %3291 = vmatpush1.bf16.msra.mxu1 %v5768_v47 }
 0xe8a   :  { %3251 = vmatprep.subr.bf16.mxu0 %v5771_v9  ;;  %3292 = vmatprep.subr.bf16.mxu1 %v5774_v49 }
 0xe8d   :  { %3252 = vmatpush1.bf16.msra.mxu0 %v5412_v41  ;;  %3293 = vmatpush1.bf16.msra.mxu1 %v5414_v63 }
 0xe8e   :  { %3253 = vmatprep.subr.bf16.mxu0 %v5418_v42  ;;  %3294 = vmatprep.subr.bf16.mxu1 %v5420_v43 }
 0xe91   :  { %3254 = vmatpush1.bf16.msra.mxu0 %v5424_v44  ;;  %3295 = vmatpush1.bf16.msra.mxu1 %v5426_v45 }
 0xe92   :  { %3255 = vmatprep.subr.bf16.mxu0 %v5430_v46  ;;  %3296 = vmatprep.subr.bf16.mxu1 %v5432_v1 }
 0xe95   :  { %3256 = vmatpush1.bf16.msra.mxu0 %v5436_v56  ;;  %3297 = vmatpush1.bf16.msra.mxu1 %v5438_v2 }
 0xe96   :  { %3257 = vmatprep.subr.bf16.mxu0 %v5442_v48  ;;  %3298 = vmatprep.subr.bf16.mxu1 %v5444_v21 }
 0xe99   :  { %3258 = vmatpush1.bf16.msra.mxu0 %v5448_v7  ;;  %3299 = vmatpush1.bf16.msra.mxu1 %v5450_v25  ;;  %v5919_v25 = vcombine.high %v5548_v18, %v5554_v60 }
 0xe9a   :  { %3259 = vmatprep.subr.bf16.mxu0 %v5454_v26  ;;  %3300 = vmatprep.subr.bf16.mxu1 %v5456_v59 }
 0xe9d   :  { %3260 = vmatpush1.bf16.msra.mxu0 %v5460_v16  ;;  %3301 = vmatpush1.bf16.msra.mxu1 %v5462_v17 }
 0xe9e   :  { %3261 = vmatprep.subr.bf16.mxu0 %v5466_v28  ;;  %3302 = vmatprep.subr.bf16.mxu1 %v5468_v13 }
 0xea1   :  { %3262 = vmatpush1.bf16.msra.mxu0 %v5472_v32  ;;  %3303 = vmatpush1.bf16.msra.mxu1 %v5474_v36 }
 0xea2   :  { %3385 = vmatprep.subr.bf16.mxu0 %v5736_v40  ;;  %3426 = vmatprep.subr.bf16.mxu1 %v5739_v51 }
 0xf57   :  { %v3143_v41 = vpop.f32.mrb[56].mxu0  ;;  %v3184_v63 = vpop.f32.mrb[64].mxu1 }
 0xf58   :  { %v3145_v42 = vpop.f32.mrb[57].mxu0  ;;  %v3186_v43 = vpop.f32.mrb[65].mxu1 }
 0xf59   :  { %v3195_v44 = vcombine.low %v3143_v41, %v3145_v42  ;;  %v3196_v45 = vcombine.low %v3184_v63, %v3186_v43  ;;  %v3147_v46 = vpop.f32.mrb[58].mxu0  ;;  %v3188_v1 = vpop.f32.mrb[66].mxu1 }
 0xf5a   :  { %v3148_v56 = vpop.f32.mrb[59].mxu0  ;;  %v3189_v2 = vpop.f32.mrb[67].mxu1 }
 0xf5b   :  { %v3203_v48 = vrot.slane %v3195_v44, %v4993_v35  ;;  %v3210_v21 = vrot.slane %v3196_v45, %v4993_v35 }
 0xf5d   :  { %v3211_v7 = vcombine.low %v3203_v48, %v3210_v21 }
 0xf5f   :  { %v3213_v26 = vadd.f32 %v3211_v7, %v5919_v25  ;;  %v5920_v7 = vcombine.low %v5551_v22, %v5557_v6 }
 0xf61   :  { %v3855_v59 = vmul.f32 -1.442695, %v3213_v26  ;;  %v3221_v16 = vrot.slane %v3213_v26, 2  ;;  %v3232_v28 = vrot.slane %v3213_v26, 6  ;;  %v3229_v36 = vrot.slane %v3213_v26, 4 }
 0xf63   :  { %4291 = vpow2.f32 %v3855_v59  ;;  %v3856_v17 = vmul.f32 -1.442695, %v3221_v16  ;;  %v3857_v13 = vmul.f32 -1.442695, %v3232_v28 }
 0xf65   :  { %4293 = vpow2.f32 %v3856_v17 }
 0xf66   :  { %4295 = vpow2.f32 %v3857_v13 }
 0xf6d   :  { %v4292_v32 = vpop.eup %4291 }
 0xf6e   :  { %v3217_v40 = vadd.f32 1.0, %v4292_v32 }
 0xf6f   :  { %v4294_v51 = vpop.eup %4293 }
 0xf70   :  { %4297 = vrcp.f32 %v3217_v40  ;;  %v3226_v27 = vadd.f32 1.0, %v4294_v51  ;;  %v4296_v34 = vpop.eup %4295 }
 0xf71   :  { %4299 = vtanh.f32 %v3229_v36  ;;  %v3237_v57 = vadd.f32 1.0, %v4296_v34 }
 0xf72   :  { %4301 = vrcp.f32 %v3226_v27 }
 0xf73   :  { %4303 = vrcp.f32 %v3237_v57 }
 0xf7a   :  { %v4298_v53 = vpop.eup %4297 }
 0xf7b   :  { %v4300_v18 = vpop.eup %4299 }
 0xf7c   :  { %v4302_v60 = vpop.eup %4301  ;;  %v3241_v33 = vmul.f32 %v4300_v18, %v4298_v53 }
 0xf7d   :  { %v3240_v30 = vmul.f32 %v4302_v60, %v5748_v55  ;;  %v4304_v50 = vpop.eup %4303  ;;  %v4391_v55 = vld [vmem:[#allocation13 + $0xa4] ss:$16 sps:$4 sm:$0xff]  }
 0xf7f   :  { %v5807_v11 = vadd.f32 %v3241_v33, %v3240_v30 }
 0xf81   :  { %4305 = vtanh.f32 %v5807_v11 }
 0xf8b   :  { %v4306_v37 = vpop.eup %4305 }
 0xf8c   :  { %v3244_v38 = vmul.f32 %v4306_v37, %v4304_v50 }
 0xf8e   :  { %v3246_v39 = vpack.c.bf16 %v3244_v38, %v3244_v38 }
 0xf90   :  { %3280 = vmatmul.mubr.bf16.vlgmr.msra.gmra.mrb[60].mxu0 %v3246_v39  ;;  %3321 = vmatmul.mubr.bf16.vlgmr.msra.gmra.mrb[68].mxu1 %v3246_v39 }
 0xf91   :  { %3386 = vmatpush1.bf16.msra.mxu0 %v5751_v62  ;;  %3427 = vmatpush1.bf16.msra.mxu1 %v5754_v29  ;;  %v4396_v62 = vld [vmem:[#allocation13 + $0xcc] ss:$16 sps:$4 sm:$0xff]   ;;  %v4397_v29 = vld [vmem:[#allocation13 + $0xc0] ss:$16 sps:$4 sm:$0xff]  }
 0xf92   :  { %3387 = vmatprep.subr.bf16.mxu0 %v5757_v5  ;;  %3428 = vmatprep.subr.bf16.mxu1 %v5760_v15  ;;  %v4398_v5 = vld [vmem:[#allocation13 + $0xc8] ss:$16 sps:$4 sm:$0xff]   ;;  %v4399_v15 = vld [vmem:[#allocation13 + $0xe4] ss:$16 sps:$4 sm:$0xff]  }
 0xf93   :  { %3417 = vmatprep.mubr.bf16.mxu0 %v4649_v0  ;;  %3458 = vmatprep.mubr.bf16.mxu1 %v4649_v0  ;;  %v4387_v0 = vld [vmem:[#allocation13 + $0x84] ss:$16 sps:$4 sm:$0xff]  }
 0xf95   :  { %3388 = vmatpush1.bf16.msra.mxu0 %v5765_v12  ;;  %3429 = vmatpush1.bf16.msra.mxu1 %v5768_v47  ;;  %v4400_v12 = vld [vmem:[#allocation13 + $0xec] ss:$16 sps:$4 sm:$0xff]   ;;  %v4401_v47 = vld [vmem:[#allocation13 + $0xe0] ss:$16 sps:$4 sm:$0xff]  }
 0xf96   :  { %3389 = vmatprep.subr.bf16.mxu0 %v5771_v9  ;;  %3430 = vmatprep.subr.bf16.mxu1 %v5774_v49  ;;  %v4402_v9 = vld [vmem:[#allocation13 + $0xe8] ss:$16 sps:$4 sm:$0xff]  }
 0xf99   :  { %3390 = vmatpush1.bf16.msra.mxu0 %v4381_v8  ;;  %3431 = vmatpush1.bf16.msra.mxu1 %v4382_v61  ;;  %v4075_v8 = vld [vmem:[#allocation15] sm:$0xff]   ;;  %v4652_v61 = vmov 0.0  }
 0xf9a   :  { %3391 = vmatprep.subr.bf16.mxu0 %v4383_v54  ;;  %3432 = vmatprep.subr.bf16.mxu1 %v4384_v24  ;;  %v4076_v54 = vld [vmem:[#allocation15 + $0x8] sm:$0xff]   ;;  %v4078_v24 = vld [vmem:[#allocation15 + $0x18] sm:$0xff]  }
 0xf9d   :  { %3392 = vmatpush1.bf16.msra.mxu0 %v4385_v14  ;;  %3433 = vmatpush1.bf16.msra.mxu1 %v4386_v19  ;;  %v4079_v14 = vld [vmem:[#allocation15 + $0x20] sm:$0xff]   ;;  %v4080_v19 = vld [vmem:[#allocation15 + $0x28] sm:$0xff]  }
 0xf9e   :  { %3393 = vmatprep.subr.bf16.mxu0 %v4387_v0  ;;  %3434 = vmatprep.subr.bf16.mxu1 %v4388_v4  ;;  %v4081_v0 = vld [vmem:[#allocation15 + $0x30] sm:$0xff]   ;;  %v4082_v4 = vld [vmem:[#allocation15 + $0x38] sm:$0xff]  }
 0xfa1   :  { %3394 = vmatpush1.bf16.msra.mxu0 %v4389_v3  ;;  %3435 = vmatpush1.bf16.msra.mxu1 %v4390_v23 }
 0xfa2   :  { %3395 = vmatprep.subr.bf16.mxu0 %v4391_v55  ;;  %3436 = vmatprep.subr.bf16.mxu1 %v4392_v58 }
 0xfa5   :  { %3396 = vmatpush1.bf16.msra.mxu0 %v4393_v31  ;;  %3437 = vmatpush1.bf16.msra.mxu1 %v4394_v20 }
 0xfa6   :  { %3397 = vmatprep.subr.bf16.mxu0 %v4395_v10  ;;  %3438 = vmatprep.subr.bf16.mxu1 %v4396_v62 }
 0xfa9   :  { %3398 = vmatpush1.bf16.msra.mxu0 %v4397_v29  ;;  %3439 = vmatpush1.bf16.msra.mxu1 %v4398_v5 }
 0xfaa   :  { %3399 = vmatprep.subr.bf16.mxu0 %v4399_v15  ;;  %3440 = vmatprep.subr.bf16.mxu1 %v4400_v12 }
 0xfad   :  { %3400 = vmatpush1.bf16.msra.mxu0 %v4401_v47  ;;  %3441 = vmatpush1.bf16.msra.mxu1 %v4402_v9  ;;  %v5921_v9 = vcombine.high %v5551_v22, %v5557_v6 }
 0xfae   :  { %3883 = vmatprep.subr.bf16.mxu0 %v4652_v61 }
0x1063   :  { %v3281_v49 = vpop.f32.mrb[60].mxu0  ;;  %v3322_v41 = vpop.f32.mrb[68].mxu1 }
0x1064   :  { %v3283_v63 = vpop.f32.mrb[61].mxu0  ;;  %v3324_v42 = vpop.f32.mrb[69].mxu1 }
0x1065   :  { %v3333_v43 = vcombine.low %v3281_v49, %v3283_v63  ;;  %v3334_v44 = vcombine.low %v3322_v41, %v3324_v42  ;;  %v3285_v45 = vpop.f32.mrb[62].mxu0  ;;  %v3326_v46 = vpop.f32.mrb[70].mxu1 }
0x1066   :  { %v3286_v1 = vpop.f32.mrb[63].mxu0  ;;  %v3327_v56 = vpop.f32.mrb[71].mxu1 }
0x1067   :  { %v3341_v2 = vrot.slane %v3333_v43, %v4993_v35  ;;  %v3348_v48 = vrot.slane %v3334_v44, %v4993_v35 }
0x1069   :  { %v3349_v21 = vcombine.low %v3341_v2, %v3348_v48 }
0x106b   :  { %v3351_v25 = vadd.f32 %v3349_v21, %v5920_v7 }
0x106d   :  { %v3858_v26 = vmul.f32 -1.442695, %v3351_v25  ;;  %v3359_v59 = vrot.slane %v3351_v25, 2  ;;  %v3370_v17 = vrot.slane %v3351_v25, 6  ;;  %v3367_v32 = vrot.slane %v3351_v25, 4 }
0x106f   :  { %4307 = vpow2.f32 %v3858_v26  ;;  %v3859_v16 = vmul.f32 -1.442695, %v3359_v59  ;;  %v3860_v28 = vmul.f32 -1.442695, %v3370_v17 }
0x1071   :  { %4309 = vpow2.f32 %v3859_v16 }
0x1072   :  { %4311 = vpow2.f32 %v3860_v28 }
0x1079   :  { %v4308_v13 = vpop.eup %4307 }
0x107a   :  { %v3355_v36 = vadd.f32 1.0, %v4308_v13 }
0x107b   :  { %v4310_v40 = vpop.eup %4309 }
0x107c   :  { %4313 = vrcp.f32 %v3355_v36  ;;  %v3364_v51 = vadd.f32 1.0, %v4310_v40  ;;  %v4312_v27 = vpop.eup %4311 }
0x107d   :  { %4315 = vtanh.f32 %v3367_v32  ;;  %v3375_v60 = vadd.f32 1.0, %v4312_v27 }
0x107e   :  { %4317 = vrcp.f32 %v3364_v51 }
0x107f   :  { %4319 = vrcp.f32 %v3375_v60 }
0x1086   :  { %v4314_v34 = vpop.eup %4313 }
0x1087   :  { %v4316_v53 = vpop.eup %4315 }
0x1088   :  { %v4318_v18 = vpop.eup %4317  ;;  %v3379_v30 = vmul.f32 %v4316_v53, %v4314_v34 }
0x1089   :  { %v3378_v57 = vmul.f32 %v4318_v18, %v5807_v11  ;;  %v4320_v50 = vpop.eup %4319  ;;  %v4077_v11 = vld [vmem:[#allocation15 + $0x10] sm:$0xff]  }
0x108b   :  { %v5826_v33 = vadd.f32 %v3379_v30, %v3378_v57 }
0x108d   :  { %4321 = vtanh.f32 %v5826_v33 }
0x1097   :  { %v4322_v37 = vpop.eup %4321 }
0x1098   :  { %v3382_v38 = vmul.f32 %v4322_v37, %v4320_v50 }
0x109a   :  { %v3384_v39 = vpack.c.bf16 %v3382_v38, %v3382_v38 }
0x109c   :  { %3418 = vmatmul.mubr.bf16.vlgmr.msra.gmra.mrb[64].mxu0 %v3384_v39  ;;  %3459 = vmatmul.mubr.bf16.vlgmr.msra.gmra.mrb[72].mxu1 %v3384_v39 }
0x109d   :  { %3884 = vmatpush3.bf16.msra.mxu0 %v4075_v8  ;;  %3899 = vmatprep.mubr.msk.bf16.mxu0 %vm4653_vm1, %v4652_v61 }
0x109e   :  { %3885 = vmatprep.subr.bf16.mxu0 %v4652_v61 }
0x10a1   :  { %3886 = vmatpush3.bf16.msra.mxu0 %v4076_v54 }
0x10a2   :  { %3887 = vmatprep.subr.bf16.mxu0 %v4652_v61 }
0x10a5   :  { %3888 = vmatpush3.bf16.msra.mxu0 %v4077_v11 }
0x10a6   :  { %3889 = vmatprep.subr.bf16.mxu0 %v4652_v61 }
0x10a9   :  { %3890 = vmatpush3.bf16.msra.mxu0 %v4078_v24 }
0x10aa   :  { %3891 = vmatprep.subr.bf16.mxu0 %v4652_v61 }
0x10ad   :  { %3892 = vmatpush3.bf16.msra.mxu0 %v4079_v14 }
0x10ae   :  { %3893 = vmatprep.subr.bf16.mxu0 %v4652_v61 }
0x10b1   :  { %3894 = vmatpush3.bf16.msra.mxu0 %v4080_v19 }
0x10b2   :  { %3895 = vmatprep.subr.bf16.mxu0 %v4652_v61 }
0x10b5   :  { %3896 = vmatpush3.bf16.msra.mxu0 %v4081_v0 }
0x10b6   :  { %3897 = vmatprep.subr.bf16.mxu0 %v4652_v61 }
0x10b9   :  { %3898 = vmatpush3.bf16.msra.mxu0 %v4082_v4 }
0x116f   :  { %v3419_v3 = vpop.f32.mrb[64].mxu0  ;;  %v3460_v23 = vpop.f32.mrb[72].mxu1 }
0x1170   :  { %v3421_v55 = vpop.f32.mrb[65].mxu0  ;;  %v3462_v58 = vpop.f32.mrb[73].mxu1 }
0x1171   :  { %v3471_v31 = vcombine.low %v3419_v3, %v3421_v55  ;;  %v3472_v20 = vcombine.low %v3460_v23, %v3462_v58  ;;  %v3423_v10 = vpop.f32.mrb[66].mxu0  ;;  %v3464_v62 = vpop.f32.mrb[74].mxu1 }
0x1172   :  { %v3424_v29 = vpop.f32.mrb[67].mxu0  ;;  %v3465_v5 = vpop.f32.mrb[75].mxu1 }
0x1173   :  { %v3479_v15 = vrot.slane %v3471_v31, %v4993_v35  ;;  %v3486_v12 = vrot.slane %v3472_v20, %v4993_v35 }
0x1175   :  { %v3487_v47 = vcombine.low %v3479_v15, %v3486_v12 }
0x1177   :  { %v3489_v49 = vadd.f32 %v3487_v47, %v5921_v9 }
0x1179   :  { %v3861_v41 = vmul.f32 -1.442695, %v3489_v49  ;;  %v3497_v63 = vrot.slane %v3489_v49, 2  ;;  %v3508_v43 = vrot.slane %v3489_v49, 6  ;;  %v3505_v46 = vrot.slane %v3489_v49, 4 }
0x117b   :  { %4323 = vpow2.f32 %v3861_v41  ;;  %v3862_v42 = vmul.f32 -1.442695, %v3497_v63  ;;  %v3863_v44 = vmul.f32 -1.442695, %v3508_v43 }
0x117d   :  { %4325 = vpow2.f32 %v3862_v42 }
0x117e   :  { %4327 = vpow2.f32 %v3863_v44 }
0x1185   :  { %v4324_v45 = vpop.eup %4323 }
0x1186   :  { %v3493_v1 = vadd.f32 1.0, %v4324_v45 }
0x1187   :  { %v4326_v56 = vpop.eup %4325 }
0x1188   :  { %4329 = vrcp.f32 %v3493_v1  ;;  %v3502_v2 = vadd.f32 1.0, %v4326_v56  ;;  %v4328_v48 = vpop.eup %4327 }
0x1189   :  { %4331 = vtanh.f32 %v3505_v46  ;;  %v3513_v7 = vadd.f32 1.0, %v4328_v48 }
0x118a   :  { %4333 = vrcp.f32 %v3502_v2 }
0x118b   :  { %4335 = vrcp.f32 %v3513_v7 }
0x1192   :  { %v4330_v21 = vpop.eup %4329 }
0x1193   :  { %v4332_v22 = vpop.eup %4331 }
0x1194   :  { %v4334_v6 = vpop.eup %4333  ;;  %v3517_v26 = vmul.f32 %v4332_v22, %v4330_v21 }
0x1195   :  { %v3516_v25 = vmul.f32 %v4334_v6, %v5826_v33  ;;  %v4336_v16 = vpop.eup %4335 }
0x1197   :  { %v3518_v59 = vadd.f32 %v3517_v26, %v3516_v25 }
0x1199   :  { %3524 = vst [vmem:[#allocation19 + $0x2] sm:$0x3] %v3518_v59  ;;  %4337 = vtanh.f32 %v3518_v59 }
0x11a3   :  { %v4338_v17 = vpop.eup %4337 }
0x11a4   :  { %v3520_v28 = vmul.f32 %v4338_v17, %v4336_v16 }
0x11a6   :  { %v3526_v13 = vcombine.low %v3520_v28, %v3520_v28  ;;  %3522 = vst [vmem:[#allocation17 + $0x2] sm:$0x3] %v3520_v28 }
0x11a8   :  { %v3533_v32 = vrot.slane %v3526_v13, %v4993_v35 }
0x11aa   :  { %v3536_v36 = vsel %vm3535_vm2, %v5377_v52, %v3533_v32 }
0x11ab   :  { %v3537_v40 = vpack.c.bf16 %v3536_v36, %v3536_v36 }
0x11ad   :  { %3900 = vmatmul.mubr.bf16.vlgmr.msra.gmra.mrb[68].mxu0 %v3537_v40 }
0x11ae   :  { %4568 = shalt.err (!%p4565_p4)
}
0x11af   :  { %s4569_s28 = scalar_lea.hbm %s5898_s12, 64 }
0x11b0   :  { %p4570_p5 = scmp.ne.s32.totalorder %s5898_s12, %s4569_s28  ;;  %p4573_p6 = scmp.lt.u32.totalorder %s4569_s28, %s5898_s12 }
0x11b2   :  { %p4575_p7 = pnand %p4573_p6, %p4570_p5 }
0x11b4   :  { %4578 = shalt.err (!%p4575_p7)
}
0x11b5   :  { %3685 = dma.vmem_to_hbm [thread:$0]  %s3680_s3, 64, %s5898_s12, [#allocation18], %s4636_s18, %s4636_s18, %s4637_s19  }
0x11b6   :  { %s4655_s14 = smov [#allocation19]  }
0x11b7   :  { %s3691_s6 = sshll.u32 %s4655_s14, 4  ;;  %s3692_s6 = int_to_ptr.vmem [resolvable:$true] %s3691_s6 }
0x11b8   :  { %s4579_s26 = scalar_lea.vmem %s3692_s6, 64  ;;  %p4584_p9 = scmp.lt.s32.totalorder %s3692_s6, %s3692_s6 }
0x11b9   :  { %p4580_p8 = scmp.ne.s32.totalorder %s3692_s6, %s4579_s26  ;;  %p4585_p10 = scmp.lt.s32.totalorder %s4579_s26, %s4579_s26 }
0x11bb   :  { %p4586_p11 = por %p4585_p10, %p4584_p9 }
0x11bd   :  { %p4587_p12 = pnand %p4586_p11, %p4580_p8 }
0x11bf   :  { %4590 = shalt.err (!%p4587_p12)
}
0x11c0   :  { %s4591_s9 = scalar_lea.hbm %s5899_s13, 64 }
0x11c1   :  { %p4592_p13 = scmp.ne.s32.totalorder %s5899_s13, %s4591_s9  ;;  %p4595_p0 = scmp.lt.u32.totalorder %s4591_s9, %s5899_s13 }
0x11c3   :  { %p4597_p1 = pnand %p4595_p0, %p4592_p13 }
0x11c5   :  { %4600 = shalt.err (!%p4597_p1)
}
0x11c6   :  { %3697 = dma.vmem_to_hbm [thread:$0]  %s3692_s6, 64, %s5899_s13, [#allocation18], %s4636_s18, %s4636_s18, %s4637_s19  }
0x11c7   :  { %v3864_v52 = vld [vmem:[%s5896_s10] ss:$0 sm:$0xff]  ;;  %s4656_s2 = smov [#allocation16]  }
0x11c8   :  { %s3667_s3 = sshll.u32 %s4656_s2, 4  ;;  %s3668_s3 = int_to_ptr.vmem [resolvable:$true] %s3667_s3 }
0x11c9   :  { %s4601_s4 = scalar_lea.vmem %s3668_s3, 64  ;;  %p4606_p3 = scmp.lt.s32.totalorder %s3668_s3, %s3668_s3 }
0x11ca   :  { %p4602_p2 = scmp.ne.s32.totalorder %s3668_s3, %s4601_s4  ;;  %p4607_p4 = scmp.lt.s32.totalorder %s4601_s4, %s4601_s4 }
0x11cc   :  { %p4608_p5 = por %p4607_p4, %p4606_p3 }
0x11ce   :  { %p4609_p6 = pnand %p4608_p5, %p4602_p2 }
0x1280   :  { %v3643_v51 = vpop.f32.mrb[68].mxu0 }
0x1281   :  { %v3644_v27 = vadd.f32 %v3864_v52, %v3643_v51  ;;  %v3901_v34 = vpop.f32.mrb[69].mxu0 }
0x1282   :  { %v3646_v53 = vpop.f32.mrb[70].mxu0 }
0x1283   :  { %v3656_v18 = vrot.slane %v3644_v27, %v4993_v35  ;;  %3873 = vst.sshfl [vmem:[#allocation16] sm:$0x3 pattern:$0x76325410] %v3644_v27  ;;  %v3902_v60 = vpop.f32.mrb[71].mxu0 }
0x1285   :  { %v3657_v57 = vcombine.high %v3656_v18, %v3656_v18 }
0x1287   :  { %3661 = vst [vmem:[#allocation16 + $0x2] sm:$0x3] %v3657_v57 }
0x1288   :  { %4612 = shalt.err (!%p4609_p6)
}
0x1289   :  { %s4613_s24 = scalar_lea.hbm %s5897_s11, 64 }
0x128a   :  { %p4614_p7 = scmp.ne.s32.totalorder %s5897_s11, %s4613_s24  ;;  %p4617_p8 = scmp.lt.u32.totalorder %s4613_s24, %s5897_s11 }
0x128c   :  { %p4619_p9 = pnand %p4617_p8, %p4614_p7 }
0x128e   :  { %4622 = shalt.err (!%p4619_p9)
}
0x128f   :  { %3673 = dma.vmem_to_hbm [thread:$0]  %s3668_s3, 64, %s5897_s11, [#allocation6], %s4636_s18, %s4636_s18, %s4637_s19  }
0x1290   :  { %4631 = dma.done.wait [#allocation6], 64  }
0x1291   :  { %4632 = vsyncadd [#allocation6], 4294967232 }
0x1292   :  { %4633 = dma.done.wait [#allocation18], 128  }
0x1293   :  { %4634 = vsyncadd [#allocation18], 4294967168 }
0x1294   :  { %3707 = vsyncpa [#allocation5], 1 }
0x1295   :  { %3708 = vsyncpa [#allocation8], 1 }
0x1296   :  { %3709 = vsyncpa [#allocation11], 1 }
0x1297   :  { %3710 = vsyncpa [#allocation14], 1 }
0x1298   :  { %3711 = vsyncpa [#allocation6], 1 }
0x1299   :  { %3712 = vsyncpa [#allocation18], 1 }

</bundles_post_ra>
